<compile_context>
chip_gen: v7x
topology: tpu7x:2x2x1
jax: 0.10.0
libtpu: 0.0.40
codegen_flags: <defaults>
</compile_context>

<pallas_src>
import jax
import jax.numpy as jnp
from jax import lax
from jax.experimental import pallas as pl
from jax.experimental.pallas import tpu as pltpu

# ----------------------------- model hyper-params -----------------------------
HIDDEN_DIM = 32
RANDOM_VEC_DIM = 8
RANDOM_VEC_STD = 1.0
EMB_DIM = HIDDEN_DIM - RANDOM_VEC_DIM          # AtomEncoder / BondEncoder emb dim
TARGET_DIM = 4
PROPAGATION_DEPTH = 3
READOUT_HIDDEN_DIM = HIDDEN_DIM
AVG_D_LOG = 1.0                                # avg_d = {'log': 1.0}
PNA_EPS = 1e-5                                 # epsilon inside the std aggregator

AGGREGATORS = ("mean", "max", "min", "std")
SCALERS = ("identity", "amplification", "attenuation")
READOUT_AGGREGATORS = ("sum", "mean", "max")

ATOM_VOCABS = (10, 5, 4)                       # synthetic categorical atom features
BOND_VOCABS = (6, 4)                           # synthetic categorical bond features

PRE_IN = 3 * HIDDEN_DIM                                          # pretrans input dim
POST_IN = (len(AGGREGATORS) * len(SCALERS) + 1) * HIDDEN_DIM     # posttrans input dim (13H)
RO_IN = len(READOUT_AGGREGATORS) * HIDDEN_DIM                    # readout dim (3H)


# ----------------------------- fused Pallas kernel -----------------------------
def _pna_fused_kernel(h0_ref, ef_ref, src_oh_ref, dst_mask_ref, deg_ref,
                      gmask_ref, cnt_ref,
                      pre_w_src_ref, pre_w_dst_ref, pre_w_ef_ref, pre_b_ref,
                      post_w_h_ref, post_w_id_ref, post_w_amp_ref, post_w_att_ref,
                      post_b_ref,
                      out_w1_ref, out_b1_ref, out_w2_ref, out_b2_ref,
                      o_ref):
    """Whole PNARandom forward for one batched graph, resident in VMEM.

    h0:        (N, H)  f32   encoded node features (atom emb ++ random vec)
    ef:        (E, H)  f32   encoded edge features (bond emb ++ random vec), layer-constant
    src_oh:    (E, N)  bf16  one-hot of edge source          (h[src] = src_oh @ h)
    dst_mask:  (N, E)  bf16  dst_mask[i,j] = 1 iff dst(edge j)==node i
                             (segment sums, h[dst] gather via transposed matmul, add-mask)
    deg:       (N, 1)  f32   in-degree        gmask: (B, N) bf16    cnt: (B, 1) f32
    weights:   per-layer pretrans/posttrans split into (H,H)/(4H,H) bf16 blocks + readout MLP
    o:         (B, TARGET_DIM) f32
    """
    H = HIDDEN_DIM
    L = PROPAGATION_DEPTH
    f32 = jnp.float32
    bf16 = jnp.bfloat16
    big = f32(3.0e38)

    h = h0_ref[...]                                    # (N, H) f32 — carried across layers
    src_oh = src_oh_ref[...]                           # (E, N) bf16
    dst_mask = dst_mask_ref[...]                       # (N, E) bf16
    dst_mask_f = dst_mask.astype(f32)

    deg_raw = deg_ref[...]                             # (N, 1)
    deg = jnp.maximum(deg_raw, 1.0)                    # zero-degree safe
    has_edges = deg_raw > 0.0                          # (N, 1)
    # Exact reciprocals on tiny (N,1) tensors (parity; approx EUP recip not worth it here).
    inv_deg = 1.0 / deg
    logd = jnp.log(deg + 1.0)
    scale_amp = logd * f32(1.0 / AVG_D_LOG)            # amplification scaler
    scale_att = f32(AVG_D_LOG) / logd                  # attenuation scaler

    # Additive mask for masked max/min over incoming edges: 0 where dst(edge)==node,
    # -BIG elsewhere.  Built ONCE, reused every layer.  (N, E, 1)
    addmask = ((dst_mask_f - 1.0) * big)[:, :, None]

    # ef is layer-constant: hoist its pretrans projection (+bias) off the serial h chain.
    ef_bf = ef_ref[...].astype(bf16)                   # (E, H)
    ef_proj = [jnp.dot(ef_bf, pre_w_ef_ref[l], preferred_element_type=f32) + pre_b_ref[l]
               for l in range(L)]                      # L x (E, H) f32

    # ---------------- PNALayer stack (residual, ef constant) -------------------
    for l in range(L):
        h_bf = h.astype(bf16)

        # Gather h[src], h[dst] on the MXU.  h[dst] contracts dst_mask's node axis
        # directly (transposed matmul) so no separate (E,N) dst one-hot is shipped.
        h_src = jnp.dot(src_oh, h_bf, preferred_element_type=f32)           # (E, H)
        h_dst = lax.dot_general(dst_mask, h_bf,
                                dimension_numbers=(((0,), (0,)), ((), ())),
                                preferred_element_type=f32)                 # (E, H)

        # pretrans (single linear, split weights — no 3H concat):
        #   msg = h_src@W_src + h_dst@W_dst + (ef@W_ef + b)
        msg = (jnp.dot(h_src.astype(bf16), pre_w_src_ref[l], preferred_element_type=f32)
               + jnp.dot(h_dst.astype(bf16), pre_w_dst_ref[l], preferred_element_type=f32)
               + ef_proj[l])                                                # (E, H)

        # --- PNA aggregation: [mean, max, min, std] ---
        # sum(e) and sum(e^2) share one segment-sum matmul (2H = 64 lanes).
        m2 = jnp.concatenate([msg, msg * msg], axis=-1).astype(bf16)        # (E, 2H)
        sums = jnp.dot(dst_mask, m2, preferred_element_type=f32)            # (N, 2H)
        mean = sums[:, :H] * inv_deg
        mean_sq = sums[:, H:] * inv_deg
        std = jnp.sqrt(jnp.maximum(mean_sq - mean * mean, 0.0) + PNA_EPS)

        # Masked max AND min in ONE packed pass: [msg, -msg] along lanes, single
        # (N,E,2H) broadcast-add + single max reduce.
        mp = jnp.concatenate([msg, -msg], axis=-1)                          # (E, 2H) f32
        red = jnp.max(mp[None, :, :] + addmask, axis=1)                     # (N, 2H)
        mx = jnp.where(has_edges, red[:, :H], 0.0)
        mn = jnp.where(has_edges, -red[:, H:], 0.0)

        agg = jnp.concatenate([mean, mx, mn, std], axis=-1).astype(bf16)    # (N, 4H=128)

        # posttrans (split weights; row scalers commute with the matmul) + residual.
        h = (h
             + jnp.dot(h_bf, post_w_h_ref[l], preferred_element_type=f32)
             + jnp.dot(agg, post_w_id_ref[l], preferred_element_type=f32)
             + scale_amp * jnp.dot(agg, post_w_amp_ref[l], preferred_element_type=f32)
             + scale_att * jnp.dot(agg, post_w_att_ref[l], preferred_element_type=f32)
             + post_b_ref[l])                                               # (N, H)

    # ---------------- graph readout: [sum, mean, max] --------------------------
    gmask = gmask_ref[...]                             # (B, N) bf16
    cnt_raw = cnt_ref[...]                             # (B, 1)
    cnt = jnp.maximum(cnt_raw, 1.0)
    has_nodes = cnt_raw > 0.0

    h_bf = h.astype(bf16)
    s = jnp.dot(gmask, h_bf, preferred_element_type=f32)          # (B, H)  sum
    mean_g = s * (1.0 / cnt)                                      # (B, H)  mean
    g_add = ((gmask.astype(f32) - 1.0) * big)[:, :, None]         # (B, N, 1)
    mx_g = jnp.max(h[None, :, :] + g_add, axis=1)                 # (B, H)  max
    mx_g = jnp.where(has_nodes, mx_g, 0.0)

    # output MLP: (3H -> H, relu) then (H -> target).  out_w1 consumed as three (H,H)
    # row-blocks (sublane slices) so the 3H readout concat is never materialized.
    # TODO(synk): readout_batchnorm (nn.BatchNorm1d) omitted — config sets it to False.
    w1 = out_w1_ref[...]                                          # (3H, H) bf16
    hid = (jnp.dot(s.astype(bf16), w1[0:H, :], preferred_element_type=f32)
           + jnp.dot(mean_g.astype(bf16), w1[H:2 * H, :], preferred_element_type=f32)
           + jnp.dot(mx_g.astype(bf16), w1[2 * H:3 * H, :], preferred_element_type=f32)
           + out_b1_ref[...])
    hid = jnp.maximum(hid, 0.0)
    o_ref[...] = (jnp.dot(hid.astype(bf16), out_w2_ref[...], preferred_element_type=f32)
                  + out_b2_ref[...])


def _fused_forward(h0, ef, src_oh, dst_mask, deg, gmask, cnt, w):
    n_nodes, h_dim = h0.shape
    n_edges = ef.shape[0]
    n_graphs = gmask.shape[0]
    L = PROPAGATION_DEPTH
    H = HIDDEN_DIM

    def full(shape):
        return pl.BlockSpec(shape, lambda i, _n=len(shape): (0,) * _n)

    # TODO(synk): at realistic sizes add (a) a 'parallel' grid axis over block-diagonal
    # graph batches (uses v7x's 2nd TensorCore, fills 128/256 MXU tiles) and (b) an
    # edge-chunked 'arbitrary' axis with BlockSpecs on src_oh/dst_mask so the O(E*N)
    # mask DMA is double-buffered and the (N,E,2H) max/min intermediate is bounded
    # (v7x VMEM is 64 MiB, half of v5e/v6e).  At this toy size one resident step suffices.
    return pl.pallas_call(
        _pna_fused_kernel,
        out_shape=jax.ShapeDtypeStruct((n_graphs, TARGET_DIM), jnp.float32),
        grid=(1,),
        in_specs=[
            full((n_nodes, h_dim)),                 # h0         f32
            full((n_edges, h_dim)),                 # ef         f32
            full((n_edges, n_nodes)),               # src_oh     bf16
            full((n_nodes, n_edges)),               # dst_mask   bf16
            full((n_nodes, 1)),                     # deg        f32
            full((n_graphs, n_nodes)),              # gmask      bf16
            full((n_graphs, 1)),                    # cnt        f32
            full((L, H, H)),                        # pre_w_src  bf16
            full((L, H, H)),                        # pre_w_dst  bf16
            full((L, H, H)),                        # pre_w_ef   bf16
            full((L, 1, H)),                        # pre_b      f32
            full((L, H, H)),                        # post_w_h   bf16
            full((L, 4 * H, H)),                    # post_w_id  bf16
            full((L, 4 * H, H)),                    # post_w_amp bf16
            full((L, 4 * H, H)),                    # post_w_att bf16
            full((L, 1, H)),                        # post_b     f32
            full((RO_IN, READOUT_HIDDEN_DIM)),      # out_w1     bf16
            full((1, READOUT_HIDDEN_DIM)),          # out_b1     f32
            full((READOUT_HIDDEN_DIM, TARGET_DIM)), # out_w2     bf16
            full((1, TARGET_DIM)),                  # out_b2     f32
        ],
        out_specs=pl.BlockSpec((n_graphs, TARGET_DIM), lambda i: (0, 0)),
        compiler_params=pltpu.CompilerParams(
            dimension_semantics=("arbitrary",),
            # v5e scoped-VMEM default is only 16 MiB; 32 MiB is safe on v5e/v6e/v7x.
            vmem_limit_bytes=32 * 1024 * 1024),
    )(h0, ef, src_oh, dst_mask, deg, gmask, cnt,
      w["pre_w_src"], w["pre_w_dst"], w["pre_w_ef"], w["pre_b"],
      w["post_w_h"], w["post_w_id"], w["post_w_amp"], w["post_w_att"], w["post_b"],
      w["out_w1"], w["out_b1"], w["out_w2"], w["out_b2"])


# ----------------------------- glue (plain JAX) --------------------------------
def _encode(tables, feat_int):
    """OGB-style Atom/Bond encoder: sum of per-column embedding lookups."""
    out = jnp.zeros((feat_int.shape[0], EMB_DIM), jnp.float32)
    for c, tab in enumerate(tables):
        out = out + jnp.take(tab, feat_int[:, c], axis=0)
    return out


def init_params(key):
    ks = jax.random.split(key, 8)

    def dense(k, fan_in, fan_out):
        return (jax.random.normal(k, (fan_in, fan_out), jnp.float32)
                / jnp.sqrt(jnp.float32(fan_in)))

    params = {
        "atom_emb": [0.1 * jax.random.normal(jax.random.fold_in(ks[0], c), (v, EMB_DIM),
                                             jnp.float32)
                     for c, v in enumerate(ATOM_VOCABS)],
        "bond_emb": [0.1 * jax.random.normal(jax.random.fold_in(ks[1], c), (v, EMB_DIM),
                                             jnp.float32)
                     for c, v in enumerate(BOND_VOCABS)],
        # per-layer pretrans / posttrans linears (module layout); split for the kernel
        "pre_w": jnp.stack([dense(jax.random.fold_in(ks[2], l), PRE_IN, HIDDEN_DIM)
                            for l in range(PROPAGATION_DEPTH)]),
        "pre_b": jnp.zeros((PROPAGATION_DEPTH, 1, HIDDEN_DIM), jnp.float32),
        "post_w": jnp.stack([dense(jax.random.fold_in(ks[3], l), POST_IN, HIDDEN_DIM)
                             for l in range(PROPAGATION_DEPTH)]),
        "post_b": jnp.zeros((PROPAGATION_DEPTH, 1, HIDDEN_DIM), jnp.float32),
        # readout MLP: layers=2 -> (3H -> H, relu), (H -> target, none)
        "out_w1": dense(ks[4], RO_IN, READOUT_HIDDEN_DIM),
        "out_b1": jnp.zeros((1, READOUT_HIDDEN_DIM), jnp.float32),
        "out_w2": dense(ks[5], READOUT_HIDDEN_DIM, TARGET_DIM),
        "out_b2": jnp.zeros((1, TARGET_DIM), jnp.float32),
    }
    return params


def pna_random_forward(params, node_feat, edge_feat, src, dst, graph_ids, n_graphs, rng_key):
    n_nodes = node_feat.shape[0]
    n_edges = edge_feat.shape[0]
    H = HIDDEN_DIM

    # torch.distributions.Normal(0, std).sample(...)  ->  jax.random.normal glue
    k1, k2 = jax.random.split(rng_key)
    rand_x = RANDOM_VEC_STD * jax.random.normal(k1, (n_nodes, RANDOM_VEC_DIM), jnp.float32)
    rand_edge = RANDOM_VEC_STD * jax.random.normal(k2, (n_edges, RANDOM_VEC_DIM), jnp.float32)

    # AtomEncoder / BondEncoder + concat with random vectors
    h0 = jnp.concatenate([_encode(params["atom_emb"], node_feat), rand_x], axis=-1)     # (N, H)
    ef = jnp.concatenate([_encode(params["bond_emb"], edge_feat), rand_edge], axis=-1)  # (E, H)

    # One-hot masks replacing DGL's message-passing bookkeeping, built directly in bf16
    # (exact 0/1) — used in-kernel on the MXU.  dst info is shipped once, as (N, E).
    node_iota = jnp.arange(n_nodes, dtype=jnp.int32)
    src_oh = (src[:, None] == node_iota[None, :]).astype(jnp.bfloat16)      # (E, N)
    dst_mask = (node_iota[:, None] == dst[None, :]).astype(jnp.bfloat16)    # (N, E)
    deg = jnp.sum((node_iota[:, None] == dst[None, :]).astype(jnp.float32),
                  axis=1, keepdims=True)                                     # (N, 1)

    gsel = (jnp.arange(n_graphs, dtype=jnp.int32)[:, None] == graph_ids[None, :])
    gmask = gsel.astype(jnp.bfloat16)                                        # (B, N)
    cnt = jnp.sum(gsel.astype(jnp.float32), axis=1, keepdims=True)           # (B, 1)

    # Split pretrans/posttrans weights into blocks so the kernel avoids 3H/13H lane
    # concats; matmul operands pre-cast to bf16 on the host (f32 accumulation in-kernel).
    bf = lambda x: x.astype(jnp.bfloat16)
    pre_w, post_w = params["pre_w"], params["post_w"]
    w = {
        "pre_w_src": bf(pre_w[:, 0:H, :]),
        "pre_w_dst": bf(pre_w[:, H:2 * H, :]),
        "pre_w_ef": bf(pre_w[:, 2 * H:3 * H, :]),
        "pre_b": params["pre_b"],
        "post_w_h": bf(post_w[:, 0:H, :]),
        "post_w_id": bf(post_w[:, H:5 * H, :]),
        "post_w_amp": bf(post_w[:, 5 * H:9 * H, :]),
        "post_w_att": bf(post_w[:, 9 * H:13 * H, :]),
        "post_b": params["post_b"],
        "out_w1": bf(params["out_w1"]), "out_b1": params["out_b1"],
        "out_w2": bf(params["out_w2"]), "out_b2": params["out_b2"],
    }
    return _fused_forward(h0, ef, src_oh, dst_mask, deg, gmask, cnt, w)


# ----------------------------- demo -------------------------------------------
if __name__ == "__main__":
    key = jax.random.PRNGKey(0)
    kp, kn, ke, kr = jax.random.split(key, 4)
    params = init_params(kp)

    # Synthetic batched graph: 2 graphs of 8 nodes, bidirectional ring edges.
    n_graphs = 2
    nodes_per_graph = 8
    n_nodes = n_graphs * nodes_per_graph
    srcs, dsts, gids = [], [], []
    for g in range(n_graphs):
        base = g * nodes_per_graph
        for i in range(nodes_per_graph):
            j = (i + 1) % nodes_per_graph
            srcs += [base + i, base + j]
            dsts += [base + j, base + i]
        gids += [g] * nodes_per_graph
    src = jnp.array(srcs, jnp.int32)
    dst = jnp.array(dsts, jnp.int32)
    graph_ids = jnp.array(gids, jnp.int32)
    n_edges = int(src.shape[0])

    node_feat = jnp.stack(
        [jax.random.randint(jax.random.fold_in(kn, c), (n_nodes,), 0, v)
         for c, v in enumerate(ATOM_VOCABS)], axis=1).astype(jnp.int32)      # (16, 3)
    edge_feat = jnp.stack(
        [jax.random.randint(jax.random.fold_in(ke, c), (n_edges,), 0, v)
         for c, v in enumerate(BOND_VOCABS)], axis=1).astype(jnp.int32)      # (32, 2)

    forward = jax.jit(pna_random_forward, static_argnames=("n_graphs",))
    out = forward(params, node_feat, edge_feat, src, dst, graph_ids,
                  n_graphs=n_graphs, rng_key=kr)
    out = jax.block_until_ready(out)

    assert out.shape == (n_graphs, TARGET_DIM), out.shape
    assert bool(jnp.all(jnp.isfinite(out)))
    print("KERNEL_OK")
</pallas_src>

<mosaic_0001>
module attributes {stable_mosaic.version = 11 : i64} {
  func.func @_pna_fused_kernel(%arg0: i32, %arg1: memref<16x32xf32, #tpu.memory_space<vmem>>, %arg2: memref<32x32xf32, #tpu.memory_space<vmem>>, %arg3: memref<32x16xbf16, #tpu.memory_space<vmem>>, %arg4: memref<16x32xbf16, #tpu.memory_space<vmem>>, %arg5: memref<16x1xf32, #tpu.memory_space<vmem>>, %arg6: memref<2x16xbf16, #tpu.memory_space<vmem>>, %arg7: memref<2x1xf32, #tpu.memory_space<vmem>>, %arg8: memref<3x32x32xbf16, #tpu.memory_space<vmem>>, %arg9: memref<3x32x32xbf16, #tpu.memory_space<vmem>>, %arg10: memref<3x32x32xbf16, #tpu.memory_space<vmem>>, %arg11: memref<3x1x32xf32, #tpu.memory_space<vmem>>, %arg12: memref<3x32x32xbf16, #tpu.memory_space<vmem>>, %arg13: memref<3x128x32xbf16, #tpu.memory_space<vmem>>, %arg14: memref<3x128x32xbf16, #tpu.memory_space<vmem>>, %arg15: memref<3x128x32xbf16, #tpu.memory_space<vmem>>, %arg16: memref<3x1x32xf32, #tpu.memory_space<vmem>>, %arg17: memref<96x32xbf16, #tpu.memory_space<vmem>>, %arg18: memref<1x32xf32, #tpu.memory_space<vmem>>, %arg19: memref<32x4xbf16, #tpu.memory_space<vmem>>, %arg20: memref<1x4xf32, #tpu.memory_space<vmem>>, %arg21: memref<2x4xf32, #tpu.memory_space<vmem>>) attributes {dimension_semantics = [#tpu.dimension_semantics<arbitrary>], iteration_bounds = array<i64: 1>, scalar_prefetch = 0 : i64, scratch_operands = 0 : i64, tpu.core_type = #tpu.core_type<tc>, window_params = [{pipeline_mode = #tpu.pipeline_mode<synchronous>, transform_indices = @transform_0, window_bounds = array<i64: 16, 32>}, {pipeline_mode = #tpu.pipeline_mode<synchronous>, transform_indices = @transform_1, window_bounds = array<i64: 32, 32>}, {pipeline_mode = #tpu.pipeline_mode<synchronous>, transform_indices = @transform_2, window_bounds = array<i64: 32, 16>}, {pipeline_mode = #tpu.pipeline_mode<synchronous>, transform_indices = @transform_3, window_bounds = array<i64: 16, 32>}, {pipeline_mode = #tpu.pipeline_mode<synchronous>, transform_indices = @transform_4, window_bounds = array<i64: 16, 1>}, {pipeline_mode = #tpu.pipeline_mode<synchronous>, transform_indices = @transform_5, window_bounds = array<i64: 2, 16>}, {pipeline_mode = #tpu.pipeline_mode<synchronous>, transform_indices = @transform_6, window_bounds = array<i64: 2, 1>}, {pipeline_mode = #tpu.pipeline_mode<synchronous>, transform_indices = @transform_7, window_bounds = array<i64: 3, 32, 32>}, {pipeline_mode = #tpu.pipeline_mode<synchronous>, transform_indices = @transform_8, window_bounds = array<i64: 3, 32, 32>}, {pipeline_mode = #tpu.pipeline_mode<synchronous>, transform_indices = @transform_9, window_bounds = array<i64: 3, 32, 32>}, {pipeline_mode = #tpu.pipeline_mode<synchronous>, transform_indices = @transform_10, window_bounds = array<i64: 3, 1, 32>}, {pipeline_mode = #tpu.pipeline_mode<synchronous>, transform_indices = @transform_11, window_bounds = array<i64: 3, 32, 32>}, {pipeline_mode = #tpu.pipeline_mode<synchronous>, transform_indices = @transform_12, window_bounds = array<i64: 3, 128, 32>}, {pipeline_mode = #tpu.pipeline_mode<synchronous>, transform_indices = @transform_13, window_bounds = array<i64: 3, 128, 32>}, {pipeline_mode = #tpu.pipeline_mode<synchronous>, transform_indices = @transform_14, window_bounds = array<i64: 3, 128, 32>}, {pipeline_mode = #tpu.pipeline_mode<synchronous>, transform_indices = @transform_15, window_bounds = array<i64: 3, 1, 32>}, {pipeline_mode = #tpu.pipeline_mode<synchronous>, transform_indices = @transform_16, window_bounds = array<i64: 96, 32>}, {pipeline_mode = #tpu.pipeline_mode<synchronous>, transform_indices = @transform_17, window_bounds = array<i64: 1, 32>}, {pipeline_mode = #tpu.pipeline_mode<synchronous>, transform_indices = @transform_18, window_bounds = array<i64: 32, 4>}, {pipeline_mode = #tpu.pipeline_mode<synchronous>, transform_indices = @transform_19, window_bounds = array<i64: 1, 4>}, {pipeline_mode = #tpu.pipeline_mode<synchronous>, transform_indices = @transform_20, window_bounds = array<i64: 2, 4>}]} {
    %c0 = arith.constant 0 : index
    %c0_0 = arith.constant 0 : index
    %0 = vector.load %arg1[%c0, %c0_0] : memref<16x32xf32, #tpu.memory_space<vmem>>, vector<16x32xf32>
    %c0_1 = arith.constant 0 : index
    %c0_2 = arith.constant 0 : index
    %1 = vector.load %arg3[%c0_1, %c0_2] : memref<32x16xbf16, #tpu.memory_space<vmem>>, vector<32x16xbf16>
    %c0_3 = arith.constant 0 : index
    %c0_4 = arith.constant 0 : index
    %2 = vector.load %arg4[%c0_3, %c0_4] : memref<16x32xbf16, #tpu.memory_space<vmem>>, vector<16x32xbf16>
    %3 = arith.extf %2 : vector<16x32xbf16> to vector<16x32xf32>
    %c0_5 = arith.constant 0 : index
    %c0_6 = arith.constant 0 : index
    %4 = vector.load %arg5[%c0_5, %c0_6] : memref<16x1xf32, #tpu.memory_space<vmem>>, vector<16x1xf32>
    %cst = arith.constant 1.000000e+00 : f32
    %5 = vector.broadcast %cst : f32 to vector<16x1xf32>
    %6 = arith.maximumf %4, %5 : vector<16x1xf32>
    %cst_7 = arith.constant 0.000000e+00 : f32
    %7 = vector.broadcast %cst_7 : f32 to vector<16x1xf32>
    %8 = arith.cmpf ogt, %4, %7 : vector<16x1xf32>
    %cst_8 = arith.constant 1.000000e+00 : f32
    %9 = vector.broadcast %cst_8 : f32 to vector<16x1xf32>
    %10 = arith.divf %9, %6 : vector<16x1xf32>
    %cst_9 = arith.constant 1.000000e+00 : f32
    %11 = vector.broadcast %cst_9 : f32 to vector<16x1xf32>
    %12 = arith.addf %6, %11 : vector<16x1xf32>
    %13 = math.log %12 : vector<16x1xf32>
    %cst_10 = arith.constant 1.000000e+00 : f32
    %14 = vector.broadcast %cst_10 : f32 to vector<16x1xf32>
    %15 = arith.mulf %13, %14 : vector<16x1xf32>
    %cst_11 = arith.constant 1.000000e+00 : f32
    %16 = vector.broadcast %cst_11 : f32 to vector<16x1xf32>
    %17 = arith.divf %16, %13 : vector<16x1xf32>
    %cst_12 = arith.constant 1.000000e+00 : f32
    %18 = vector.broadcast %cst_12 : f32 to vector<16x32xf32>
    %19 = arith.subf %3, %18 : vector<16x32xf32>
    %cst_13 = arith.constant 3.000000e+38 : f32
    %20 = vector.broadcast %cst_13 : f32 to vector<16x32xf32>
    %21 = arith.mulf %19, %20 : vector<16x32xf32>
    %22 = vector.shape_cast %21 : vector<16x32xf32> to vector<16x32x1xf32>
    %c0_14 = arith.constant 0 : index
    %c0_15 = arith.constant 0 : index
    %23 = vector.load %arg2[%c0_14, %c0_15] : memref<32x32xf32, #tpu.memory_space<vmem>>, vector<32x32xf32>
    %24 = arith.truncf %23 : vector<32x32xf32> to vector<32x32xbf16>
    %c0_16 = arith.constant 0 : index
    %c0_17 = arith.constant 0 : index
    %c0_18 = arith.constant 0 : index
    %25 = vector.load %arg10[%c0_16, %c0_17, %c0_18] : memref<3x32x32xbf16, #tpu.memory_space<vmem>>, vector<1x32x32xbf16>
    %26 = vector.shape_cast %25 : vector<1x32x32xbf16> to vector<32x32xbf16>
    %cst_19 = arith.constant dense<0.000000e+00> : vector<32x32xf32>
    %27 = tpu.matmul %24, %26, %cst_19 {dimension_numbers = #tpu.dot_dimension_numbers<[1], [0], [0], [1], [0, 0, 1, 1], [], []>} : vector<32x32xbf16>, vector<32x32xbf16>, vector<32x32xf32> -> vector<32x32xf32>
    %c0_20 = arith.constant 0 : index
    %c0_21 = arith.constant 0 : index
    %c0_22 = arith.constant 0 : index
    %28 = vector.load %arg11[%c0_20, %c0_21, %c0_22] : memref<3x1x32xf32, #tpu.memory_space<vmem>>, vector<1x1x32xf32>
    %29 = vector.shape_cast %28 : vector<1x1x32xf32> to vector<1x32xf32>
    %30 = vector.broadcast %29 : vector<1x32xf32> to vector<32x32xf32>
    %31 = arith.addf %27, %30 : vector<32x32xf32>
    %c1 = arith.constant 1 : index
    %c0_23 = arith.constant 0 : index
    %c0_24 = arith.constant 0 : index
    %32 = vector.load %arg10[%c1, %c0_23, %c0_24] : memref<3x32x32xbf16, #tpu.memory_space<vmem>>, vector<1x32x32xbf16>
    %33 = vector.shape_cast %32 : vector<1x32x32xbf16> to vector<32x32xbf16>
    %cst_25 = arith.constant dense<0.000000e+00> : vector<32x32xf32>
    %34 = tpu.matmul %24, %33, %cst_25 {dimension_numbers = #tpu.dot_dimension_numbers<[1], [0], [0], [1], [0, 0, 1, 1], [], []>} : vector<32x32xbf16>, vector<32x32xbf16>, vector<32x32xf32> -> vector<32x32xf32>
    %c1_26 = arith.constant 1 : index
    %c0_27 = arith.constant 0 : index
    %c0_28 = arith.constant 0 : index
    %35 = vector.load %arg11[%c1_26, %c0_27, %c0_28] : memref<3x1x32xf32, #tpu.memory_space<vmem>>, vector<1x1x32xf32>
    %36 = vector.shape_cast %35 : vector<1x1x32xf32> to vector<1x32xf32>
    %37 = vector.broadcast %36 : vector<1x32xf32> to vector<32x32xf32>
    %38 = arith.addf %34, %37 : vector<32x32xf32>
    %c2 = arith.constant 2 : index
    %c0_29 = arith.constant 0 : index
    %c0_30 = arith.constant 0 : index
    %39 = vector.load %arg10[%c2, %c0_29, %c0_30] : memref<3x32x32xbf16, #tpu.memory_space<vmem>>, vector<1x32x32xbf16>
    %40 = vector.shape_cast %39 : vector<1x32x32xbf16> to vector<32x32xbf16>
    %cst_31 = arith.constant dense<0.000000e+00> : vector<32x32xf32>
    %41 = tpu.matmul %24, %40, %cst_31 {dimension_numbers = #tpu.dot_dimension_numbers<[1], [0], [0], [1], [0, 0, 1, 1], [], []>} : vector<32x32xbf16>, vector<32x32xbf16>, vector<32x32xf32> -> vector<32x32xf32>
    %c2_32 = arith.constant 2 : index
    %c0_33 = arith.constant 0 : index
    %c0_34 = arith.constant 0 : index
    %42 = vector.load %arg11[%c2_32, %c0_33, %c0_34] : memref<3x1x32xf32, #tpu.memory_space<vmem>>, vector<1x1x32xf32>
    %43 = vector.shape_cast %42 : vector<1x1x32xf32> to vector<1x32xf32>
    %44 = vector.broadcast %43 : vector<1x32xf32> to vector<32x32xf32>
    %45 = arith.addf %41, %44 : vector<32x32xf32>
    %46 = arith.truncf %0 : vector<16x32xf32> to vector<16x32xbf16>
    %cst_35 = arith.constant dense<0.000000e+00> : vector<32x32xf32>
    %47 = tpu.matmul %1, %46, %cst_35 {dimension_numbers = #tpu.dot_dimension_numbers<[1], [0], [0], [1], [0, 0, 1, 1], [], []>} : vector<32x16xbf16>, vector<16x32xbf16>, vector<32x32xf32> -> vector<32x32xf32>
    %cst_36 = arith.constant dense<0.000000e+00> : vector<32x32xf32>
    %48 = tpu.matmul %2, %46, %cst_36 {dimension_numbers = #tpu.dot_dimension_numbers<[0], [0], [1], [1], [0, 1, 1, 1], [], []>} : vector<16x32xbf16>, vector<16x32xbf16>, vector<32x32xf32> -> vector<32x32xf32>
    %49 = arith.truncf %47 : vector<32x32xf32> to vector<32x32xbf16>
    %c0_37 = arith.constant 0 : index
    %c0_38 = arith.constant 0 : index
    %c0_39 = arith.constant 0 : index
    %50 = vector.load %arg8[%c0_37, %c0_38, %c0_39] : memref<3x32x32xbf16, #tpu.memory_space<vmem>>, vector<1x32x32xbf16>
    %51 = vector.shape_cast %50 : vector<1x32x32xbf16> to vector<32x32xbf16>
    %cst_40 = arith.constant dense<0.000000e+00> : vector<32x32xf32>
    %52 = tpu.matmul %49, %51, %cst_40 {dimension_numbers = #tpu.dot_dimension_numbers<[1], [0], [0], [1], [0, 0, 1, 1], [], []>} : vector<32x32xbf16>, vector<32x32xbf16>, vector<32x32xf32> -> vector<32x32xf32>
    %53 = arith.truncf %48 : vector<32x32xf32> to vector<32x32xbf16>
    %c0_41 = arith.constant 0 : index
    %c0_42 = arith.constant 0 : index
    %c0_43 = arith.constant 0 : index
    %54 = vector.load %arg9[%c0_41, %c0_42, %c0_43] : memref<3x32x32xbf16, #tpu.memory_space<vmem>>, vector<1x32x32xbf16>
    %55 = vector.shape_cast %54 : vector<1x32x32xbf16> to vector<32x32xbf16>
    %cst_44 = arith.constant dense<0.000000e+00> : vector<32x32xf32>
    %56 = tpu.matmul %53, %55, %cst_44 {dimension_numbers = #tpu.dot_dimension_numbers<[1], [0], [0], [1], [0, 0, 1, 1], [], []>} : vector<32x32xbf16>, vector<32x32xbf16>, vector<32x32xf32> -> vector<32x32xf32>
    %57 = arith.addf %52, %56 : vector<32x32xf32>
    %58 = arith.addf %57, %31 : vector<32x32xf32>
    %59 = arith.mulf %58, %58 : vector<32x32xf32>
    %60 = tpu.concatenate %58, %59 in 1 : vector<32x32xf32>, vector<32x32xf32> -> vector<32x64xf32>
    %61 = arith.truncf %60 : vector<32x64xf32> to vector<32x64xbf16>
    %cst_45 = arith.constant dense<0.000000e+00> : vector<16x64xf32>
    %62 = tpu.matmul %2, %61, %cst_45 {dimension_numbers = #tpu.dot_dimension_numbers<[1], [0], [0], [1], [0, 0, 1, 1], [], []>} : vector<16x32xbf16>, vector<32x64xbf16>, vector<16x64xf32> -> vector<16x64xf32>
    %63 = vector.extract_strided_slice %62 {offsets = [0, 0], sizes = [16, 32], strides = [1, 1]} : vector<16x64xf32> to vector<16x32xf32>
    %64 = vector.broadcast %10 : vector<16x1xf32> to vector<16x32xf32>
    %65 = arith.mulf %63, %64 : vector<16x32xf32>
    %66 = vector.extract_strided_slice %62 {offsets = [0, 32], sizes = [16, 32], strides = [1, 1]} : vector<16x64xf32> to vector<16x32xf32>
    %67 = vector.broadcast %10 : vector<16x1xf32> to vector<16x32xf32>
    %68 = arith.mulf %66, %67 : vector<16x32xf32>
    %69 = arith.mulf %65, %65 : vector<16x32xf32>
    %70 = arith.subf %68, %69 : vector<16x32xf32>
    %cst_46 = arith.constant 0.000000e+00 : f32
    %71 = vector.broadcast %cst_46 : f32 to vector<16x32xf32>
    %72 = arith.maximumf %70, %71 : vector<16x32xf32>
    %cst_47 = arith.constant 9.99999974E-6 : f32
    %73 = vector.broadcast %cst_47 : f32 to vector<16x32xf32>
    %74 = arith.addf %72, %73 : vector<16x32xf32>
    %75 = math.sqrt %74 : vector<16x32xf32>
    %cst_48 = arith.constant 0.000000e+00 : f32
    %76 = vector.broadcast %cst_48 : f32 to vector<32x32xf32>
    %77 = arith.subf %76, %58 : vector<32x32xf32>
    %78 = tpu.concatenate %58, %77 in 1 : vector<32x32xf32>, vector<32x32xf32> -> vector<32x64xf32>
    %79 = vector.shape_cast %78 : vector<32x64xf32> to vector<1x32x64xf32>
    %80 = vector.broadcast %79 : vector<1x32x64xf32> to vector<16x32x64xf32>
    %81 = vector.broadcast %22 : vector<16x32x1xf32> to vector<16x32x64xf32>
    %82 = arith.addf %80, %81 : vector<16x32x64xf32>
    %cst_49 = arith.constant dense<0xFF800000> : vector<16x64xf32>
    %83 = vector.multi_reduction <maximumf>, %82, %cst_49 [1] : vector<16x32x64xf32> to vector<16x64xf32>
    %84 = vector.extract_strided_slice %83 {offsets = [0, 0], sizes = [16, 32], strides = [1, 1]} : vector<16x64xf32> to vector<16x32xf32>
    %cst_50 = arith.constant 0.000000e+00 : f32
    %85 = vector.shape_cast %8 : vector<16x1xi1> to vector<16x1xi1>
    %86 = vector.broadcast %85 : vector<16x1xi1> to vector<16x32xi1>
    %87 = vector.broadcast %cst_50 : f32 to vector<16x32xf32>
    %88 = arith.select %86, %84, %87 : vector<16x32xi1>, vector<16x32xf32>
    %89 = vector.extract_strided_slice %83 {offsets = [0, 32], sizes = [16, 32], strides = [1, 1]} : vector<16x64xf32> to vector<16x32xf32>
    %cst_51 = arith.constant 0.000000e+00 : f32
    %90 = vector.broadcast %cst_51 : f32 to vector<16x32xf32>
    %91 = arith.subf %90, %89 : vector<16x32xf32>
    %cst_52 = arith.constant 0.000000e+00 : f32
    %92 = vector.shape_cast %8 : vector<16x1xi1> to vector<16x1xi1>
    %93 = vector.broadcast %92 : vector<16x1xi1> to vector<16x32xi1>
    %94 = vector.broadcast %cst_52 : f32 to vector<16x32xf32>
    %95 = arith.select %93, %91, %94 : vector<16x32xi1>, vector<16x32xf32>
    %96 = tpu.concatenate %65, %88, %95, %75 in 1 : vector<16x32xf32>, vector<16x32xf32>, vector<16x32xf32>, vector<16x32xf32> -> vector<16x128xf32>
    %97 = arith.truncf %96 : vector<16x128xf32> to vector<16x128xbf16>
    %c0_53 = arith.constant 0 : index
    %c0_54 = arith.constant 0 : index
    %c0_55 = arith.constant 0 : index
    %98 = vector.load %arg12[%c0_53, %c0_54, %c0_55] : memref<3x32x32xbf16, #tpu.memory_space<vmem>>, vector<1x32x32xbf16>
    %99 = vector.shape_cast %98 : vector<1x32x32xbf16> to vector<32x32xbf16>
    %cst_56 = arith.constant dense<0.000000e+00> : vector<16x32xf32>
    %100 = tpu.matmul %46, %99, %cst_56 {dimension_numbers = #tpu.dot_dimension_numbers<[1], [0], [0], [1], [0, 0, 1, 1], [], []>} : vector<16x32xbf16>, vector<32x32xbf16>, vector<16x32xf32> -> vector<16x32xf32>
    %101 = arith.addf %0, %100 : vector<16x32xf32>
    %c0_57 = arith.constant 0 : index
    %c0_58 = arith.constant 0 : index
    %c0_59 = arith.constant 0 : index
    %102 = vector.load %arg13[%c0_57, %c0_58, %c0_59] : memref<3x128x32xbf16, #tpu.memory_space<vmem>>, vector<1x128x32xbf16>
    %103 = vector.shape_cast %102 : vector<1x128x32xbf16> to vector<128x32xbf16>
    %cst_60 = arith.constant dense<0.000000e+00> : vector<16x32xf32>
    %104 = tpu.matmul %97, %103, %cst_60 {dimension_numbers = #tpu.dot_dimension_numbers<[1], [0], [0], [1], [0, 0, 1, 1], [], []>} : vector<16x128xbf16>, vector<128x32xbf16>, vector<16x32xf32> -> vector<16x32xf32>
    %105 = arith.addf %101, %104 : vector<16x32xf32>
    %c0_61 = arith.constant 0 : index
    %c0_62 = arith.constant 0 : index
    %c0_63 = arith.constant 0 : index
    %106 = vector.load %arg14[%c0_61, %c0_62, %c0_63] : memref<3x128x32xbf16, #tpu.memory_space<vmem>>, vector<1x128x32xbf16>
    %107 = vector.shape_cast %106 : vector<1x128x32xbf16> to vector<128x32xbf16>
    %cst_64 = arith.constant dense<0.000000e+00> : vector<16x32xf32>
    %108 = tpu.matmul %97, %107, %cst_64 {dimension_numbers = #tpu.dot_dimension_numbers<[1], [0], [0], [1], [0, 0, 1, 1], [], []>} : vector<16x128xbf16>, vector<128x32xbf16>, vector<16x32xf32> -> vector<16x32xf32>
    %109 = vector.broadcast %15 : vector<16x1xf32> to vector<16x32xf32>
    %110 = arith.mulf %109, %108 : vector<16x32xf32>
    %111 = arith.addf %105, %110 : vector<16x32xf32>
    %c0_65 = arith.constant 0 : index
    %c0_66 = arith.constant 0 : index
    %c0_67 = arith.constant 0 : index
    %112 = vector.load %arg15[%c0_65, %c0_66, %c0_67] : memref<3x128x32xbf16, #tpu.memory_space<vmem>>, vector<1x128x32xbf16>
    %113 = vector.shape_cast %112 : vector<1x128x32xbf16> to vector<128x32xbf16>
    %cst_68 = arith.constant dense<0.000000e+00> : vector<16x32xf32>
    %114 = tpu.matmul %97, %113, %cst_68 {dimension_numbers = #tpu.dot_dimension_numbers<[1], [0], [0], [1], [0, 0, 1, 1], [], []>} : vector<16x128xbf16>, vector<128x32xbf16>, vector<16x32xf32> -> vector<16x32xf32>
    %115 = vector.broadcast %17 : vector<16x1xf32> to vector<16x32xf32>
    %116 = arith.mulf %115, %114 : vector<16x32xf32>
    %117 = arith.addf %111, %116 : vector<16x32xf32>
    %c0_69 = arith.constant 0 : index
    %c0_70 = arith.constant 0 : index
    %c0_71 = arith.constant 0 : index
    %118 = vector.load %arg16[%c0_69, %c0_70, %c0_71] : memref<3x1x32xf32, #tpu.memory_space<vmem>>, vector<1x1x32xf32>
    %119 = vector.shape_cast %118 : vector<1x1x32xf32> to vector<1x32xf32>
    %120 = vector.broadcast %119 : vector<1x32xf32> to vector<16x32xf32>
    %121 = arith.addf %117, %120 : vector<16x32xf32>
    %122 = arith.truncf %121 : vector<16x32xf32> to vector<16x32xbf16>
    %cst_72 = arith.constant dense<0.000000e+00> : vector<32x32xf32>
    %123 = tpu.matmul %1, %122, %cst_72 {dimension_numbers = #tpu.dot_dimension_numbers<[1], [0], [0], [1], [0, 0, 1, 1], [], []>} : vector<32x16xbf16>, vector<16x32xbf16>, vector<32x32xf32> -> vector<32x32xf32>
    %cst_73 = arith.constant dense<0.000000e+00> : vector<32x32xf32>
    %124 = tpu.matmul %2, %122, %cst_73 {dimension_numbers = #tpu.dot_dimension_numbers<[0], [0], [1], [1], [0, 1, 1, 1], [], []>} : vector<16x32xbf16>, vector<16x32xbf16>, vector<32x32xf32> -> vector<32x32xf32>
    %125 = arith.truncf %123 : vector<32x32xf32> to vector<32x32xbf16>
    %c1_74 = arith.constant 1 : index
    %c0_75 = arith.constant 0 : index
    %c0_76 = arith.constant 0 : index
    %126 = vector.load %arg8[%c1_74, %c0_75, %c0_76] : memref<3x32x32xbf16, #tpu.memory_space<vmem>>, vector<1x32x32xbf16>
    %127 = vector.shape_cast %126 : vector<1x32x32xbf16> to vector<32x32xbf16>
    %cst_77 = arith.constant dense<0.000000e+00> : vector<32x32xf32>
    %128 = tpu.matmul %125, %127, %cst_77 {dimension_numbers = #tpu.dot_dimension_numbers<[1], [0], [0], [1], [0, 0, 1, 1], [], []>} : vector<32x32xbf16>, vector<32x32xbf16>, vector<32x32xf32> -> vector<32x32xf32>
    %129 = arith.truncf %124 : vector<32x32xf32> to vector<32x32xbf16>
    %c1_78 = arith.constant 1 : index
    %c0_79 = arith.constant 0 : index
    %c0_80 = arith.constant 0 : index
    %130 = vector.load %arg9[%c1_78, %c0_79, %c0_80] : memref<3x32x32xbf16, #tpu.memory_space<vmem>>, vector<1x32x32xbf16>
    %131 = vector.shape_cast %130 : vector<1x32x32xbf16> to vector<32x32xbf16>
    %cst_81 = arith.constant dense<0.000000e+00> : vector<32x32xf32>
    %132 = tpu.matmul %129, %131, %cst_81 {dimension_numbers = #tpu.dot_dimension_numbers<[1], [0], [0], [1], [0, 0, 1, 1], [], []>} : vector<32x32xbf16>, vector<32x32xbf16>, vector<32x32xf32> -> vector<32x32xf32>
    %133 = arith.addf %128, %132 : vector<32x32xf32>
    %134 = arith.addf %133, %38 : vector<32x32xf32>
    %135 = arith.mulf %134, %134 : vector<32x32xf32>
    %136 = tpu.concatenate %134, %135 in 1 : vector<32x32xf32>, vector<32x32xf32> -> vector<32x64xf32>
    %137 = arith.truncf %136 : vector<32x64xf32> to vector<32x64xbf16>
    %cst_82 = arith.constant dense<0.000000e+00> : vector<16x64xf32>
    %138 = tpu.matmul %2, %137, %cst_82 {dimension_numbers = #tpu.dot_dimension_numbers<[1], [0], [0], [1], [0, 0, 1, 1], [], []>} : vector<16x32xbf16>, vector<32x64xbf16>, vector<16x64xf32> -> vector<16x64xf32>
    %139 = vector.extract_strided_slice %138 {offsets = [0, 0], sizes = [16, 32], strides = [1, 1]} : vector<16x64xf32> to vector<16x32xf32>
    %140 = vector.broadcast %10 : vector<16x1xf32> to vector<16x32xf32>
    %141 = arith.mulf %139, %140 : vector<16x32xf32>
    %142 = vector.extract_strided_slice %138 {offsets = [0, 32], sizes = [16, 32], strides = [1, 1]} : vector<16x64xf32> to vector<16x32xf32>
    %143 = vector.broadcast %10 : vector<16x1xf32> to vector<16x32xf32>
    %144 = arith.mulf %142, %143 : vector<16x32xf32>
    %145 = arith.mulf %141, %141 : vector<16x32xf32>
    %146 = arith.subf %144, %145 : vector<16x32xf32>
    %cst_83 = arith.constant 0.000000e+00 : f32
    %147 = vector.broadcast %cst_83 : f32 to vector<16x32xf32>
    %148 = arith.maximumf %146, %147 : vector<16x32xf32>
    %cst_84 = arith.constant 9.99999974E-6 : f32
    %149 = vector.broadcast %cst_84 : f32 to vector<16x32xf32>
    %150 = arith.addf %148, %149 : vector<16x32xf32>
    %151 = math.sqrt %150 : vector<16x32xf32>
    %cst_85 = arith.constant 0.000000e+00 : f32
    %152 = vector.broadcast %cst_85 : f32 to vector<32x32xf32>
    %153 = arith.subf %152, %134 : vector<32x32xf32>
    %154 = tpu.concatenate %134, %153 in 1 : vector<32x32xf32>, vector<32x32xf32> -> vector<32x64xf32>
    %155 = vector.shape_cast %154 : vector<32x64xf32> to vector<1x32x64xf32>
    %156 = vector.broadcast %155 : vector<1x32x64xf32> to vector<16x32x64xf32>
    %157 = vector.broadcast %22 : vector<16x32x1xf32> to vector<16x32x64xf32>
    %158 = arith.addf %156, %157 : vector<16x32x64xf32>
    %cst_86 = arith.constant dense<0xFF800000> : vector<16x64xf32>
    %159 = vector.multi_reduction <maximumf>, %158, %cst_86 [1] : vector<16x32x64xf32> to vector<16x64xf32>
    %160 = vector.extract_strided_slice %159 {offsets = [0, 0], sizes = [16, 32], strides = [1, 1]} : vector<16x64xf32> to vector<16x32xf32>
    %cst_87 = arith.constant 0.000000e+00 : f32
    %161 = vector.shape_cast %8 : vector<16x1xi1> to vector<16x1xi1>
    %162 = vector.broadcast %161 : vector<16x1xi1> to vector<16x32xi1>
    %163 = vector.broadcast %cst_87 : f32 to vector<16x32xf32>
    %164 = arith.select %162, %160, %163 : vector<16x32xi1>, vector<16x32xf32>
    %165 = vector.extract_strided_slice %159 {offsets = [0, 32], sizes = [16, 32], strides = [1, 1]} : vector<16x64xf32> to vector<16x32xf32>
    %cst_88 = arith.constant 0.000000e+00 : f32
    %166 = vector.broadcast %cst_88 : f32 to vector<16x32xf32>
    %167 = arith.subf %166, %165 : vector<16x32xf32>
    %cst_89 = arith.constant 0.000000e+00 : f32
    %168 = vector.shape_cast %8 : vector<16x1xi1> to vector<16x1xi1>
    %169 = vector.broadcast %168 : vector<16x1xi1> to vector<16x32xi1>
    %170 = vector.broadcast %cst_89 : f32 to vector<16x32xf32>
    %171 = arith.select %169, %167, %170 : vector<16x32xi1>, vector<16x32xf32>
    %172 = tpu.concatenate %141, %164, %171, %151 in 1 : vector<16x32xf32>, vector<16x32xf32>, vector<16x32xf32>, vector<16x32xf32> -> vector<16x128xf32>
    %173 = arith.truncf %172 : vector<16x128xf32> to vector<16x128xbf16>
    %c1_90 = arith.constant 1 : index
    %c0_91 = arith.constant 0 : index
    %c0_92 = arith.constant 0 : index
    %174 = vector.load %arg12[%c1_90, %c0_91, %c0_92] : memref<3x32x32xbf16, #tpu.memory_space<vmem>>, vector<1x32x32xbf16>
    %175 = vector.shape_cast %174 : vector<1x32x32xbf16> to vector<32x32xbf16>
    %cst_93 = arith.constant dense<0.000000e+00> : vector<16x32xf32>
    %176 = tpu.matmul %122, %175, %cst_93 {dimension_numbers = #tpu.dot_dimension_numbers<[1], [0], [0], [1], [0, 0, 1, 1], [], []>} : vector<16x32xbf16>, vector<32x32xbf16>, vector<16x32xf32> -> vector<16x32xf32>
    %177 = arith.addf %121, %176 : vector<16x32xf32>
    %c1_94 = arith.constant 1 : index
    %c0_95 = arith.constant 0 : index
    %c0_96 = arith.constant 0 : index
    %178 = vector.load %arg13[%c1_94, %c0_95, %c0_96] : memref<3x128x32xbf16, #tpu.memory_space<vmem>>, vector<1x128x32xbf16>
    %179 = vector.shape_cast %178 : vector<1x128x32xbf16> to vector<128x32xbf16>
    %cst_97 = arith.constant dense<0.000000e+00> : vector<16x32xf32>
    %180 = tpu.matmul %173, %179, %cst_97 {dimension_numbers = #tpu.dot_dimension_numbers<[1], [0], [0], [1], [0, 0, 1, 1], [], []>} : vector<16x128xbf16>, vector<128x32xbf16>, vector<16x32xf32> -> vector<16x32xf32>
    %181 = arith.addf %177, %180 : vector<16x32xf32>
    %c1_98 = arith.constant 1 : index
    %c0_99 = arith.constant 0 : index
    %c0_100 = arith.constant 0 : index
    %182 = vector.load %arg14[%c1_98, %c0_99, %c0_100] : memref<3x128x32xbf16, #tpu.memory_space<vmem>>, vector<1x128x32xbf16>
    %183 = vector.shape_cast %182 : vector<1x128x32xbf16> to vector<128x32xbf16>
    %cst_101 = arith.constant dense<0.000000e+00> : vector<16x32xf32>
    %184 = tpu.matmul %173, %183, %cst_101 {dimension_numbers = #tpu.dot_dimension_numbers<[1], [0], [0], [1], [0, 0, 1, 1], [], []>} : vector<16x128xbf16>, vector<128x32xbf16>, vector<16x32xf32> -> vector<16x32xf32>
    %185 = vector.broadcast %15 : vector<16x1xf32> to vector<16x32xf32>
    %186 = arith.mulf %185, %184 : vector<16x32xf32>
    %187 = arith.addf %181, %186 : vector<16x32xf32>
    %c1_102 = arith.constant 1 : index
    %c0_103 = arith.constant 0 : index
    %c0_104 = arith.constant 0 : index
    %188 = vector.load %arg15[%c1_102, %c0_103, %c0_104] : memref<3x128x32xbf16, #tpu.memory_space<vmem>>, vector<1x128x32xbf16>
    %189 = vector.shape_cast %188 : vector<1x128x32xbf16> to vector<128x32xbf16>
    %cst_105 = arith.constant dense<0.000000e+00> : vector<16x32xf32>
    %190 = tpu.matmul %173, %189, %cst_105 {dimension_numbers = #tpu.dot_dimension_numbers<[1], [0], [0], [1], [0, 0, 1, 1], [], []>} : vector<16x128xbf16>, vector<128x32xbf16>, vector<16x32xf32> -> vector<16x32xf32>
    %191 = vector.broadcast %17 : vector<16x1xf32> to vector<16x32xf32>
    %192 = arith.mulf %191, %190 : vector<16x32xf32>
    %193 = arith.addf %187, %192 : vector<16x32xf32>
    %c1_106 = arith.constant 1 : index
    %c0_107 = arith.constant 0 : index
    %c0_108 = arith.constant 0 : index
    %194 = vector.load %arg16[%c1_106, %c0_107, %c0_108] : memref<3x1x32xf32, #tpu.memory_space<vmem>>, vector<1x1x32xf32>
    %195 = vector.shape_cast %194 : vector<1x1x32xf32> to vector<1x32xf32>
    %196 = vector.broadcast %195 : vector<1x32xf32> to vector<16x32xf32>
    %197 = arith.addf %193, %196 : vector<16x32xf32>
    %198 = arith.truncf %197 : vector<16x32xf32> to vector<16x32xbf16>
    %cst_109 = arith.constant dense<0.000000e+00> : vector<32x32xf32>
    %199 = tpu.matmul %1, %198, %cst_109 {dimension_numbers = #tpu.dot_dimension_numbers<[1], [0], [0], [1], [0, 0, 1, 1], [], []>} : vector<32x16xbf16>, vector<16x32xbf16>, vector<32x32xf32> -> vector<32x32xf32>
    %cst_110 = arith.constant dense<0.000000e+00> : vector<32x32xf32>
    %200 = tpu.matmul %2, %198, %cst_110 {dimension_numbers = #tpu.dot_dimension_numbers<[0], [0], [1], [1], [0, 1, 1, 1], [], []>} : vector<16x32xbf16>, vector<16x32xbf16>, vector<32x32xf32> -> vector<32x32xf32>
    %201 = arith.truncf %199 : vector<32x32xf32> to vector<32x32xbf16>
    %c2_111 = arith.constant 2 : index
    %c0_112 = arith.constant 0 : index
    %c0_113 = arith.constant 0 : index
    %202 = vector.load %arg8[%c2_111, %c0_112, %c0_113] : memref<3x32x32xbf16, #tpu.memory_space<vmem>>, vector<1x32x32xbf16>
    %203 = vector.shape_cast %202 : vector<1x32x32xbf16> to vector<32x32xbf16>
    %cst_114 = arith.constant dense<0.000000e+00> : vector<32x32xf32>
    %204 = tpu.matmul %201, %203, %cst_114 {dimension_numbers = #tpu.dot_dimension_numbers<[1], [0], [0], [1], [0, 0, 1, 1], [], []>} : vector<32x32xbf16>, vector<32x32xbf16>, vector<32x32xf32> -> vector<32x32xf32>
    %205 = arith.truncf %200 : vector<32x32xf32> to vector<32x32xbf16>
    %c2_115 = arith.constant 2 : index
    %c0_116 = arith.constant 0 : index
    %c0_117 = arith.constant 0 : index
    %206 = vector.load %arg9[%c2_115, %c0_116, %c0_117] : memref<3x32x32xbf16, #tpu.memory_space<vmem>>, vector<1x32x32xbf16>
    %207 = vector.shape_cast %206 : vector<1x32x32xbf16> to vector<32x32xbf16>
    %cst_118 = arith.constant dense<0.000000e+00> : vector<32x32xf32>
    %208 = tpu.matmul %205, %207, %cst_118 {dimension_numbers = #tpu.dot_dimension_numbers<[1], [0], [0], [1], [0, 0, 1, 1], [], []>} : vector<32x32xbf16>, vector<32x32xbf16>, vector<32x32xf32> -> vector<32x32xf32>
    %209 = arith.addf %204, %208 : vector<32x32xf32>
    %210 = arith.addf %209, %45 : vector<32x32xf32>
    %211 = arith.mulf %210, %210 : vector<32x32xf32>
    %212 = tpu.concatenate %210, %211 in 1 : vector<32x32xf32>, vector<32x32xf32> -> vector<32x64xf32>
    %213 = arith.truncf %212 : vector<32x64xf32> to vector<32x64xbf16>
    %cst_119 = arith.constant dense<0.000000e+00> : vector<16x64xf32>
    %214 = tpu.matmul %2, %213, %cst_119 {dimension_numbers = #tpu.dot_dimension_numbers<[1], [0], [0], [1], [0, 0, 1, 1], [], []>} : vector<16x32xbf16>, vector<32x64xbf16>, vector<16x64xf32> -> vector<16x64xf32>
    %215 = vector.extract_strided_slice %214 {offsets = [0, 0], sizes = [16, 32], strides = [1, 1]} : vector<16x64xf32> to vector<16x32xf32>
    %216 = vector.broadcast %10 : vector<16x1xf32> to vector<16x32xf32>
    %217 = arith.mulf %215, %216 : vector<16x32xf32>
    %218 = vector.extract_strided_slice %214 {offsets = [0, 32], sizes = [16, 32], strides = [1, 1]} : vector<16x64xf32> to vector<16x32xf32>
    %219 = vector.broadcast %10 : vector<16x1xf32> to vector<16x32xf32>
    %220 = arith.mulf %218, %219 : vector<16x32xf32>
    %221 = arith.mulf %217, %217 : vector<16x32xf32>
    %222 = arith.subf %220, %221 : vector<16x32xf32>
    %cst_120 = arith.constant 0.000000e+00 : f32
    %223 = vector.broadcast %cst_120 : f32 to vector<16x32xf32>
    %224 = arith.maximumf %222, %223 : vector<16x32xf32>
    %cst_121 = arith.constant 9.99999974E-6 : f32
    %225 = vector.broadcast %cst_121 : f32 to vector<16x32xf32>
    %226 = arith.addf %224, %225 : vector<16x32xf32>
    %227 = math.sqrt %226 : vector<16x32xf32>
    %cst_122 = arith.constant 0.000000e+00 : f32
    %228 = vector.broadcast %cst_122 : f32 to vector<32x32xf32>
    %229 = arith.subf %228, %210 : vector<32x32xf32>
    %230 = tpu.concatenate %210, %229 in 1 : vector<32x32xf32>, vector<32x32xf32> -> vector<32x64xf32>
    %231 = vector.shape_cast %230 : vector<32x64xf32> to vector<1x32x64xf32>
    %232 = vector.broadcast %231 : vector<1x32x64xf32> to vector<16x32x64xf32>
    %233 = vector.broadcast %22 : vector<16x32x1xf32> to vector<16x32x64xf32>
    %234 = arith.addf %232, %233 : vector<16x32x64xf32>
    %cst_123 = arith.constant dense<0xFF800000> : vector<16x64xf32>
    %235 = vector.multi_reduction <maximumf>, %234, %cst_123 [1] : vector<16x32x64xf32> to vector<16x64xf32>
    %236 = vector.extract_strided_slice %235 {offsets = [0, 0], sizes = [16, 32], strides = [1, 1]} : vector<16x64xf32> to vector<16x32xf32>
    %cst_124 = arith.constant 0.000000e+00 : f32
    %237 = vector.shape_cast %8 : vector<16x1xi1> to vector<16x1xi1>
    %238 = vector.broadcast %237 : vector<16x1xi1> to vector<16x32xi1>
    %239 = vector.broadcast %cst_124 : f32 to vector<16x32xf32>
    %240 = arith.select %238, %236, %239 : vector<16x32xi1>, vector<16x32xf32>
    %241 = vector.extract_strided_slice %235 {offsets = [0, 32], sizes = [16, 32], strides = [1, 1]} : vector<16x64xf32> to vector<16x32xf32>
    %cst_125 = arith.constant 0.000000e+00 : f32
    %242 = vector.broadcast %cst_125 : f32 to vector<16x32xf32>
    %243 = arith.subf %242, %241 : vector<16x32xf32>
    %cst_126 = arith.constant 0.000000e+00 : f32
    %244 = vector.shape_cast %8 : vector<16x1xi1> to vector<16x1xi1>
    %245 = vector.broadcast %244 : vector<16x1xi1> to vector<16x32xi1>
    %246 = vector.broadcast %cst_126 : f32 to vector<16x32xf32>
    %247 = arith.select %245, %243, %246 : vector<16x32xi1>, vector<16x32xf32>
    %248 = tpu.concatenate %217, %240, %247, %227 in 1 : vector<16x32xf32>, vector<16x32xf32>, vector<16x32xf32>, vector<16x32xf32> -> vector<16x128xf32>
    %249 = arith.truncf %248 : vector<16x128xf32> to vector<16x128xbf16>
    %c2_127 = arith.constant 2 : index
    %c0_128 = arith.constant 0 : index
    %c0_129 = arith.constant 0 : index
    %250 = vector.load %arg12[%c2_127, %c0_128, %c0_129] : memref<3x32x32xbf16, #tpu.memory_space<vmem>>, vector<1x32x32xbf16>
    %251 = vector.shape_cast %250 : vector<1x32x32xbf16> to vector<32x32xbf16>
    %cst_130 = arith.constant dense<0.000000e+00> : vector<16x32xf32>
    %252 = tpu.matmul %198, %251, %cst_130 {dimension_numbers = #tpu.dot_dimension_numbers<[1], [0], [0], [1], [0, 0, 1, 1], [], []>} : vector<16x32xbf16>, vector<32x32xbf16>, vector<16x32xf32> -> vector<16x32xf32>
    %253 = arith.addf %197, %252 : vector<16x32xf32>
    %c2_131 = arith.constant 2 : index
    %c0_132 = arith.constant 0 : index
    %c0_133 = arith.constant 0 : index
    %254 = vector.load %arg13[%c2_131, %c0_132, %c0_133] : memref<3x128x32xbf16, #tpu.memory_space<vmem>>, vector<1x128x32xbf16>
    %255 = vector.shape_cast %254 : vector<1x128x32xbf16> to vector<128x32xbf16>
    %cst_134 = arith.constant dense<0.000000e+00> : vector<16x32xf32>
    %256 = tpu.matmul %249, %255, %cst_134 {dimension_numbers = #tpu.dot_dimension_numbers<[1], [0], [0], [1], [0, 0, 1, 1], [], []>} : vector<16x128xbf16>, vector<128x32xbf16>, vector<16x32xf32> -> vector<16x32xf32>
    %257 = arith.addf %253, %256 : vector<16x32xf32>
    %c2_135 = arith.constant 2 : index
    %c0_136 = arith.constant 0 : index
    %c0_137 = arith.constant 0 : index
    %258 = vector.load %arg14[%c2_135, %c0_136, %c0_137] : memref<3x128x32xbf16, #tpu.memory_space<vmem>>, vector<1x128x32xbf16>
    %259 = vector.shape_cast %258 : vector<1x128x32xbf16> to vector<128x32xbf16>
    %cst_138 = arith.constant dense<0.000000e+00> : vector<16x32xf32>
    %260 = tpu.matmul %249, %259, %cst_138 {dimension_numbers = #tpu.dot_dimension_numbers<[1], [0], [0], [1], [0, 0, 1, 1], [], []>} : vector<16x128xbf16>, vector<128x32xbf16>, vector<16x32xf32> -> vector<16x32xf32>
    %261 = vector.broadcast %15 : vector<16x1xf32> to vector<16x32xf32>
    %262 = arith.mulf %261, %260 : vector<16x32xf32>
    %263 = arith.addf %257, %262 : vector<16x32xf32>
    %c2_139 = arith.constant 2 : index
    %c0_140 = arith.constant 0 : index
    %c0_141 = arith.constant 0 : index
    %264 = vector.load %arg15[%c2_139, %c0_140, %c0_141] : memref<3x128x32xbf16, #tpu.memory_space<vmem>>, vector<1x128x32xbf16>
    %265 = vector.shape_cast %264 : vector<1x128x32xbf16> to vector<128x32xbf16>
    %cst_142 = arith.constant dense<0.000000e+00> : vector<16x32xf32>
    %266 = tpu.matmul %249, %265, %cst_142 {dimension_numbers = #tpu.dot_dimension_numbers<[1], [0], [0], [1], [0, 0, 1, 1], [], []>} : vector<16x128xbf16>, vector<128x32xbf16>, vector<16x32xf32> -> vector<16x32xf32>
    %267 = vector.broadcast %17 : vector<16x1xf32> to vector<16x32xf32>
    %268 = arith.mulf %267, %266 : vector<16x32xf32>
    %269 = arith.addf %263, %268 : vector<16x32xf32>
    %c2_143 = arith.constant 2 : index
    %c0_144 = arith.constant 0 : index
    %c0_145 = arith.constant 0 : index
    %270 = vector.load %arg16[%c2_143, %c0_144, %c0_145] : memref<3x1x32xf32, #tpu.memory_space<vmem>>, vector<1x1x32xf32>
    %271 = vector.shape_cast %270 : vector<1x1x32xf32> to vector<1x32xf32>
    %272 = vector.broadcast %271 : vector<1x32xf32> to vector<16x32xf32>
    %273 = arith.addf %269, %272 : vector<16x32xf32>
    %c0_146 = arith.constant 0 : index
    %c0_147 = arith.constant 0 : index
    %274 = vector.load %arg6[%c0_146, %c0_147] : memref<2x16xbf16, #tpu.memory_space<vmem>>, vector<2x16xbf16>
    %c0_148 = arith.constant 0 : index
    %c0_149 = arith.constant 0 : index
    %275 = vector.load %arg7[%c0_148, %c0_149] : memref<2x1xf32, #tpu.memory_space<vmem>>, vector<2x1xf32>
    %cst_150 = arith.constant 1.000000e+00 : f32
    %276 = vector.broadcast %cst_150 : f32 to vector<2x1xf32>
    %277 = arith.maximumf %275, %276 : vector<2x1xf32>
    %cst_151 = arith.constant 0.000000e+00 : f32
    %278 = vector.broadcast %cst_151 : f32 to vector<2x1xf32>
    %279 = arith.cmpf ogt, %275, %278 : vector<2x1xf32>
    %280 = arith.truncf %273 : vector<16x32xf32> to vector<16x32xbf16>
    %cst_152 = arith.constant dense<0.000000e+00> : vector<2x32xf32>
    %281 = tpu.matmul %274, %280, %cst_152 {dimension_numbers = #tpu.dot_dimension_numbers<[1], [0], [0], [1], [0, 0, 1, 1], [], []>} : vector<2x16xbf16>, vector<16x32xbf16>, vector<2x32xf32> -> vector<2x32xf32>
    %cst_153 = arith.constant 1.000000e+00 : f32
    %282 = vector.broadcast %cst_153 : f32 to vector<2x1xf32>
    %283 = arith.divf %282, %277 : vector<2x1xf32>
    %284 = vector.broadcast %283 : vector<2x1xf32> to vector<2x32xf32>
    %285 = arith.mulf %281, %284 : vector<2x32xf32>
    %286 = arith.extf %274 : vector<2x16xbf16> to vector<2x16xf32>
    %cst_154 = arith.constant 1.000000e+00 : f32
    %287 = vector.broadcast %cst_154 : f32 to vector<2x16xf32>
    %288 = arith.subf %286, %287 : vector<2x16xf32>
    %cst_155 = arith.constant 3.000000e+38 : f32
    %289 = vector.broadcast %cst_155 : f32 to vector<2x16xf32>
    %290 = arith.mulf %288, %289 : vector<2x16xf32>
    %291 = vector.shape_cast %290 : vector<2x16xf32> to vector<2x16x1xf32>
    %292 = vector.shape_cast %273 : vector<16x32xf32> to vector<1x16x32xf32>
    %293 = vector.broadcast %292 : vector<1x16x32xf32> to vector<2x16x32xf32>
    %294 = vector.broadcast %291 : vector<2x16x1xf32> to vector<2x16x32xf32>
    %295 = arith.addf %293, %294 : vector<2x16x32xf32>
    %cst_156 = arith.constant dense<0xFF800000> : vector<2x32xf32>
    %296 = vector.multi_reduction <maximumf>, %295, %cst_156 [1] : vector<2x16x32xf32> to vector<2x32xf32>
    %cst_157 = arith.constant 0.000000e+00 : f32
    %297 = vector.shape_cast %279 : vector<2x1xi1> to vector<2x1xi1>
    %298 = vector.broadcast %297 : vector<2x1xi1> to vector<2x32xi1>
    %299 = vector.broadcast %cst_157 : f32 to vector<2x32xf32>
    %300 = arith.select %298, %296, %299 : vector<2x32xi1>, vector<2x32xf32>
    %c0_158 = arith.constant 0 : index
    %c0_159 = arith.constant 0 : index
    %301 = vector.load %arg17[%c0_158, %c0_159] : memref<96x32xbf16, #tpu.memory_space<vmem>>, vector<96x32xbf16>
    %302 = arith.truncf %281 : vector<2x32xf32> to vector<2x32xbf16>
    %303 = vector.extract_strided_slice %301 {offsets = [0, 0], sizes = [32, 32], strides = [1, 1]} : vector<96x32xbf16> to vector<32x32xbf16>
    %cst_160 = arith.constant dense<0.000000e+00> : vector<2x32xf32>
    %304 = tpu.matmul %302, %303, %cst_160 {dimension_numbers = #tpu.dot_dimension_numbers<[1], [0], [0], [1], [0, 0, 1, 1], [], []>} : vector<2x32xbf16>, vector<32x32xbf16>, vector<2x32xf32> -> vector<2x32xf32>
    %305 = arith.truncf %285 : vector<2x32xf32> to vector<2x32xbf16>
    %306 = vector.extract_strided_slice %301 {offsets = [32, 0], sizes = [32, 32], strides = [1, 1]} : vector<96x32xbf16> to vector<32x32xbf16>
    %cst_161 = arith.constant dense<0.000000e+00> : vector<2x32xf32>
    %307 = tpu.matmul %305, %306, %cst_161 {dimension_numbers = #tpu.dot_dimension_numbers<[1], [0], [0], [1], [0, 0, 1, 1], [], []>} : vector<2x32xbf16>, vector<32x32xbf16>, vector<2x32xf32> -> vector<2x32xf32>
    %308 = arith.addf %304, %307 : vector<2x32xf32>
    %309 = arith.truncf %300 : vector<2x32xf32> to vector<2x32xbf16>
    %310 = vector.extract_strided_slice %301 {offsets = [64, 0], sizes = [32, 32], strides = [1, 1]} : vector<96x32xbf16> to vector<32x32xbf16>
    %cst_162 = arith.constant dense<0.000000e+00> : vector<2x32xf32>
    %311 = tpu.matmul %309, %310, %cst_162 {dimension_numbers = #tpu.dot_dimension_numbers<[1], [0], [0], [1], [0, 0, 1, 1], [], []>} : vector<2x32xbf16>, vector<32x32xbf16>, vector<2x32xf32> -> vector<2x32xf32>
    %312 = arith.addf %308, %311 : vector<2x32xf32>
    %c0_163 = arith.constant 0 : index
    %c0_164 = arith.constant 0 : index
    %313 = vector.load %arg18[%c0_163, %c0_164] : memref<1x32xf32, #tpu.memory_space<vmem>>, vector<1x32xf32>
    %314 = vector.broadcast %313 : vector<1x32xf32> to vector<2x32xf32>
    %315 = arith.addf %312, %314 : vector<2x32xf32>
    %cst_165 = arith.constant 0.000000e+00 : f32
    %316 = vector.broadcast %cst_165 : f32 to vector<2x32xf32>
    %317 = arith.maximumf %315, %316 : vector<2x32xf32>
    %318 = arith.truncf %317 : vector<2x32xf32> to vector<2x32xbf16>
    %c0_166 = arith.constant 0 : index
    %c0_167 = arith.constant 0 : index
    %319 = vector.load %arg19[%c0_166, %c0_167] : memref<32x4xbf16, #tpu.memory_space<vmem>>, vector<32x4xbf16>
    %cst_168 = arith.constant dense<0.000000e+00> : vector<2x4xf32>
    %320 = tpu.matmul %318, %319, %cst_168 {dimension_numbers = #tpu.dot_dimension_numbers<[1], [0], [0], [1], [0, 0, 1, 1], [], []>} : vector<2x32xbf16>, vector<32x4xbf16>, vector<2x4xf32> -> vector<2x4xf32>
    %c0_169 = arith.constant 0 : index
    %c0_170 = arith.constant 0 : index
    %321 = vector.load %arg20[%c0_169, %c0_170] : memref<1x4xf32, #tpu.memory_space<vmem>>, vector<1x4xf32>
    %322 = vector.broadcast %321 : vector<1x4xf32> to vector<2x4xf32>
    %323 = arith.addf %320, %322 : vector<2x4xf32>
    %c0_171 = arith.constant 0 : index
    %c0_172 = arith.constant 0 : index
    %324 = vector.load %arg21[%c0_171, %c0_172] : memref<2x4xf32, #tpu.memory_space<vmem>>, vector<2x4xf32>
    tpu.vector_store %arg21[%c0_171, %c0_172], %323 {strides = array<i32>} : memref<2x4xf32, #tpu.memory_space<vmem>>, vector<2x4xf32>,
    return
  }
  func.func @transform_0(%arg0: i32) -> (i32, i32) {
    %c0_i32 = arith.constant 0 : i32
    %c0_i32_0 = arith.constant 0 : i32
    %c0_i32_1 = arith.constant 0 : i32
    return %c0_i32, %c0_i32_0 : i32, i32
  }
  func.func @transform_1(%arg0: i32) -> (i32, i32) {
    %c0_i32 = arith.constant 0 : i32
    %c0_i32_0 = arith.constant 0 : i32
    %c0_i32_1 = arith.constant 0 : i32
    return %c0_i32, %c0_i32_0 : i32, i32
  }
  func.func @transform_2(%arg0: i32) -> (i32, i32) {
    %c0_i32 = arith.constant 0 : i32
    %c0_i32_0 = arith.constant 0 : i32
    %c0_i32_1 = arith.constant 0 : i32
    return %c0_i32, %c0_i32_0 : i32, i32
  }
  func.func @transform_3(%arg0: i32) -> (i32, i32) {
    %c0_i32 = arith.constant 0 : i32
    %c0_i32_0 = arith.constant 0 : i32
    %c0_i32_1 = arith.constant 0 : i32
    return %c0_i32, %c0_i32_0 : i32, i32
  }
  func.func @transform_4(%arg0: i32) -> (i32, i32) {
    %c0_i32 = arith.constant 0 : i32
    %c0_i32_0 = arith.constant 0 : i32
    %c0_i32_1 = arith.constant 0 : i32
    return %c0_i32, %c0_i32_0 : i32, i32
  }
  func.func @transform_5(%arg0: i32) -> (i32, i32) {
    %c0_i32 = arith.constant 0 : i32
    %c0_i32_0 = arith.constant 0 : i32
    %c0_i32_1 = arith.constant 0 : i32
    return %c0_i32, %c0_i32_0 : i32, i32
  }
  func.func @transform_6(%arg0: i32) -> (i32, i32) {
    %c0_i32 = arith.constant 0 : i32
    %c0_i32_0 = arith.constant 0 : i32
    %c0_i32_1 = arith.constant 0 : i32
    return %c0_i32, %c0_i32_0 : i32, i32
  }
  func.func @transform_7(%arg0: i32) -> (i32, i32, i32) {
    %c0_i32 = arith.constant 0 : i32
    %c0_i32_0 = arith.constant 0 : i32
    %c0_i32_1 = arith.constant 0 : i32
    %c0_i32_2 = arith.constant 0 : i32
    return %c0_i32, %c0_i32_0, %c0_i32_1 : i32, i32, i32
  }
  func.func @transform_8(%arg0: i32) -> (i32, i32, i32) {
    %c0_i32 = arith.constant 0 : i32
    %c0_i32_0 = arith.constant 0 : i32
    %c0_i32_1 = arith.constant 0 : i32
    %c0_i32_2 = arith.constant 0 : i32
    return %c0_i32, %c0_i32_0, %c0_i32_1 : i32, i32, i32
  }
  func.func @transform_9(%arg0: i32) -> (i32, i32, i32) {
    %c0_i32 = arith.constant 0 : i32
    %c0_i32_0 = arith.constant 0 : i32
    %c0_i32_1 = arith.constant 0 : i32
    %c0_i32_2 = arith.constant 0 : i32
    return %c0_i32, %c0_i32_0, %c0_i32_1 : i32, i32, i32
  }
  func.func @transform_10(%arg0: i32) -> (i32, i32, i32) {
    %c0_i32 = arith.constant 0 : i32
    %c0_i32_0 = arith.constant 0 : i32
    %c0_i32_1 = arith.constant 0 : i32
    %c0_i32_2 = arith.constant 0 : i32
    return %c0_i32, %c0_i32_0, %c0_i32_1 : i32, i32, i32
  }
  func.func @transform_11(%arg0: i32) -> (i32, i32, i32) {
    %c0_i32 = arith.constant 0 : i32
    %c0_i32_0 = arith.constant 0 : i32
    %c0_i32_1 = arith.constant 0 : i32
    %c0_i32_2 = arith.constant 0 : i32
    return %c0_i32, %c0_i32_0, %c0_i32_1 : i32, i32, i32
  }
  func.func @transform_12(%arg0: i32) -> (i32, i32, i32) {
    %c0_i32 = arith.constant 0 : i32
    %c0_i32_0 = arith.constant 0 : i32
    %c0_i32_1 = arith.constant 0 : i32
    %c0_i32_2 = arith.constant 0 : i32
    return %c0_i32, %c0_i32_0, %c0_i32_1 : i32, i32, i32
  }
  func.func @transform_13(%arg0: i32) -> (i32, i32, i32) {
    %c0_i32 = arith.constant 0 : i32
    %c0_i32_0 = arith.constant 0 : i32
    %c0_i32_1 = arith.constant 0 : i32
    %c0_i32_2 = arith.constant 0 : i32
    return %c0_i32, %c0_i32_0, %c0_i32_1 : i32, i32, i32
  }
  func.func @transform_14(%arg0: i32) -> (i32, i32, i32) {
    %c0_i32 = arith.constant 0 : i32
    %c0_i32_0 = arith.constant 0 : i32
    %c0_i32_1 = arith.constant 0 : i32
    %c0_i32_2 = arith.constant 0 : i32
    return %c0_i32, %c0_i32_0, %c0_i32_1 : i32, i32, i32
  }
  func.func @transform_15(%arg0: i32) -> (i32, i32, i32) {
    %c0_i32 = arith.constant 0 : i32
    %c0_i32_0 = arith.constant 0 : i32
    %c0_i32_1 = arith.constant 0 : i32
    %c0_i32_2 = arith.constant 0 : i32
    return %c0_i32, %c0_i32_0, %c0_i32_1 : i32, i32, i32
  }
  func.func @transform_16(%arg0: i32) -> (i32, i32) {
    %c0_i32 = arith.constant 0 : i32
    %c0_i32_0 = arith.constant 0 : i32
    %c0_i32_1 = arith.constant 0 : i32
    return %c0_i32, %c0_i32_0 : i32, i32
  }
  func.func @transform_17(%arg0: i32) -> (i32, i32) {
    %c0_i32 = arith.constant 0 : i32
    %c0_i32_0 = arith.constant 0 : i32
    %c0_i32_1 = arith.constant 0 : i32
    return %c0_i32, %c0_i32_0 : i32, i32
  }
  func.func @transform_18(%arg0: i32) -> (i32, i32) {
    %c0_i32 = arith.constant 0 : i32
    %c0_i32_0 = arith.constant 0 : i32
    %c0_i32_1 = arith.constant 0 : i32
    return %c0_i32, %c0_i32_0 : i32, i32
  }
  func.func @transform_19(%arg0: i32) -> (i32, i32) {
    %c0_i32 = arith.constant 0 : i32
    %c0_i32_0 = arith.constant 0 : i32
    %c0_i32_1 = arith.constant 0 : i32
    return %c0_i32, %c0_i32_0 : i32, i32
  }
  func.func @transform_20(%arg0: i32) -> (i32, i32) {
    %c0_i32 = arith.constant 0 : i32
    %c0_i32_0 = arith.constant 0 : i32
    %c0_i32_1 = arith.constant 0 : i32
    return %c0_i32, %c0_i32_0 : i32, i32
  }
}

</mosaic_0001>

<bundles_post_ra>
// kernel: pna_random_forward.1
= control target key start
LH: loop header
LB: loop body
LE: loop exit
PB: predicated region body
PF: predicated region fallthrough
CT: control target
= control target key end

     0   :  { %s8141_s0 = inlined_call_operand.vmem [shape: f32[16,32], index: 0, kind: input, shape index: {}]   ;;  %s8142_s1 = inlined_call_operand.vmem [shape: f32[32,32], index: 1, kind: input, shape index: {}]   ;;  %s8143_s2 = inlined_call_operand.vmem [shape: bf16[32,16], index: 2, kind: input, shape index: {}]   ;;  %s8144_s3 = inlined_call_operand.vmem [shape: bf16[16,32], index: 3, kind: input, shape index: {}]   ;;  %s8145_s4 = inlined_call_operand.vmem [shape: f32[16,1], index: 4, kind: input, shape index: {}]   ;;  %s8146_s5 = inlined_call_operand.vmem [shape: bf16[2,16], index: 5, kind: input, shape index: {}]   ;;  %s8147_s6 = inlined_call_operand.vmem [shape: f32[2,1], index: 6, kind: input, shape index: {}]   ;;  %s8148_s7 = inlined_call_operand.vmem [shape: bf16[3,32,32], index: 7, kind: input, shape index: {}]   ;;  %s8149_s8 = inlined_call_operand.vmem [shape: bf16[3,32,32], index: 8, kind: input, shape index: {}]   ;;  %s8150_s9 = inlined_call_operand.vmem [shape: bf16[3,32,32], index: 9, kind: input, shape index: {}]   ;;  %s8151_s10 = inlined_call_operand.vmem [shape: f32[3,1,32], index: 10, kind: input, shape index: {}]   ;;  %s8152_s11 = inlined_call_operand.vmem [shape: bf16[3,32,32], index: 11, kind: input, shape index: {}]   ;;  %s8153_s12 = inlined_call_operand.vmem [shape: bf16[3,128,32], index: 12, kind: input, shape index: {}]   ;;  %s8154_s13 = inlined_call_operand.vmem [shape: bf16[3,128,32], index: 13, kind: input, shape index: {}]   ;;  %s8155_s14 = inlined_call_operand.vmem [shape: bf16[3,128,32], index: 14, kind: input, shape index: {}]   ;;  %s8156_s15 = inlined_call_operand.vmem [shape: f32[3,1,32], index: 15, kind: input, shape index: {}]   ;;  %s8157_s16 = inlined_call_operand.vmem [shape: bf16[96,32], index: 16, kind: input, shape index: {}]   ;;  %s8158_s17 = inlined_call_operand.vmem [shape: f32[1,32], index: 17, kind: input, shape index: {}]   ;;  %s8159_s18 = inlined_call_operand.vmem [shape: bf16[32,4], index: 18, kind: input, shape index: {}]   ;;  %s8160_s19 = inlined_call_operand.vmem [shape: f32[1,4], index: 19, kind: input, shape index: {}]   ;;  %s8161_s20 = inlined_call_operand.hbm [shape: f32[2,4], index: 20, kind: output, shape index: {}]  }
   0x1   :  { %8330 = sst [smem:[#allocation90_spill]] %s8141_s0 }
   0x2   :  { %8331 = sst [smem:[#allocation91_spill]] %s8142_s1 }
   0x3   :  { %8332 = sst [smem:[#allocation92_spill]] %s8143_s2 }
   0x4   :  { %8333 = sst [smem:[#allocation93_spill]] %s8144_s3 }
   0x5   :  { %8334 = sst [smem:[#allocation94_spill]] %s8145_s4 }
   0x6   :  { %s8335_s23 = sld [smem:[#allocation93_spill]]  ;;  %v5580_v1 = vld [vmem:[%s8150_s9] sm:$0xff]   ;;  %v5581_v2 = vld [vmem:[%s8150_s9 + $0x8] sm:$0xff]   ;;  %s8337_s28 = sld [smem:[#allocation91_spill]]  ;;  %vm434_vm0 = vcmask 261120   ;;  %v5584_v11 = vld [vmem:[%s8150_s9 + $0x10] sm:$0xff]  }
   0x7   :  { %5070 = vmatprep.subr.bf16.mxu0 %v5580_v1  ;;  %v5582_v8 = vld [vmem:[%s8150_s9 + $0x20] sm:$0xff]   ;;  %v5583_v10 = vld [vmem:[%s8150_s9 + $0x28] sm:$0xff]   ;;  %v5585_v12 = vld [vmem:[%s8150_s9 + $0x18] sm:$0xff]   ;;  %5078 = vmatprep.subr.bf16.mxu1 %v5584_v11  ;;  %s8338_s29 = sld [smem:[#allocation90_spill]]  ;;  %vm649_vm1 = vcmask 130048   ;;  %s8339_s1 = sld [smem:[#allocation92_spill]] }
   0x8   :  { %5071 = vmatpush3.bf16.msra.mxu0 %v5580_v1  ;;  %5079 = vmatpush3.bf16.msra.mxu1 %v5584_v11  ;;  %v5588_v17 = vld [vmem:[%s8149_s8] sm:$0xff]  }
   0x9   :  { %5072 = vmatprep.subr.bf16.mxu0 %v5581_v2  ;;  %5080 = vmatprep.subr.bf16.mxu1 %v5585_v12 }
   0xc   :  { %v5860_v0 = vld [vmem:[%s8335_s23] sm:$0xff]   ;;  %v406_v4 = vld [vmem:[%s8337_s28 + $0x8] sm:$0xff]  ;;  %v407_v6 = vld [vmem:[%s8337_s28 + $0x10] sm:$0xff]  ;;  %5073 = vmatpush3.bf16.msra.mxu0 %v5581_v2  ;;  %5081 = vmatpush3.bf16.msra.mxu1 %v5585_v12 }
   0xd   :  { %8336 = vst [vmem:[#allocation5_spill] sm:$0xff] %v5860_v0  ;;  %v405_v3 = vld [vmem:[%s8337_s28] sm:$0xff]  ;;  %711 = vxpose.xlu0.c.b16.start.end [1/1] (short) (narrow) %v5860_v0, 32  ;;  %v408_v7 = vld [vmem:[%s8337_s28 + $0x18] sm:$0xff]  ;;  %5086 = vmatprep.subr.bf16.mxu0 %v5582_v8  ;;  %v68_v14 = vld [vmem:[%s8338_s29 + $0x8] sm:$0xff] }
   0xe   :  { %v409_v5 = vpack.c.bf16 %v406_v4, %v405_v3  ;;  %v410_v9 = vpack.c.bf16 %v408_v7, %v407_v6  ;;  %v67_v13 = vld [vmem:[%s8338_s29] sm:$0xff]  ;;  %v5587_v18 = vld [vmem:[%s8339_s1 + $0x8] sm:$0xff]  }
   0xf   :  { %v5586_v15 = vld [vmem:[%s8339_s1] sm:$0xff]   ;;  %v5906_v16 = vpack.c.bf16 %v68_v14, %v67_v13 }
  0x10   :  { %5074 = vmatprep.mubr.msk.bf16.mxu0 %vm434_vm0, %v409_v5  ;;  %5082 = vmatprep.mubr.msk.bf16.mxu1 %vm434_vm0, %v409_v5 }
  0x11   :  { %5075 = vmatmul.mubr.msk.bf16.vlgmr.msra.gmra.mrb[0].mxu0 %vm434_vm0, %v410_v9  ;;  %8340 = vst [vmem:[#allocation6_spill] sm:$0xff] %v5906_v16  ;;  %5094 = vmatprep.subr.bf16.mxu1 %v5906_v16 }
  0x12   :  { %5087 = vmatpush3.bf16.msra.mxu0 %v5582_v8  ;;  %5090 = vmatprep.mubr.msk.bf16.mxu0 %vm434_vm0, %v409_v5 }
  0x13   :  { %5088 = vmatprep.subr.bf16.mxu0 %v5583_v10  ;;  %5083 = vmatmul.mubr.msk.bf16.vlgmr.msra.gmra.mrb[0].mxu1 %vm434_vm0, %v410_v9 }
  0x14   :  { %5095 = vmatpush3.bf16.msra.mxu1 %v5906_v16  ;;  %5096 = vmatprep.mubr.msk.bf16.mxu1 %vm649_vm1, %v5586_v15 }
  0x16   :  { %5089 = vmatpush3.bf16.msra.mxu0 %v5583_v10 }
  0x17   :  { %5100 = vmatprep.subr.bf16.mxu0 %v5906_v16 }
  0x19   :  { %5091 = vmatmul.mubr.msk.bf16.vlgmr.msra.gmra.mrb[4].mxu0 %vm434_vm0, %v410_v9 }
  0x1a   :  { %5101 = vmatpush3.bf16.msra.mxu0 %v5906_v16 }
  0x1b   :  { %5106 = vmatprep.subr.bf16.mxu0 %v5588_v17  ;;  %5097 = vmatmul.mubr.msk.bf16.vlgmr.msra.gmra.mrb[4].mxu1 %vm649_vm1, %v5587_v18 }
  0x1c   :  { %25 = vsyncpa [#allocation3], 0  ;;  %v5589_v21 = vld [vmem:[%s8149_s8 + $0x8] sm:$0xff]   ;;  %v5590_v22 = vld [vmem:[%s8148_s7] sm:$0xff]   ;;  %v8170_v36 = vmov 0   ;;  %v75_v37 = vunpack.c.l.bf16 %v5860_v0  ;;  %v101_v39 = vlaneseq  ;;  %v76_v41 = vunpack.c.h.bf16 %v5860_v0  ;;  %s8344_s22 = sld [smem:[#allocation94_spill]] }
  0x1d   :  { %v5591_v35 = vld [vmem:[%s8148_s7 + $0x8] sm:$0xff]   ;;  %5497 = vset.pattern.permute.xlu0 %v8170_v36  ;;  %5498 = vset.pattern.permute.xlu1 %v8170_v36  ;;  %v4614_v38 = vld [vmem:[%s8151_s10] ss:$0 sm:$0xff]  ;;  %v8168_v44 = vmov 0.0   ;;  %vm5747_vm2 = vmmov 0   ;;  %s5748_s23 = smov 32  }
  0x1e   :  { %5122 = vmatprep.subr.bf16.mxu1 %v8168_v44  ;;  %v4612_v45 = vadd.f32 -1.0, %v75_v37  ;;  %v5956_v48 = vshrl.u32 %v101_v39, 7  ;;  %v4613_v52 = vadd.f32 -1.0, %v76_v41  ;;  %5126 = vmatprep.mubr.msk.bf16.mxu1 %vm5747_vm2, %v8168_v44  ;;  %vm1132_vm3 = vcmask 523264   ;;  %s5749_s28 = smov 96   ;;  %s5750_s4 = smov 64  }
  0x1f   :  { %vm1367_vm4 = vcmask 1041409   ;;  %vm1369_vm5 = vcmask 1042434   ;;  %vm1371_vm6 = vcmask 1043459   ;;  %vm1373_vm7 = vcmask 1044484   ;;  %s5751_s27 = smov [#allocation2]  }
  0x20   :  { %v5966_v55 = vmul.f32 3e+38, %v4612_v45  ;;  %v5973_v58 = vsub.s32 1, %v5956_v48  ;;  %v5986_v62 = vsub.s32 0, %v5956_v48  ;;  %v5989_v1 = vmul.f32 3e+38, %v4613_v52 }
  0x21   :  { %v141_v9 = vsub.s32 2, %v5956_v48  ;;  %v160_v14 = vsub.s32 3, %v5956_v48  ;;  %vm8324_vm8 = vcmask 1045509   ;;  %vm1377_vm9 = vcmask 1046534  }
  0x22   :  { %8343 = vst [vmem:[#allocation9_spill] sm:$0xff] %v5973_v58  ;;  %v5978_v59 = vld [vmem:[%s8344_s22] sm:$0xff]  ;;  %8346 = vst [vmem:[#allocation11_spill] sm:$0xff] %v5986_v62  ;;  %v123_v2 = vrot.slane %v5966_v55, %v5973_v58  ;;  %v104_v4 = vrot.slane %v5966_v55, %v5986_v62  ;;  %v256_v5 = vrot.slane %v5989_v1, %v5986_v62  ;;  %v6005_v6 = vld [vmem:[%s8344_s22 + $0x8] sm:$0xff]  ;;  %vm8302_vm10 = vcmask 1047559  }
  0x23   :  { %8345 = vst [vmem:[#allocation10_spill] sm:$0xff] %v5978_v59  ;;  %v8167_v63 = vmax.f32 %v5978_v59, 1.0  ;;  %8347 = vst [vmem:[#allocation12_spill] sm:$0xff] %v6005_v6  ;;  %v275_v7 = vrot.slane %v5989_v1, %v5973_v58  ;;  %v8166_v8 = vmax.f32 %v6005_v6, 1.0  ;;  %v142_v11 = vrot.slane %v5966_v55, %v141_v9 }
  0x24   :  { %v294_v12 = vrot.slane %v5989_v1, %v141_v9  ;;  %v161_v15 = vrot.slane %v5966_v55, %v160_v14 }
  0x25   :  { %5687 = vrcp.f32 %v8167_v63 }
  0x26   :  { %5689 = vrcp.f32 %v8166_v8 }
  0x2f   :  { %v5688_v10 = vpop.eup %5687 }
  0x30   :  { %v5690_v13 = vpop.eup %5689 }
  0x73   :  { %v5922_v19 = vpop.trf.xlu0 }
  0x74   :  { %8341 = vst [vmem:[#allocation7_spill] sm:$0xff] %v5922_v19  ;;  %5102 = vmatprep.mubr.msk.bf16.mxu0 %vm649_vm1, %v5922_v19 }
  0x77   :  { %v5926_v20 = vpop.trf.xlu0 }
  0x78   :  { %8342 = vst [vmem:[#allocation8_spill] sm:$0xff] %v5926_v20  ;;  %5103 = vmatmul.mubr.msk.bf16.vlgmr.msra.gmra.mrb[8].mxu0 %vm649_vm1, %v5926_v20 }
  0x79   :  { %5107 = vmatpush3.bf16.msra.mxu0 %v5588_v17  ;;  %v313_v17 = vrot.slane %v5989_v1, %v160_v14 }
  0x7a   :  { %5108 = vmatprep.subr.bf16.mxu0 %v5589_v21 }
  0x7d   :  { %5109 = vmatpush3.bf16.msra.mxu0 %v5589_v21  ;;  %v179_v21 = vsub.s32 4, %v5956_v48 }
  0x7e   :  { %5114 = vmatprep.subr.bf16.mxu0 %v5590_v22 }
  0xee   :  { %v5098_v23 = vpop.f32.mrb[4].mxu1 }
  0xef   :  { %v690_v24 = vpop.f32.mrb[5].mxu1 }
  0xf0   :  { %v5099_v25 = vpop.f32.mrb[6].mxu1 }
  0xf1   :  { %v783_v26 = vpack.c.bf16 %v5099_v25, %v5098_v23  ;;  %v693_v27 = vpop.f32.mrb[7].mxu1  ;;  %v6026_v23 = vrot.slane %v5989_v1, %v179_v21  ;;  %v198_v25 = vsub.s32 5, %v5956_v48 }
  0xf2   :  { %v782_v28 = vpack.c.bf16 %v693_v27, %v690_v24 }
  0xf3   :  { %v6039_v27 = vrot.slane %v5989_v1, %v198_v25 }
 0x14b   :  { %v5104_v29 = vpop.f32.mrb[8].mxu0 }
 0x14c   :  { %v767_v30 = vpop.f32.mrb[9].mxu0 }
 0x14d   :  { %v5105_v31 = vpop.f32.mrb[10].mxu0 }
 0x14e   :  { %v789_v32 = vpack.c.bf16 %v5105_v31, %v5104_v29  ;;  %v770_v33 = vpop.f32.mrb[11].mxu0  ;;  %v236_v31 = vsub.s32 7, %v5956_v48 }
 0x14f   :  { %v788_v34 = vpack.c.bf16 %v770_v33, %v767_v30 }
 0x150   :  { %v389_v33 = vrot.slane %v5989_v1, %v236_v31 }
 0x151   :  { %5110 = vmatprep.mubr.msk.bf16.mxu0 %vm434_vm0, %v788_v34 }
 0x152   :  { %5111 = vmatmul.mubr.msk.bf16.vlgmr.msra.gmra.mrb[0].mxu0 %vm434_vm0, %v789_v32  ;;  %v237_v32 = vrot.slane %v5966_v55, %v236_v31 }
 0x153   :  { %5115 = vmatpush3.bf16.msra.mxu0 %v5590_v22  ;;  %5118 = vmatprep.mubr.msk.bf16.mxu0 %vm434_vm0, %v782_v28  ;;  %v6022_v22 = vrot.slane %v5966_v55, %v179_v21  ;;  %v217_v28 = vsub.s32 6, %v5956_v48 }
 0x154   :  { %5116 = vmatprep.subr.bf16.mxu0 %v5591_v35 }
 0x155   :  { %v218_v29 = vrot.slane %v5966_v55, %v217_v28  ;;  %v370_v30 = vrot.slane %v5989_v1, %v217_v28 }
 0x157   :  { %5117 = vmatpush3.bf16.msra.mxu0 %v5591_v35 }
 0x158   :  { %5158 = vmatprep.subr.bf16.mxu0 %v8168_v44 }
 0x15e   :  { %5119 = vmatmul.mubr.msk.bf16.vlgmr.msra.gmra.mrb[0].mxu0 %vm434_vm0, %v783_v26  ;;  %v6034_v26 = vrot.slane %v5966_v55, %v198_v25 }
 0x15f   :  { %5174 = vmatprep.mubr.msk.bf16.mxu0 %vm5747_vm2, %v8168_v44 }
 0x231   :  { %v5120_v40 = vpop.f32.mrb[0].mxu0 }
 0x232   :  { %v5950_v42 = vadd.f32 %v5120_v40, %v4614_v38  ;;  %v913_v43 = vpop.f32.mrb[1].mxu0 }
 0x233   :  { %v5954_v46 = vadd.f32 %v4614_v38, %v913_v43  ;;  %v5121_v47 = vpop.f32.mrb[2].mxu0 }
 0x234   :  { %v5958_v49 = vadd.f32 %v5121_v47, %v4614_v38  ;;  %v916_v50 = vpop.f32.mrb[3].mxu0  ;;  %v934_v53 = vmul.f32 %v5950_v42, %v5950_v42  ;;  %v1046_v18 = vsub.f32 0.0, %v5950_v42 }
 0x235   :  { %v5960_v51 = vadd.f32 %v4614_v38, %v916_v50  ;;  %v932_v56 = vmul.f32 %v5954_v46, %v5954_v46  ;;  %v1044_v3 = vsub.f32 0.0, %v5954_v46 }
 0x236   :  { %v935_v54 = vmul.f32 %v5958_v49, %v5958_v49  ;;  %v1047_v24 = vsub.f32 0.0, %v5958_v49 }
 0x237   :  { %v933_v57 = vmul.f32 %v5960_v51, %v5960_v51 }
 0x238   :  { %v5492_v60 = vpack.i.bf16 %v935_v54, %v934_v53 }
 0x239   :  { %v5487_v61 = vpack.i.bf16 %v933_v57, %v932_v56  ;;  %v1045_v57 = vsub.f32 0.0, %v5960_v51 }
 0x23a   :  { %5493 = vrot.lane.b32.xlu1 %v5492_v60, %s5748_s23 }
 0x23b   :  { %5488 = vrot.lane.b32.xlu0 %v5487_v61, %s5748_s23 }
 0x23e   :  { %1052 = vrot.lane.b32.xlu1 %v1044_v3, %s5748_s23 }
 0x23f   :  { %125 = vbcast.lane.b32.xlu0 %v123_v2, 256 }
 0x242   :  { %106 = vbcast.lane.b32.xlu1 %v104_v4, 256 }
 0x243   :  { %258 = vbcast.lane.b32.xlu0 %v256_v5, 256 }
 0x246   :  { %110 = vbcast.lane.b32.xlu1 %v104_v4, 264 }
 0x247   :  { %277 = vbcast.lane.b32.xlu0 %v275_v7, 256 }
 0x24a   :  { %129 = vbcast.lane.b32.xlu1 %v123_v2, 264 }
 0x24b   :  { %1004 = vperm.xlu0 %5497, %v5688_v10  }
 0x24e   :  { %262 = vbcast.lane.b32.xlu1 %v256_v5, 264 }
 0x24f   :  { %148 = vbcast.lane.b32.xlu0 %v142_v11, 264 }
 0x252   :  { %281 = vbcast.lane.b32.xlu1 %v275_v7, 264 }
 0x253   :  { %300 = vbcast.lane.b32.xlu0 %v294_v12, 264 }
 0x256   :  { %1009 = vperm.xlu1 %5498, %v5690_v13  }
 0x257   :  { %114 = vbcast.lane.b32.xlu0 %v104_v4, 272 }
 0x25a   :  { %144 = vbcast.lane.b32.xlu1 %v142_v11, 256 }
 0x25b   :  { %163 = vbcast.lane.b32.xlu0 %v161_v15, 256 }
 0x25e   :  { %296 = vbcast.lane.b32.xlu1 %v294_v12, 256 }
 0x25f   :  { %266 = vbcast.lane.b32.xlu0 %v256_v5, 272 }
 0x262   :  { %1056 = vrot.lane.b32.xlu1 %v1046_v18, %s5748_s23 }
 0x263   :  { %315 = vbcast.lane.b32.xlu0 %v313_v17, 256 }
 0x266   :  { %133 = vbcast.lane.b32.xlu1 %v123_v2, 272 }
 0x267   :  { %152 = vbcast.lane.b32.xlu0 %v142_v11, 272 }
 0x26a   :  { %167 = vbcast.lane.b32.xlu1 %v161_v15, 264 }
 0x26b   :  { %186 = vbcast.lane.b32.xlu0 %v6022_v22, 264 }
 0x26e   :  { %285 = vbcast.lane.b32.xlu1 %v275_v7, 272 }
 0x26f   :  { %334 = vbcast.lane.b32.xlu0 %v6026_v23, 256 }
 0x272   :  { %319 = vbcast.lane.b32.xlu1 %v313_v17, 264 }
 0x273   :  { %1058 = vrot.lane.b32.xlu0 %v1047_v24, %s5748_s23 }
 0x276   :  { %182 = vbcast.lane.b32.xlu1 %v6022_v22, 256 }
 0x277   :  { %137 = vbcast.lane.b32.xlu0 %v123_v2, 280 }
 0x27a   :  { %304 = vbcast.lane.b32.xlu1 %v294_v12, 272 }
 0x27b   :  { %201 = vbcast.lane.b32.xlu0 %v6034_v26, 256 }
 0x27e   :  { %338 = vbcast.lane.b32.xlu1 %v6026_v23, 264 }
 0x27f   :  { %270 = vbcast.lane.b32.xlu0 %v256_v5, 280 }
 0x282   :  { %118 = vbcast.lane.b32.xlu1 %v104_v4, 280 }
 0x283   :  { %323 = vbcast.lane.b32.xlu0 %v313_v17, 272 }
 0x286   :  { %171 = vbcast.lane.b32.xlu1 %v161_v15, 272 }
 0x287   :  { %357 = vbcast.lane.b32.xlu0 %v6039_v27, 264 }
 0x28a   :  { %205 = vbcast.lane.b32.xlu1 %v6034_v26, 264 }
 0x28b   :  { %190 = vbcast.lane.b32.xlu0 %v6022_v22, 272 }
 0x28e   :  { %289 = vbcast.lane.b32.xlu1 %v275_v7, 280 }
 0x28f   :  { %224 = vbcast.lane.b32.xlu0 %v218_v29, 264 }
 0x292   :  { %353 = vbcast.lane.b32.xlu1 %v6039_v27, 256 }
 0x293   :  { %342 = vbcast.lane.b32.xlu0 %v6026_v23, 272 }
 0x296   :  { %156 = vbcast.lane.b32.xlu1 %v142_v11, 280 }
 0x297   :  { %376 = vbcast.lane.b32.xlu0 %v370_v30, 264 }
 0x29a   :  { %220 = vbcast.lane.b32.xlu1 %v218_v29, 256 }
 0x29b   :  { %209 = vbcast.lane.b32.xlu0 %v6034_v26, 272 }
 0x29e   :  { %308 = vbcast.lane.b32.xlu1 %v294_v12, 280 }
 0x29f   :  { %243 = vbcast.lane.b32.xlu0 %v237_v32, 264 }
 0x2a2   :  { %372 = vbcast.lane.b32.xlu1 %v370_v30, 256 }
 0x2a3   :  { %361 = vbcast.lane.b32.xlu0 %v6039_v27, 272 }
 0x2a6   :  { %175 = vbcast.lane.b32.xlu1 %v161_v15, 280 }
 0x2a7   :  { %395 = vbcast.lane.b32.xlu0 %v389_v33, 264 }
 0x2aa   :  { %239 = vbcast.lane.b32.xlu1 %v237_v32, 256 }
 0x2ab   :  { %228 = vbcast.lane.b32.xlu0 %v218_v29, 272 }
 0x2ac   :  { %v5494_v34 = vpop.permute.xlu1 %5493 }
 0x2ad   :  { %v5489_v35 = vpop.permute.xlu0 %5488  ;;  %v5496_v37 = vunpack.i.h.bf16 %v5494_v34  ;;  %v5495_v38 = vunpack.i.l.bf16 %v5494_v34 }
 0x2ae   :  { %v5491_v39 = vunpack.i.h.bf16 %v5489_v35  ;;  %v5490_v40 = vunpack.i.l.bf16 %v5489_v35  ;;  %327 = vbcast.lane.b32.xlu1 %v313_v17, 280 }
 0x2af   :  { %380 = vbcast.lane.b32.xlu0 %v370_v30, 272  ;;  %v955_v47 = vsel %vm434_vm0, %v5958_v49, %v5496_v37  ;;  %v954_v48 = vsel %vm434_vm0, %v5950_v42, %v5495_v38 }
 0x2b0   :  { %v953_v41 = vsel %vm434_vm0, %v5960_v51, %v5491_v39  ;;  %v952_v43 = vsel %vm434_vm0, %v5954_v46, %v5490_v40  ;;  %v6062_v50 = vpop.permute.xlu1 %1052  ;;  %v957_v52 = vpack.c.bf16 %v955_v47, %v954_v48 }
 0x2b1   :  { %v956_v45 = vpack.c.bf16 %v953_v41, %v952_v43  ;;  %v6069_v54 = vpop.permute.xlu0 %125 }
 0x2b2   :  { %391 = vbcast.lane.b32.xlu1 %v389_v33, 256  ;;  %8349 = vst [vmem:[#allocation14_spill] sm:$0xff] %v6069_v54 }
 0x2b3   :  { %5123 = vmatpush3.bf16.msra.mxu1 %v956_v45  ;;  %247 = vbcast.lane.b32.xlu0 %v237_v32, 272 }
 0x2b4   :  { %5124 = vmatprep.subr.bf16.mxu1 %v8168_v44  ;;  %v6067_v53 = vpop.permute.xlu1 %106 }
 0x2b5   :  { %8348 = vst [vmem:[#allocation13_spill] sm:$0xff] %v6067_v53  ;;  %v6079_v56 = vpop.permute.xlu0 %258 }
 0x2b6   :  { %194 = vbcast.lane.b32.xlu1 %v6022_v22, 280  ;;  %8351 = vst [vmem:[#allocation16_spill] sm:$0xff] %v6079_v56 }
 0x2b7   :  { %5125 = vmatpush3.bf16.msra.mxu1 %v957_v52  ;;  %399 = vbcast.lane.b32.xlu0 %v389_v33, 272 }
 0x2b8   :  { %5130 = vmatprep.subr.bf16.mxu1 %v8168_v44  ;;  %v6076_v55 = vpop.permute.xlu1 %110 }
 0x2b9   :  { %8350 = vst [vmem:[#allocation15_spill] sm:$0xff] %v6076_v55  ;;  %v6085_v61 = vpop.permute.xlu0 %277 }
 0x2ba   :  { %346 = vbcast.lane.b32.xlu1 %v6026_v23, 280  ;;  %5127 = vmatmul.mubr.msk.bf16.vlgmr.msra.gmra.mrb[8].mxu1 %vm434_vm0, %v5860_v0  ;;  %8353 = vst [vmem:[#allocation18_spill] sm:$0xff] %v6085_v61  ;;  %v6181_v0 = vsel %vm434_vm0, %v5954_v46, %v6062_v50 }
 0x2bb   :  { %384 = vbcast.lane.b32.xlu0 %v370_v30, 280  ;;  %5134 = vmatprep.mubr.msk.bf16.mxu1 %vm5747_vm2, %v8168_v44  ;;  %v1072_v59 = vadd.f32 %v6181_v0, %v6069_v54  ;;  %v1068_v16 = vadd.f32 %v6181_v0, %v6067_v53  ;;  %v1104_v46 = vadd.f32 %v6181_v0, %v6085_v61 }
 0x2bc   :  { %v6083_v60 = vpop.permute.xlu1 %129 }
 0x2bd   :  { %8352 = vst [vmem:[#allocation17_spill] sm:$0xff] %v6083_v60 }
 0x2be   :  { %213 = vbcast.lane.b32.xlu1 %v6034_v26, 280 }
 0x2bf   :  { %403 = vbcast.lane.b32.xlu0 %v389_v33, 280 }
 0x2c0   :  { %v6088_v1 = vpop.permute.xlu1 %262 }
 0x2c1   :  { %8354 = vst [vmem:[#allocation19_spill] sm:$0xff] %v6088_v1 }
 0x2c2   :  { %1054 = vrot.lane.b32.xlu1 %v1045_v57, %s5748_s23 }
 0x2c4   :  { %v6094_v4 = vpop.permute.xlu1 %281 }
 0x2c5   :  { %8357 = vst [vmem:[#allocation22_spill] sm:$0xff] %v6094_v4 }
 0x2c6   :  { %365 = vbcast.lane.b32.xlu1 %v6039_v27, 280 }
 0x2ca   :  { %v6090_v2 = vpop.permute.xlu0 %1004  ;;  %232 = vbcast.lane.b32.xlu1 %v218_v29, 280 }
 0x2cb   :  { %8355 = vst [vmem:[#allocation20_spill] sm:$0xff] %v6090_v2 }
 0x2ce   :  { %v6092_v3 = vpop.permute.xlu0 %148  ;;  %251 = vbcast.lane.b32.xlu1 %v237_v32, 280 }
 0x2cf   :  { %8356 = vst [vmem:[#allocation21_spill] sm:$0xff] %v6092_v3 }
 0x2d2   :  { %v6096_v5 = vpop.permute.xlu0 %300 }
 0x2d3   :  { %8358 = vst [vmem:[#allocation23_spill] sm:$0xff] %v6096_v5 }
 0x2d5   :  { %v6098_v7 = vpop.permute.xlu1 %1009 }
 0x2d6   :  { %8359 = vst [vmem:[#allocation24_spill] sm:$0xff] %v6098_v7  ;;  %v6100_v9 = vpop.permute.xlu0 %114  ;;  %v1100_v7 = vadd.f32 %v6181_v0, %v6079_v56 }
 0x2d7   :  { %8360 = vst [vmem:[#allocation25_spill] sm:$0xff] %v6100_v9 }
 0x2d9   :  { %v6102_v10 = vpop.permute.xlu1 %144 }
 0x2da   :  { %8361 = vst [vmem:[#allocation26_spill] sm:$0xff] %v6102_v10  ;;  %v6104_v11 = vpop.permute.xlu0 %163  ;;  %v1076_v50 = vadd.f32 %v6181_v0, %v6102_v10 }
 0x2db   :  { %8362 = vst [vmem:[#allocation27_spill] sm:$0xff] %v6104_v11 }
 0x2dd   :  { %v6106_v12 = vpop.permute.xlu1 %296 }
 0x2de   :  { %8363 = vst [vmem:[#allocation28_spill] sm:$0xff] %v6106_v12  ;;  %v6108_v13 = vpop.permute.xlu0 %266 }
 0x2df   :  { %8364 = vst [vmem:[#allocation29_spill] sm:$0xff] %v6108_v13 }
 0x2e1   :  { %v1057_v14 = vpop.permute.xlu1 %1056 }
 0x2e2   :  { %v6110_v15 = vpop.permute.xlu0 %315  ;;  %v6187_v19 = vsel %vm434_vm0, %v5950_v42, %v1057_v14  ;;  %v1080_v42 = vadd.f32 %v6181_v0, %v6104_v11  ;;  %v1108_v14 = vadd.f32 %v6181_v0, %v6106_v12  ;;  %v6220_v12 = vsel %vm1132_vm3, %v1072_v59, -inf }
 0x2e3   :  { %8365 = vst [vmem:[#allocation30_spill] sm:$0xff] %v6110_v15  ;;  %v1112_v54 = vadd.f32 %v6181_v0, %v6110_v15  ;;  %v1070_v61 = vadd.f32 %v6187_v19, %v6100_v9  ;;  %v1102_v56 = vadd.f32 %v6187_v19, %v6108_v13  ;;  %v6223_v15 = vsel %vm1132_vm3, %v1068_v16, -inf }
 0x2e4   :  { %v6234_v13 = vsel %vm1132_vm3, %v1076_v50, -inf  ;;  %v6240_v59 = vsel %vm1132_vm3, %v1108_v14, -inf }
 0x2e5   :  { %v6112_v17 = vpop.permute.xlu1 %133  ;;  %v6243_v16 = vsel %vm1132_vm3, %v1112_v54, -inf  ;;  %v6254_v50 = vsel %vm1132_vm3, %v1102_v56, -inf }
 0x2e6   :  { %8366 = vst [vmem:[#allocation31_spill] sm:$0xff] %v6112_v17  ;;  %v6114_v18 = vpop.permute.xlu0 %152  ;;  %v1074_v53 = vadd.f32 %v6187_v19, %v6112_v17  ;;  %v6226_v17 = vsel %vm1132_vm3, %v1100_v7, -inf  ;;  %8404 = vst [vmem:[#allocation69_spill] sm:$0xff] %v6243_v16 }
 0x2e7   :  { %8367 = vst [vmem:[#allocation32_spill] sm:$0xff] %v6114_v18  ;;  %v1078_v11 = vadd.f32 %v6187_v19, %v6114_v18  ;;  %8403 = vst [vmem:[#allocation68_spill] sm:$0xff] %v6226_v17  ;;  %v6237_v18 = vsel %vm1132_vm3, %v1080_v42, -inf }
 0x2e8   :  { %v6246_v7 = vsel %vm1132_vm3, %v1074_v53, -inf }
 0x2e9   :  { %v6116_v21 = vpop.permute.xlu1 %167  ;;  %v6257_v42 = vsel %vm1132_vm3, %v1078_v11, -inf }
 0x2ea   :  { %8368 = vst [vmem:[#allocation33_spill] sm:$0xff] %v6116_v21  ;;  %v6118_v22 = vpop.permute.xlu0 %186 }
 0x2eb   :  { %8369 = vst [vmem:[#allocation34_spill] sm:$0xff] %v6118_v22 }
 0x2ed   :  { %v6120_v23 = vpop.permute.xlu1 %285 }
 0x2ee   :  { %8370 = vst [vmem:[#allocation35_spill] sm:$0xff] %v6120_v23  ;;  %v6122_v24 = vpop.permute.xlu0 %334  ;;  %v1106_v9 = vadd.f32 %v6187_v19, %v6120_v23 }
 0x2ef   :  { %8371 = vst [vmem:[#allocation36_spill] sm:$0xff] %v6122_v24  ;;  %v1116_v14 = vadd.f32 %v6181_v0, %v6122_v24 }
 0x2f1   :  { %v6124_v25 = vpop.permute.xlu1 %319 }
 0x2f2   :  { %8372 = vst [vmem:[#allocation37_spill] sm:$0xff] %v6124_v25  ;;  %v1059_v26 = vpop.permute.xlu0 %1058 }
 0x2f3   :  { %v6263_v54 = vsel %vm434_vm0, %v5958_v49, %v1059_v26 }
 0x2f5   :  { %v6126_v27 = vpop.permute.xlu1 %182 }
 0x2f6   :  { %8373 = vst [vmem:[#allocation38_spill] sm:$0xff] %v6126_v27  ;;  %v6128_v28 = vpop.permute.xlu0 %137  ;;  %v1084_v53 = vadd.f32 %v6181_v0, %v6126_v27 }
 0x2f7   :  { %8374 = vst [vmem:[#allocation39_spill] sm:$0xff] %v6128_v28  ;;  %v1075_v56 = vadd.f32 %v6263_v54, %v6128_v28 }
 0x2f9   :  { %v6130_v29 = vpop.permute.xlu1 %304 }
 0x2fa   :  { %8375 = vst [vmem:[#allocation40_spill] sm:$0xff] %v6130_v29  ;;  %v6132_v30 = vpop.permute.xlu0 %201  ;;  %v1110_v11 = vadd.f32 %v6187_v19, %v6130_v29 }
 0x2fb   :  { %8376 = vst [vmem:[#allocation41_spill] sm:$0xff] %v6132_v30  ;;  %v1088_v24 = vadd.f32 %v6181_v0, %v6132_v30 }
 0x2fd   :  { %v6134_v31 = vpop.permute.xlu1 %338 }
 0x2fe   :  { %8377 = vst [vmem:[#allocation42_spill] sm:$0xff] %v6134_v31  ;;  %v6136_v32 = vpop.permute.xlu0 %270 }
 0x2ff   :  { %8378 = vst [vmem:[#allocation43_spill] sm:$0xff] %v6136_v32  ;;  %v1103_v49 = vadd.f32 %v6263_v54, %v6136_v32 }
 0x301   :  { %v6138_v33 = vpop.permute.xlu1 %118 }
 0x302   :  { %8379 = vst [vmem:[#allocation44_spill] sm:$0xff] %v6138_v33  ;;  %v6140_v34 = vpop.permute.xlu0 %323  ;;  %v1071_v26 = vadd.f32 %v6263_v54, %v6138_v33  ;;  %v6297_v33 = vsel %vm1132_vm3, %v1116_v14, -inf  ;;  %v6315_v14 = vsel %vm1132_vm3, %v1088_v24, -inf }
 0x303   :  { %8380 = vst [vmem:[#allocation45_spill] sm:$0xff] %v6140_v34  ;;  %v1114_v27 = vadd.f32 %v6187_v19, %v6140_v34  ;;  %8408 = vst [vmem:[#allocation73_spill] sm:$0xff] %v6297_v33  ;;  %v6300_v34 = vsel %vm1132_vm3, %v1084_v53, -inf  ;;  %v6320_v33 = vsel %vm1132_vm3, %v1103_v49, -inf }
 0x305   :  { %v6142_v35 = vpop.permute.xlu1 %171 }
 0x306   :  { %8381 = vst [vmem:[#allocation46_spill] sm:$0xff] %v6142_v35  ;;  %v6144_v37 = vpop.permute.xlu0 %357 }
 0x307   :  { %8382 = vst [vmem:[#allocation47_spill] sm:$0xff] %v6144_v37 }
 0x309   :  { %v6146_v38 = vpop.permute.xlu1 %205 }
 0x30a   :  { %8383 = vst [vmem:[#allocation48_spill] sm:$0xff] %v6146_v38  ;;  %v6148_v39 = vpop.permute.xlu0 %190 }
 0x30b   :  { %8384 = vst [vmem:[#allocation49_spill] sm:$0xff] %v6148_v39  ;;  %v1086_v28 = vadd.f32 %v6187_v19, %v6148_v39 }
 0x30d   :  { %v6150_v40 = vpop.permute.xlu1 %289 }
 0x30e   :  { %8385 = vst [vmem:[#allocation50_spill] sm:$0xff] %v6150_v40  ;;  %v6152_v41 = vpop.permute.xlu0 %224  ;;  %v1107_v29 = vadd.f32 %v6263_v54, %v6150_v40 }
 0x30f   :  { %8386 = vst [vmem:[#allocation51_spill] sm:$0xff] %v6152_v41 }
 0x310   :  { %v6335_v24 = vsel %vm1132_vm3, %v1107_v29, -inf }
 0x311   :  { %v6154_v43 = vpop.permute.xlu1 %353  ;;  %8411 = vst [vmem:[#allocation76_spill] sm:$0xff] %v6335_v24 }
 0x312   :  { %8387 = vst [vmem:[#allocation52_spill] sm:$0xff] %v6154_v43  ;;  %v6156_v45 = vpop.permute.xlu0 %342  ;;  %v1120_v30 = vadd.f32 %v6181_v0, %v6154_v43  ;;  %v6309_v43 = vsel %vm1132_vm3, %v1075_v56, -inf }
 0x313   :  { %8388 = vst [vmem:[#allocation53_spill] sm:$0xff] %v6156_v45  ;;  %v1118_v32 = vadd.f32 %v6187_v19, %v6156_v45  ;;  %v6312_v45 = vsel %vm1132_vm3, %v1110_v11, -inf  ;;  %v6332_v11 = vsel %vm1132_vm3, %v1086_v28, -inf }
 0x315   :  { %v6158_v47 = vpop.permute.xlu1 %156  ;;  %v6341_v49 = vsel %vm1132_vm3, %v1118_v32, -inf }
 0x316   :  { %8389 = vst [vmem:[#allocation54_spill] sm:$0xff] %v6158_v47  ;;  %v6160_v48 = vpop.permute.xlu0 %376  ;;  %v1079_v39 = vadd.f32 %v6263_v54, %v6158_v47  ;;  %v6323_v47 = vsel %vm1132_vm3, %v1071_v26, -inf  ;;  %8412 = vst [vmem:[#allocation77_spill] sm:$0xff] %v6341_v49 }
 0x317   :  { %8390 = vst [vmem:[#allocation55_spill] sm:$0xff] %v6160_v48 }
 0x319   :  { %v6162_v52 = vpop.permute.xlu1 %220 }
 0x31a   :  { %8391 = vst [vmem:[#allocation56_spill] sm:$0xff] %v6162_v52  ;;  %v6164_v57 = vpop.permute.xlu0 %209  ;;  %v1092_v40 = vadd.f32 %v6181_v0, %v6162_v52  ;;  %v6326_v52 = vsel %vm1132_vm3, %v1114_v27, -inf  ;;  %v6346_v27 = vsel %vm1132_vm3, %v1079_v39, -inf }
 0x31b   :  { %8392 = vst [vmem:[#allocation57_spill] sm:$0xff] %v6164_v57  ;;  %v1090_v53 = vadd.f32 %v6187_v19, %v6164_v57  ;;  %8410 = vst [vmem:[#allocation75_spill] sm:$0xff] %v6326_v52  ;;  %v6338_v57 = vsel %vm1132_vm3, %v1120_v30, -inf }
 0x31d   :  { %v6166_v8 = vpop.permute.xlu1 %308  ;;  %v6358_v30 = vsel %vm1132_vm3, %v1090_v53, -inf }
 0x31e   :  { %8393 = vst [vmem:[#allocation58_spill] sm:$0xff] %v6166_v8  ;;  %v6168_v63 = vpop.permute.xlu0 %243  ;;  %v1111_v28 = vadd.f32 %v6263_v54, %v6166_v8 }
 0x31f   :  { %8394 = vst [vmem:[#allocation59_spill] sm:$0xff] %v6168_v63 }
 0x321   :  { %v6170_v44 = vpop.permute.xlu1 %372 }
 0x322   :  { %8395 = vst [vmem:[#allocation60_spill] sm:$0xff] %v6170_v44  ;;  %v6172_v36 = vpop.permute.xlu0 %361  ;;  %v1124_v29 = vadd.f32 %v6181_v0, %v6170_v44 }
 0x323   :  { %8396 = vst [vmem:[#allocation61_spill] sm:$0xff] %v6172_v36  ;;  %v1122_v32 = vadd.f32 %v6187_v19, %v6172_v36 }
 0x325   :  { %v6174_v58 = vpop.permute.xlu1 %175 }
 0x326   :  { %8397 = vst [vmem:[#allocation62_spill] sm:$0xff] %v6174_v58  ;;  %v6176_v62 = vpop.permute.xlu0 %395  ;;  %v1083_v39 = vadd.f32 %v6263_v54, %v6174_v58 }
 0x327   :  { %8398 = vst [vmem:[#allocation63_spill] sm:$0xff] %v6176_v62  ;;  %v6231_v62 = vsel %vm1132_vm3, %v1104_v46, -inf  ;;  %v6251_v46 = vsel %vm1132_vm3, %v1070_v61, -inf  ;;  %v6270_v61 = vsel %vm1132_vm3, %v1106_v9, -inf  ;;  %v1082_v9 = vadd.f32 %v6187_v19, %v6142_v35 }
 0x329   :  { %v6183_v20 = vpop.permute.xlu1 %239  ;;  %v6329_v56 = vsel %vm1132_vm3, %v1082_v9, -inf  ;;  %v6349_v9 = vsel %vm1132_vm3, %v1092_v40, -inf }
 0x32a   :  { %8399 = vst [vmem:[#allocation64_spill] sm:$0xff] %v6183_v20  ;;  %v6189_v6 = vpop.permute.xlu0 %228  ;;  %v1096_v40 = vadd.f32 %v6181_v0, %v6183_v20 }
 0x32b   :  { %8400 = vst [vmem:[#allocation65_spill] sm:$0xff] %v6189_v6  ;;  %v1094_v8 = vadd.f32 %v6187_v19, %v6189_v6 }
 0x32d   :  { %v6209_v2 = vpop.permute.xlu1 %327 }
 0x32e   :  { %8401 = vst [vmem:[#allocation66_spill] sm:$0xff] %v6209_v2  ;;  %v6217_v10 = vpop.permute.xlu0 %380  ;;  %v1115_v44 = vadd.f32 %v6263_v54, %v6209_v2  ;;  %v6385_v2 = vsel %vm1132_vm3, %v1111_v28, -inf }
 0x32f   :  { %8402 = vst [vmem:[#allocation67_spill] sm:$0xff] %v6217_v10  ;;  %v1126_v49 = vadd.f32 %v6187_v19, %v6217_v10  ;;  %v6388_v10 = vsel %vm1132_vm3, %v1124_v29, -inf  ;;  %v1214_v29 = vsel %vm1132_vm3, %v1094_v8, -inf }
 0x331   :  { %v6248_v17 = vpop.permute.xlu1 %391 }
 0x332   :  { %8405 = vst [vmem:[#allocation70_spill] sm:$0xff] %v6248_v17  ;;  %v6267_v23 = vpop.permute.xlu0 %247  ;;  %v1128_v53 = vadd.f32 %v6181_v0, %v6248_v17 }
 0x333   :  { %8406 = vst [vmem:[#allocation71_spill] sm:$0xff] %v6267_v23  ;;  %v1098_v36 = vadd.f32 %v6187_v19, %v6267_v23 }
 0x335   :  { %v6294_v16 = vpop.permute.xlu1 %194 }
 0x336   :  { %8407 = vst [vmem:[#allocation72_spill] sm:$0xff] %v6294_v16  ;;  %v6306_v35 = vpop.permute.xlu0 %399  ;;  %v1087_v58 = vadd.f32 %v6263_v54, %v6294_v16  ;;  %v6405_v16 = vsel %vm1132_vm3, %v1115_v44, -inf }
 0x337   :  { %8409 = vst [vmem:[#allocation74_spill] sm:$0xff] %v6306_v35  ;;  %v1130_v20 = vadd.f32 %v6187_v19, %v6306_v35  ;;  %v1305_v19 = vsel %vm1132_vm3, %v1122_v32, -inf  ;;  %v6398_v35 = vsel %vm1132_vm3, %v1083_v39, -inf  ;;  %v1227_v32 = vsel %vm1132_vm3, %v1098_v36, -inf }
 0x338   :  { %v6415_v39 = vsel %vm1132_vm3, %v1087_v58, -inf }
 0x339   :  { %v6343_v26 = vpop.permute.xlu1 %346 }
 0x33a   :  { %8413 = vst [vmem:[#allocation78_spill] sm:$0xff] %v6343_v26  ;;  %v6355_v52 = vpop.permute.xlu0 %384  ;;  %v1119_v6 = vadd.f32 %v6263_v54, %v6343_v26  ;;  %v1224_v26 = vsel %vm1132_vm3, %v1096_v40, -inf  ;;  %v6418_v40 = vsel %vm1132_vm3, %v1130_v20, -inf }
 0x33b   :  { %8414 = vst [vmem:[#allocation79_spill] sm:$0xff] %v6355_v52  ;;  %v1127_v0 = vadd.f32 %v6263_v54, %v6355_v52  ;;  %v6408_v52 = vsel %vm1132_vm3, %v1126_v49, -inf  ;;  %8417 = vst [vmem:[#allocation82_spill] sm:$0xff] %v6418_v40 }
 0x33d   :  { %v6382_v24 = vpop.permute.xlu1 %213  ;;  %v6424_v44 = vsel %vm1132_vm3, %v1127_v0, -inf }
 0x33e   :  { %8415 = vst [vmem:[#allocation80_spill] sm:$0xff] %v6382_v24  ;;  %v1091_v17 = vadd.f32 %v6263_v54, %v6382_v24  ;;  %v6394_v23 = vpop.permute.xlu0 %403  ;;  %v6411_v24 = vsel %vm1132_vm3, %v1128_v53, -inf  ;;  %8418 = vst [vmem:[#allocation83_spill] sm:$0xff] %v6424_v44 }
 0x33f   :  { %8416 = vst [vmem:[#allocation81_spill] sm:$0xff] %v6394_v23  ;;  %v1131_v28 = vadd.f32 %v6263_v54, %v6394_v23  ;;  %v6421_v23 = vsel %vm1132_vm3, %v1119_v6, -inf }
 0x340   :  { %v6427_v49 = vsel %vm1132_vm3, %v1091_v17, -inf }
 0x341   :  { %v1055_v8 = vpop.permute.xlu1 %1054  ;;  %v6430_v53 = vsel %vm1132_vm3, %v1131_v28, -inf }
 0x342   :  { %8419 = vst [vmem:[#allocation84_spill] sm:$0xff] %v6430_v53  ;;  %v1065_v36 = vsel %vm434_vm0, %v5960_v51, %v1055_v8 }
 0x343   :  { %v1121_v58 = vadd.f32 %v1065_v36, %v6144_v37  ;;  %v1093_v20 = vadd.f32 %v1065_v36, %v6152_v41  ;;  %v1097_v6 = vadd.f32 %v1065_v36, %v6168_v63  ;;  %v1069_v40 = vadd.f32 %v1065_v36, %v6076_v55 }
 0x344   :  { %v1073_v0 = vadd.f32 %v1065_v36, %v6083_v60  ;;  %v1077_v44 = vadd.f32 %v1065_v36, %v6092_v3  ;;  %v1081_v17 = vadd.f32 %v1065_v36, %v6116_v21  ;;  %v1085_v28 = vadd.f32 %v1065_v36, %v6118_v22 }
 0x345   :  { %v6442_v53 = vpop.permute.xlu1 %365  ;;  %v1303_v51 = vsel %vm1132_vm3, %v1121_v58, -inf  ;;  %v1212_v8 = vsel %vm1132_vm3, %v1093_v20, -inf  ;;  %v1225_v37 = vsel %vm1132_vm3, %v1097_v6, -inf  ;;  %v6448_v63 = vadd.f32 %v1065_v36, %v6146_v38 }
 0x346   :  { %8420 = vst [vmem:[#allocation85_spill] sm:$0xff] %v6442_v53  ;;  %v1123_v41 = vadd.f32 %v6263_v54, %v6442_v53  ;;  %v1304_v3 = vmax.f32 %v6338_v57, %v1303_v51  ;;  %v1213_v21 = vmax.f32 %v6349_v9, %v1212_v8  ;;  %v1226_v60 = vmax.f32 %v1224_v26, %v1225_v37  ;;  %v8422_v9 = vld [vmem:[#allocation63_spill] sm:$0xff] }
 0x347   :  { %v6455_v22 = vadd.f32 %v1065_v36, %v6088_v1  ;;  %v6458_v58 = vadd.f32 %v1065_v36, %v6094_v4  ;;  %v6461_v20 = vadd.f32 %v1065_v36, %v6096_v5  ;;  %v6464_v6 = vadd.f32 %v1065_v36, %v6124_v25 }
 0x348   :  { %v1306_v38 = vmax.f32 %v1304_v3, %v1305_v19  ;;  %v1307_v53 = vsel %vm1132_vm3, %v1123_v41, -inf  ;;  %v1215_v55 = vmax.f32 %v1213_v21, %v1214_v29  ;;  %v1228_v57 = vmax.f32 %v1226_v60, %v1227_v32 }
 0x349   :  { %v6467_v51 = vpop.permute.xlu1 %232  ;;  %v6470_v37 = vadd.f32 %v1065_v36, %v6134_v31  ;;  %v6473_v26 = vadd.f32 %v1065_v36, %v6160_v48  ;;  %v6476_v8 = vadd.f32 %v1065_v36, %v8422_v9  ;;  %v1134_v5 = vsel %vm1132_vm3, %v1069_v40, -inf }
 0x34a   :  { %8421 = vst [vmem:[#allocation86_spill] sm:$0xff] %v6467_v51  ;;  %v1308_v25 = vmax.f32 %v1306_v38, %v1307_v53  ;;  %v1095_v3 = vadd.f32 %v6263_v54, %v6467_v51  ;;  %v1135_v21 = vmax.f32 %v6223_v15, %v1134_v5  ;;  %v1147_v60 = vsel %vm1132_vm3, %v1073_v0, -inf }
 0x34b   :  { %v1148_v41 = vmax.f32 %v6220_v12, %v1147_v60  ;;  %v1160_v19 = vsel %vm1132_vm3, %v1077_v44, -inf  ;;  %v1173_v29 = vsel %vm1132_vm3, %v1081_v17, -inf  ;;  %v1186_v32 = vsel %vm1132_vm3, %v1085_v28, -inf }
 0x34c   :  { %v1309_v36 = vrot.slane %v1308_v25, 4  ;;  %v1216_v9 = vsel %vm1132_vm3, %v1095_v3, -inf  ;;  %v1137_v38 = vmax.f32 %v1135_v21, %v6251_v46  ;;  %v1161_v40 = vmax.f32 %v6234_v13, %v1160_v19 }
 0x34d   :  { %v1217_v53 = vmax.f32 %v1215_v55, %v1216_v9  ;;  %v6490_v48 = vpop.permute.xlu1 %251  ;;  %v1150_v5 = vmax.f32 %v1148_v41, %v6246_v7  ;;  %v1174_v12 = vmax.f32 %v6237_v18, %v1173_v29  ;;  %v1187_v15 = vmax.f32 %v6300_v34, %v1186_v32 }
 0x34e   :  { %8423 = vst [vmem:[#allocation87_spill] sm:$0xff] %v6490_v48  ;;  %v1310_v44 = vmax.f32 %v1308_v25, %v1309_v36  ;;  %v1099_v0 = vadd.f32 %v6263_v54, %v6490_v48  ;;  %v1139_v17 = vmax.f32 %v1137_v38, %v6323_v47  ;;  %v1163_v28 = vmax.f32 %v1161_v40, %v6257_v42 }
 0x34f   :  { %v1218_v46 = vrot.slane %v1217_v53, 4  ;;  %v1152_v13 = vmax.f32 %v1150_v5, %v6309_v43  ;;  %v1176_v55 = vmax.f32 %v1174_v12, %v6329_v56  ;;  %v1189_v9 = vmax.f32 %v1187_v15, %v6332_v11 }
 0x350   :  { %v1311_v7 = vrot.slane %v1310_v44, 2  ;;  %v1229_v18 = vsel %vm1132_vm3, %v1099_v0, -inf  ;;  %v1140_v3 = vrot.slane %v1139_v17, 4  ;;  %v1165_v25 = vmax.f32 %v1163_v28, %v6346_v27 }
 0x351   :  { %v1219_v34 = vmax.f32 %v1217_v53, %v1218_v46  ;;  %v1230_v21 = vmax.f32 %v1228_v57, %v1229_v18  ;;  %v1153_v54 = vrot.slane %v1152_v13, 4  ;;  %v1178_v47 = vmax.f32 %v1176_v55, %v6398_v35 }
 0x352   :  { %v1312_v60 = vmax.f32 %v1310_v44, %v1311_v7  ;;  %v1141_v42 = vmax.f32 %v1139_v17, %v1140_v3  ;;  %v1166_v41 = vrot.slane %v1165_v25, 4  ;;  %v1191_v43 = vmax.f32 %v1189_v9, %v6415_v39 }
 0x353   :  { %v1220_v19 = vrot.slane %v1219_v34, 2  ;;  %v1231_v56 = vrot.slane %v1230_v21, 4  ;;  %v1154_v29 = vmax.f32 %v1152_v13, %v1153_v54  ;;  %v1179_v11 = vrot.slane %v1178_v47, 4 }
 0x354   :  { %v1313_v32 = vrot.slane %v1312_v60, 1  ;;  %v1142_v36 = vrot.slane %v1141_v42, 2  ;;  %v1167_v38 = vmax.f32 %v1165_v25, %v1166_v41  ;;  %v1192_v40 = vrot.slane %v1191_v43, 4 }
 0x355   :  { %v1221_v5 = vmax.f32 %v1219_v34, %v1220_v19  ;;  %v1232_v27 = vmax.f32 %v1230_v21, %v1231_v56  ;;  %v1155_v53 = vrot.slane %v1154_v29, 2  ;;  %v1180_v57 = vmax.f32 %v1178_v47, %v1179_v11 }
 0x356   :  { %v6506_v12 = vmax.f32 %v1312_v60, %v1313_v32  ;;  %v1143_v35 = vmax.f32 %v1141_v42, %v1142_v36  ;;  %v1168_v15 = vrot.slane %v1167_v38, 2  ;;  %v1193_v44 = vmax.f32 %v1191_v43, %v1192_v40 }
 0x357   :  { %v1222_v0 = vrot.slane %v1221_v5, 1  ;;  %v1233_v17 = vrot.slane %v1232_v27, 2  ;;  %v1156_v39 = vmax.f32 %v1154_v29, %v1155_v53  ;;  %v1181_v28 = vrot.slane %v1180_v57, 2  ;;  %v8424_v29 = vld [vmem:[#allocation68_spill] sm:$0xff] }
 0x358   :  { %v1144_v46 = vrot.slane %v1143_v35, 1  ;;  %v1169_v13 = vmax.f32 %v1167_v38, %v1168_v15  ;;  %v1194_v55 = vrot.slane %v1193_v44, 2  ;;  %v1199_v9 = vsel %vm1132_vm3, %v6448_v63, -inf  ;;  %v8425_v15 = vld [vmem:[#allocation69_spill] sm:$0xff] }
 0x359   :  { %v6510_v7 = vmax.f32 %v1221_v5, %v1222_v0  ;;  %v1234_v18 = vmax.f32 %v1232_v27, %v1233_v17  ;;  %v1157_v3 = vrot.slane %v1156_v39, 1  ;;  %v1182_v25 = vmax.f32 %v1180_v57, %v1181_v28  ;;  %v8428_v28 = vld [vmem:[#allocation75_spill] sm:$0xff] }
 0x35a   :  { %v6512_v34 = vmax.f32 %v1143_v35, %v1144_v46  ;;  %v1170_v21 = vrot.slane %v1169_v13, 1  ;;  %v1195_v54 = vmax.f32 %v1193_v44, %v1194_v55  ;;  %v1200_v47 = vmax.f32 %v6315_v14, %v1199_v9  ;;  %v8426_v44 = vld [vmem:[#allocation73_spill] sm:$0xff] }
 0x35b   :  { %v1235_v60 = vrot.slane %v1234_v18, 1  ;;  %v6515_v42 = vmax.f32 %v1156_v39, %v1157_v3  ;;  %v1183_v41 = vrot.slane %v1182_v25, 1  ;;  %v1238_v43 = vsel %vm1132_vm3, %v6455_v22, -inf  ;;  %v8427_v39 = vld [vmem:[#allocation76_spill] sm:$0xff] }
 0x35c   :  { %v6519_v19 = vmax.f32 %v1169_v13, %v1170_v21  ;;  %v1196_v63 = vrot.slane %v1195_v54, 1  ;;  %v1202_v56 = vmax.f32 %v1200_v47, %v6358_v30  ;;  %v1239_v11 = vmax.f32 %v8424_v29, %v1238_v43  ;;  %v8430_v21 = vld [vmem:[#allocation83_spill] sm:$0xff]  ;;  %v8431_v47 = vld [vmem:[#allocation82_spill] sm:$0xff] }
 0x35d   :  { %v6523_v32 = vmax.f32 %v1182_v25, %v1183_v41  ;;  %v6525_v36 = vmax.f32 %v1234_v18, %v1235_v60  ;;  %v1251_v14 = vsel %vm1132_vm3, %v6458_v58, -inf  ;;  %v1264_v38 = vsel %vm1132_vm3, %v6461_v20, -inf }
 0x35e   :  { %v6531_v40 = vmax.f32 %v1195_v54, %v1196_v63  ;;  %v1204_v22 = vmax.f32 %v1202_v56, %v6427_v49  ;;  %v1241_v5 = vmax.f32 %v1239_v11, %v6254_v50  ;;  %v1252_v30 = vmax.f32 %v6231_v62, %v1251_v14 }
 0x35f   :  { %v1265_v27 = vmax.f32 %v6240_v59, %v1264_v38  ;;  %v1277_v53 = vsel %vm1132_vm3, %v6464_v6, -inf  ;;  %v1290_v57 = vsel %vm1132_vm3, %v6470_v37, -inf  ;;  %v1316_v58 = vsel %vm1132_vm3, %v6473_v26, -inf }
 0x360   :  { %v1205_v20 = vrot.slane %v1204_v22, 4  ;;  %v1243_v35 = vmax.f32 %v1241_v5, %v6320_v33  ;;  %v1254_v49 = vmax.f32 %v1252_v30, %v6270_v61  ;;  %v1278_v50 = vmax.f32 %v8425_v15, %v1277_v53  ;;  %v8429_v61 = vld [vmem:[#allocation77_spill] sm:$0xff] }
 0x361   :  { %v1267_v62 = vmax.f32 %v1265_v27, %v6312_v45  ;;  %v1291_v59 = vmax.f32 %v8426_v44, %v1290_v57  ;;  %v1317_v0 = vmax.f32 %v6388_v10, %v1316_v58  ;;  %v1329_v6 = vsel %vm1132_vm3, %v6476_v8, -inf }
 0x362   :  { %v1206_v37 = vmax.f32 %v1204_v22, %v1205_v20  ;;  %v1244_v17 = vrot.slane %v1243_v35, 4  ;;  %v1256_v26 = vmax.f32 %v1254_v49, %v8427_v39  ;;  %v1280_v46 = vmax.f32 %v1278_v50, %v8428_v28 }
 0x363   :  { %v1269_v33 = vmax.f32 %v1267_v62, %v6385_v2  ;;  %v1293_v13 = vmax.f32 %v1291_v59, %v8429_v61  ;;  %v1319_v55 = vmax.f32 %v1317_v0, %v6408_v52  ;;  %v1330_v45 = vmax.f32 %v6411_v24, %v1329_v6  ;;  %v8432_v24 = vld [vmem:[#allocation84_spill] sm:$0xff] }
 0x364   :  { %v1207_v9 = vrot.slane %v1206_v37, 2  ;;  %v1245_v18 = vmax.f32 %v1243_v35, %v1244_v17  ;;  %v1257_v10 = vrot.slane %v1256_v26, 4  ;;  %v1282_v3 = vmax.f32 %v1280_v46, %v6405_v16 }
 0x365   :  { %v1270_v8 = vrot.slane %v1269_v33, 4  ;;  %v1295_v25 = vmax.f32 %v1293_v13, %v6421_v23  ;;  %v1321_v54 = vmax.f32 %v1319_v55, %v8430_v21  ;;  %v1332_v60 = vmax.f32 %v1330_v45, %v8431_v47 }
 0x366   :  { %v1208_v41 = vmax.f32 %v1206_v37, %v1207_v9  ;;  %v1246_v2 = vrot.slane %v1245_v18, 2  ;;  %v1258_v43 = vmax.f32 %v1256_v26, %v1257_v10  ;;  %v1283_v63 = vrot.slane %v1282_v3, 4 }
 0x367   :  { %v1271_v56 = vmax.f32 %v1269_v33, %v1270_v8  ;;  %v1296_v52 = vrot.slane %v1295_v25, 4  ;;  %v1322_v29 = vrot.slane %v1321_v54, 4  ;;  %v1334_v11 = vmax.f32 %v1332_v60, %v8432_v24 }
 0x368   :  { %v1209_v14 = vrot.slane %v1208_v41, 1  ;;  %v1247_v38 = vmax.f32 %v1245_v18, %v1246_v2  ;;  %v1259_v22 = vrot.slane %v1258_v43, 2  ;;  %v1284_v16 = vmax.f32 %v1282_v3, %v1283_v63 }
 0x369   :  { %v1272_v5 = vrot.slane %v1271_v56, 2  ;;  %v1297_v30 = vmax.f32 %v1295_v25, %v1296_v52  ;;  %v1323_v23 = vmax.f32 %v1321_v54, %v1322_v29  ;;  %v1335_v27 = vrot.slane %v1334_v11, 4 }
 0x36a   :  { %v6562_v53 = vmax.f32 %v1208_v41, %v1209_v14  ;;  %v1248_v57 = vrot.slane %v1247_v38, 1  ;;  %v1260_v58 = vmax.f32 %v1258_v43, %v1259_v22  ;;  %v1285_v20 = vrot.slane %v1284_v16, 2 }
 0x36b   :  { %v1273_v35 = vmax.f32 %v1271_v56, %v1272_v5  ;;  %v1298_v49 = vrot.slane %v1297_v30, 2  ;;  %v1324_v15 = vrot.slane %v1323_v23, 2  ;;  %v1336_v50 = vmax.f32 %v1334_v11, %v1335_v27 }
 0x36c   :  { %v1249_v62 = vmax.f32 %v1247_v38, %v1248_v57  ;;  %v1261_v44 = vrot.slane %v1260_v58, 1  ;;  %v1286_v59 = vmax.f32 %v1284_v16, %v1285_v20  ;;  %v1392_v0 = vsub.f32 0.0, %v6512_v34 }
 0x36d   :  { %v1274_v6 = vrot.slane %v1273_v35, 1  ;;  %v1299_v37 = vmax.f32 %v1297_v30, %v1298_v49  ;;  %v1325_v17 = vmax.f32 %v1323_v23, %v1324_v15  ;;  %v1337_v39 = vrot.slane %v1336_v50, 2 }
 0x36e   :  { %v1262_v26 = vmax.f32 %v1260_v58, %v1261_v44  ;;  %v1287_v28 = vrot.slane %v1286_v59, 1  ;;  %v1393_v46 = vsub.f32 0.0, %v6515_v42  ;;  %v1394_v33 = vsub.f32 0.0, %v6519_v19 }
 0x36f   :  { %v1275_v61 = vmax.f32 %v1273_v35, %v1274_v6  ;;  %v1300_v13 = vrot.slane %v1299_v37, 1  ;;  %v1326_v55 = vrot.slane %v1325_v17, 1  ;;  %v1338_v45 = vmax.f32 %v1336_v50, %v1337_v39  ;;  %v8433_v39 = vld [vmem:[#allocation20_spill] sm:$0xff] }
 0x370   :  { %v1288_v9 = vmax.f32 %v1286_v59, %v1287_v28  ;;  %v1395_v18 = vsub.f32 0.0, %v6523_v32  ;;  %v1396_v10 = vsub.f32 0.0, %v6531_v40  ;;  %v1397_v3 = vsub.f32 0.0, %v6562_v53 }
 0x371   :  { %v1301_v8 = vmax.f32 %v1299_v37, %v1300_v13  ;;  %v1327_v25 = vmax.f32 %v1325_v17, %v1326_v55  ;;  %v1339_v21 = vrot.slane %v1338_v45, 1  ;;  %v1398_v54 = vsub.f32 0.0, %v6510_v7 }
 0x372   :  { %v1399_v47 = vsub.f32 0.0, %v6525_v36  ;;  %v1400_v60 = vsub.f32 0.0, %v1249_v62  ;;  %v1401_v41 = vsub.f32 0.0, %v1262_v26  ;;  %v1402_v2 = vsub.f32 0.0, %v1275_v61 }
 0x373   :  { %v1340_v43 = vmax.f32 %v1338_v45, %v1339_v21  ;;  %v1403_v63 = vsub.f32 0.0, %v1288_v9  ;;  %v1404_v56 = vsub.f32 0.0, %v1301_v8  ;;  %v1405_v52 = vsub.f32 0.0, %v6506_v12  ;;  %v5714_v45 = vld [vmem:[%s8344_s22 + $0x8] sm:$0xff] }
 0x374   :  { %v1406_v29 = vsub.f32 0.0, %v1327_v25  ;;  %v1424_v24 = vsel %vm1367_vm4, %v1393_v46, %v1392_v0  ;;  %v1431_v11 = vsel %vm1367_vm4, %v1401_v41, %v1400_v60  ;;  %v1368_v14 = vsel %vm1367_vm4, %v6515_v42, %v6512_v34  ;;  %v5599_v60 = vld [vmem:[%s8154_s13 + $0x10] sm:$0xff]  }
 0x375   :  { %v1407_v38 = vsub.f32 0.0, %v1340_v43  ;;  %v1425_v22 = vsel %vm1369_vm5, %v1394_v33, %v1424_v24  ;;  %v1432_v16 = vsel %vm1369_vm5, %v1402_v2, %v1431_v11  ;;  %v1370_v5 = vsel %vm1369_vm5, %v6519_v19, %v1368_v14  ;;  %v8434_v33 = vld [vmem:[#allocation24_spill] sm:$0xff]  ;;  %v8437_v41 = vld [vmem:[#allocation6_spill] sm:$0xff] }
 0x376   :  { %v1426_v30 = vsel %vm1371_vm6, %v1395_v18, %v1425_v22  ;;  %v1433_v23 = vsel %vm1371_vm6, %v1403_v63, %v1432_v16  ;;  %v1372_v27 = vsel %vm1371_vm6, %v6523_v32, %v1370_v5  ;;  %v1381_v57 = vsel %vm1367_vm4, %v1262_v26, %v1249_v62  ;;  %v5596_v2 = vld [vmem:[%s8153_s12 + $0x8] sm:$0xff]   ;;  %v5598_v63 = vld [vmem:[%s8153_s12 + $0x10] sm:$0xff]   ;;  %v5602_v24 = vld [vmem:[%s8153_s12 + $0x20] sm:$0xff]  }
 0x377   :  { %v1427_v58 = vsel %vm1373_vm7, %v1396_v10, %v1426_v30  ;;  %v1434_v34 = vsel %vm1373_vm7, %v1404_v56, %v1433_v23  ;;  %v1374_v42 = vsel %vm1373_vm7, %v6531_v40, %v1372_v27  ;;  %v1382_v20 = vsel %vm1369_vm5, %v1275_v61, %v1381_v57  ;;  %v5603_v56 = vld [vmem:[%s8154_s13 + $0x20] sm:$0xff]   ;;  %v5604_v11 = vld [vmem:[%s8153_s12 + $0x28] sm:$0xff]  }
 0x378   :  { %v1428_v19 = vsel %vm8324_vm8, %v1397_v3, %v1427_v58  ;;  %v1435_v35 = vsel %vm8324_vm8, %v1405_v52, %v1434_v34  ;;  %v1376_v49 = vsel %vm8324_vm8, %v6562_v53, %v1374_v42  ;;  %v1383_v32 = vsel %vm1371_vm6, %v1288_v9, %v1382_v20  ;;  %v5592_v3 = vld [vmem:[%s8152_s11] sm:$0xff]   ;;  %v5600_v52 = vld [vmem:[%s8153_s12 + $0x18] sm:$0xff]   ;;  %v8438_v14 = vld [vmem:[#allocation10_spill] sm:$0xff] }
 0x379   :  { %v1429_v15 = vsel %vm1377_vm9, %v1398_v54, %v1428_v19  ;;  %v1436_v50 = vsel %vm1377_vm9, %v1406_v29, %v1435_v35  ;;  %v1378_v62 = vsel %vm1377_vm9, %v6510_v7, %v1376_v49  ;;  %v1384_v40 = vsel %vm1373_vm7, %v1301_v8, %v1383_v32  ;;  %v5595_v8 = vld [vmem:[%s8154_s13] sm:$0xff]   ;;  %5131 = vmatpush3.bf16.msra.mxu1 %v5592_v3  ;;  %v5597_v54 = vld [vmem:[%s8154_s13 + $0x8] sm:$0xff]   ;;  %v5606_v49 = vld [vmem:[%s8153_s12 + $0x30] sm:$0xff]  }
 0x37a   :  { %v1430_v44 = vsel %vm8302_vm10, %v1399_v47, %v1429_v15  ;;  %v1437_v59 = vsel %vm8302_vm10, %v1407_v38, %v1436_v50  ;;  %v6606_v0 = vsel %vm8302_vm10, %v6525_v36, %v1378_v62  ;;  %v1385_v53 = vsel %vm8324_vm8, %v6506_v12, %v1384_v40  ;;  %v5713_v12 = vld [vmem:[%s8344_s22] sm:$0xff]  ;;  %5159 = vmatpush3.bf16.msra.mxu0 %v5595_v8  ;;  %v5605_v29 = vld [vmem:[%s8154_s13 + $0x28] sm:$0xff]   ;;  %v5607_v32 = vld [vmem:[%s8154_s13 + $0x30] sm:$0xff]  }
 0x37b   :  { %v5499_v6 = vpack.i.bf16 %v1437_v59, %v1430_v44  ;;  %v1386_v37 = vsel %vm1377_vm9, %v1327_v25, %v1385_v53  ;;  %vm81_vm11 = vcmp.gt.f32.partialorder %v5713_v12, 0.0  ;;  %vm82_vm12 = vcmp.gt.f32.partialorder %v5714_v45, 0.0  ;;  %v5593_v25 = vld [vmem:[%s8152_s11 + $0x8] sm:$0xff]   ;;  %v5594_v47 = vld [vmem:[%s8153_s12] sm:$0xff]   ;;  %v5608_v59 = vld [vmem:[%s8153_s12 + $0x38] sm:$0xff]  }
 0x37c   :  { %v6612_v17 = vsel %vm8302_vm10, %v1340_v43, %v1386_v37  ;;  %v8435_v9 = vmov 0   ;;  %v8436_v21 = vmov 0.0   ;;  %v5601_v43 = vld [vmem:[%s8154_s13 + $0x18] sm:$0xff]   ;;  %v8439_v38 = vmax.f32 %v8438_v14, 1.0 }
 0x37d   :  { %v1341_v18 = vsel %vm81_vm11, 1, %v8435_v9  ;;  %v1342_v10 = vsel %vm82_vm12, 1, %v8435_v9  ;;  %5132 = vmatprep.subr.bf16.mxu1 %v8436_v21  ;;  %5160 = vmatprep.subr.bf16.mxu0 %v8436_v21  ;;  %v8440_v23 = vld [vmem:[#allocation12_spill] sm:$0xff]  ;;  %v8473_v9 = vld [vmem:[#allocation46_spill] sm:$0xff] }
 0x37e   :  { %5133 = vmatpush3.bf16.msra.mxu1 %v5593_v25  ;;  %5161 = vmatpush3.bf16.msra.mxu0 %v5597_v54  ;;  %v87_v22 = vadd.f32 1.0, %v8439_v38  ;;  %v8441_v27 = vmax.f32 %v8440_v23, 1.0  ;;  %v5609_v53 = vld [vmem:[%s8154_s13 + $0x38] sm:$0xff]  }
 0x37f   :  { %5138 = vmatprep.subr.bf16.mxu1 %v8436_v21  ;;  %5162 = vmatprep.subr.bf16.mxu0 %v8436_v21 }
 0x380   :  { %5691 = vlog2.f32 %v87_v22  ;;  %v88_v57 = vadd.f32 1.0, %v8441_v27 }
 0x381   :  { %5135 = vmatmul.mubr.msk.bf16.vlgmr.msra.gmra.mrb[12].mxu1 %vm434_vm0, %v8437_v41 }
 0x382   :  { %5139 = vmatpush3.bf16.msra.mxu1 %v5594_v47  ;;  %5154 = vmatprep.mubr.msk.bf16.mxu1 %vm5747_vm2, %v8436_v21  ;;  %5693 = vlog2.f32 %v88_v57 }
 0x383   :  { %5140 = vmatprep.subr.bf16.mxu1 %v8436_v21  ;;  %5163 = vmatpush3.bf16.msra.mxu0 %v5599_v60 }
 0x384   :  { %5164 = vmatprep.subr.bf16.mxu0 %v8436_v21 }
 0x386   :  { %5141 = vmatpush3.bf16.msra.mxu1 %v5596_v2 }
 0x387   :  { %5142 = vmatprep.subr.bf16.mxu1 %v8436_v21  ;;  %5165 = vmatpush3.bf16.msra.mxu0 %v5601_v43 }
 0x388   :  { %5166 = vmatprep.subr.bf16.mxu0 %v8436_v21 }
 0x38a   :  { %5143 = vmatpush3.bf16.msra.mxu1 %v5598_v63  ;;  %v5692_v35 = vpop.eup %5691 }
 0x38b   :  { %5144 = vmatprep.subr.bf16.mxu1 %v8436_v21  ;;  %5167 = vmatpush3.bf16.msra.mxu0 %v5603_v56  ;;  %v90_v15 = vmul.f32 0.6931472, %v5692_v35  ;;  %v5612_v35 = vld [vmem:[%s8155_s14 + $0x10] sm:$0xff]  }
 0x38c   :  { %5168 = vmatprep.subr.bf16.mxu0 %v8436_v21  ;;  %v5694_v50 = vpop.eup %5693 }
 0x38d   :  { %v995_v7 = vpop.f32.mrb[8].mxu1 }
 0x38e   :  { %v6615_v26 = vmul.f32 %v8433_v39, %v995_v7  ;;  %v5128_v28 = vpop.f32.mrb[9].mxu1  ;;  %5145 = vmatpush3.bf16.msra.mxu1 %v5600_v52  ;;  %v92_v7 = vmul.f32 0.6931472, %v5694_v50  ;;  %v5616_v50 = vld [vmem:[%s8155_s14 + $0x30] sm:$0xff]  }
 0x38f   :  { %v998_v46 = vpop.f32.mrb[10].mxu1  ;;  %5146 = vmatprep.subr.bf16.mxu1 %v8436_v21  ;;  %5169 = vmatpush3.bf16.msra.mxu0 %v5605_v29 }
 0x390   :  { %v6618_v61 = vmul.f32 %v8434_v33, %v998_v46  ;;  %v5129_v36 = vpop.f32.mrb[11].mxu1  ;;  %v1014_v13 = vmul.f32 %v6615_v26, %v6615_v26  ;;  %5170 = vmatprep.subr.bf16.mxu0 %v8436_v21 }
 0x392   :  { %1018 = vrot.lane.b32.xlu1 %v1014_v13, %s5748_s23  ;;  %v1015_v55 = vmul.f32 %v6618_v61, %v6618_v61  ;;  %5147 = vmatpush3.bf16.msra.mxu1 %v5602_v24 }
 0x393   :  { %5148 = vmatprep.subr.bf16.mxu1 %v8436_v21  ;;  %5171 = vmatpush3.bf16.msra.mxu0 %v5607_v32  ;;  %v5614_v32 = vld [vmem:[%s8155_s14 + $0x20] sm:$0xff]  }
 0x394   :  { %1020 = vrot.lane.b32.xlu0 %v1015_v55, %s5748_s23  ;;  %5172 = vmatprep.subr.bf16.mxu0 %v8436_v21 }
 0x396   :  { %1344 = vperm.xlu1 %5498, %v1341_v18   ;;  %5149 = vmatpush3.bf16.msra.mxu1 %v5604_v11 }
 0x397   :  { %5150 = vmatprep.subr.bf16.mxu1 %v8436_v21  ;;  %5173 = vmatpush3.bf16.msra.mxu0 %v5609_v53  ;;  %v5716_v53 = vld [vmem:[%s8338_s29] sm:$0xff] }
 0x398   :  { %1347 = vperm.xlu0 %5497, %v1342_v10  }
 0x39a   :  { %5500 = vrot.lane.b32.xlu1 %v5499_v6, %s5749_s28  ;;  %5151 = vmatpush3.bf16.msra.mxu1 %v5606_v49  ;;  %v5613_v49 = vld [vmem:[%s8155_s14 + $0x18] sm:$0xff]  }
 0x39b   :  { %5152 = vmatprep.subr.bf16.mxu1 %v8436_v21 }
 0x39e   :  { %5153 = vmatpush3.bf16.msra.mxu1 %v5608_v59 }
 0x39f   :  { %5178 = vmatprep.subr.bf16.mxu1 %v8436_v21 }
 0x404   :  { %v1019_v16 = vpop.permute.xlu1 %1018 }
 0x405   :  { %v1024_v5 = vsub.f32 %v6615_v26, %v1019_v16 }
 0x406   :  { %v1021_v30 = vpop.permute.xlu0 %1020 }
 0x407   :  { %v1026_v58 = vmax.f32 %v1024_v5, 0.0  ;;  %v1025_v34 = vsub.f32 %v6618_v61, %v1021_v30 }
 0x409   :  { %v1028_v42 = vadd.f32 1e-05, %v1026_v58  ;;  %v1027_v20 = vmax.f32 %v1025_v34, 0.0 }
 0x40b   :  { %5695 = vrsqrt.f32 %v1028_v42  ;;  %v1029_v19 = vadd.f32 1e-05, %v1027_v20  ;;  %vm1032_vm14 = vcmp.eq.f32.partialorder %v1028_v42, inf  ;;  %v1035_v8 = vand.u32 2147483648, %v1028_v42  ;;  %v5610_v20 = vld [vmem:[%s8155_s14] sm:$0xff]  }
 0x40c   :  { %vm1034_vm10 = vcmp.eq.f32.partialorder %v1028_v42, 0.0 }
 0x40d   :  { %5697 = vrsqrt.f32 %v1029_v19  ;;  %vm1039_vm11 = vcmp.eq.f32.partialorder %v1029_v19, inf  ;;  %vm1041_vm12 = vcmp.eq.f32.partialorder %v1029_v19, 0.0  ;;  %v1042_v55 = vand.u32 2147483648, %v1029_v19 }
 0x40e   :  { %5699 = vrcp.f32 %v90_v15 }
 0x40f   :  { %5701 = vrcp.f32 %v92_v7 }
 0x415   :  { %v5696_v62 = vpop.eup %5695  ;;  %v6709_v40 = vpop.permute.xlu1 %1344 }
 0x416   :  { %8442 = vst [vmem:[#allocation68_spill] sm:$0xff] %v6709_v40  ;;  %vm1349_vm13 = vcmp.eq.s32.totalorder %v6709_v40, 1  ;;  %v1031_v44 = vmul.f32 %v5696_v62, %v1028_v42  ;;  %v5617_v62 = vld [vmem:[%s8155_s14 + $0x38] sm:$0xff]  }
 0x417   :  { %v5698_v6 = vpop.eup %5697  ;;  %v6718_v37 = vpop.permute.xlu0 %1347  ;;  %v1390_v36 = vsel %vm1349_vm13, %v6606_v0, 0.0  ;;  %v8505_v40 = vld [vmem:[#allocation52_spill] sm:$0xff] }
 0x418   :  { %8443 = vst [vmem:[#allocation69_spill] sm:$0xff] %v6718_v37  ;;  %vm1350_vm15 = vcmp.eq.s32.totalorder %v6718_v37, 1  ;;  %v1038_v28 = vmul.f32 %v5698_v6, %v1029_v19  ;;  %v1033_v12 = vsel %vm1032_vm14, %v1028_v42, %v1031_v44  ;;  %v5700_v41 = vpop.eup %5699  ;;  %v8503_v37 = vld [vmem:[#allocation78_spill] sm:$0xff]  ;;  %vm8526_vm14 = vcmask 1047559  }
 0x419   :  { %v5501_v46 = vpop.permute.xlu1 %5500  ;;  %v1391_v13 = vsel %vm1350_vm15, %v6612_v17, 0.0  ;;  %v1036_v47 = vsel %vm1034_vm10, %v1035_v8, %v1033_v12  ;;  %v5702_v2 = vpop.eup %5701  ;;  %vm1474_vm10 = vcmask 785408  }
 0x41a   :  { %v5503_v45 = vunpack.i.h.bf16 %v5501_v46  ;;  %v5502_v18 = vunpack.i.l.bf16 %v5501_v46  ;;  %v5504_v10 = vpack.i.bf16 %v1391_v13, %v1390_v36  ;;  %v1040_v3 = vsel %vm1039_vm11, %v1029_v19, %v1038_v28  ;;  %v5717_v46 = vld [vmem:[%s8338_s29 + $0x8] sm:$0xff]  ;;  %vm8527_vm11 = vmmov %vm8526_vm14  ;;  %s4604_s29 = sshll.u32 %s5751_s27, 4  ;;  %s4605_s29 = int_to_ptr.vmem [resolvable:$true] %s4604_s29 }
 0x41b   :  { %v1043_v25 = vsel %vm1041_vm12, %v1042_v55, %v1040_v3  ;;  %vm8528_vm12 = vmmov %vm8527_vm11  ;;  %p5726_p1 = scmp.lt.s32.totalorder %s4605_s29, %s4605_s29 }
 0x41c   :  { %v1444_v54 = vsel %vm1349_vm13, %v5502_v18, 0.0  ;;  %v1445_v0 = vsel %vm1350_vm15, %v5503_v45, 0.0  ;;  %5505 = vrot.lane.b32.xlu0 %v5504_v10, %s5748_s23  ;;  %v5514_v60 = vpack.i.bf16 %v1043_v25, %v1036_v47 }
 0x41d   :  { %v5509_v17 = vpack.i.bf16 %v1445_v0, %v1444_v54 }
 0x41f   :  { %5510 = vrot.lane.b32.xlu1 %v5509_v17, %s5750_s4 }
 0x420   :  { %5515 = vrot.lane.b32.xlu0 %v5514_v60, %s5750_s4 }
 0x423   :  { %1754 = vperm.xlu1 %5498, %v90_v15   ;;  %v5615_v15 = vld [vmem:[%s8155_s14 + $0x28] sm:$0xff]  }
 0x424   :  { %1759 = vperm.xlu0 %5497, %v92_v7  }
 0x427   :  { %1873 = vperm.xlu1 %5498, %v5700_v41  }
 0x428   :  { %1878 = vperm.xlu0 %5497, %v5702_v2  }
 0x454   :  { %v1531_v43 = vpop.f32.mrb[12].mxu1 }
 0x455   :  { %v5136_v63 = vpop.f32.mrb[13].mxu1  ;;  %v1538_v6 = vadd.f32 %v5716_v53, %v1531_v43  ;;  %v4624_v53 = vld [vmem:[%s8151_s10 + $0x1] ss:$0 sm:$0xff] }
 0x456   :  { %v1534_v56 = vpop.f32.mrb[14].mxu1 }
 0x457   :  { %v5137_v52 = vpop.f32.mrb[15].mxu1  ;;  %v1539_v36 = vadd.f32 %v5717_v46, %v1534_v56 }
 0x48e   :  { %v5506_v29 = vpop.permute.xlu0 %5505 }
 0x48f   :  { %v5508_v24 = vunpack.i.h.bf16 %v5506_v29  ;;  %v5507_v11 = vunpack.i.l.bf16 %v5506_v29 }
 0x491   :  { %v5511_v14 = vpop.permute.xlu1 %5510  ;;  %v1471_v5 = vsel %vm434_vm0, %v6618_v61, %v5508_v24  ;;  %v1470_v30 = vsel %vm434_vm0, %v6615_v26, %v5507_v11  ;;  %v5611_v26 = vld [vmem:[%s8155_s14 + $0x8] sm:$0xff]   ;;  %v5715_v61 = vld [vmem:[%s8339_s1] sm:$0xff]  }
 0x492   :  { %v5513_v38 = vunpack.i.h.bf16 %v5511_v14  ;;  %v5512_v22 = vunpack.i.l.bf16 %v5511_v14  ;;  %v5516_v16 = vpop.permute.xlu0 %5515  ;;  %v4682_v24 = vld [vmem:[%s8156_s15] ss:$0 sm:$0xff] }
 0x493   :  { %v5518_v23 = vunpack.i.h.bf16 %v5516_v16  ;;  %v5517_v27 = vunpack.i.l.bf16 %v5516_v16  ;;  %v5718_v16 = vld [vmem:[%s8339_s1 + $0x8] sm:$0xff]  }
 0x494   :  { %v1472_v57 = vsel %vm1132_vm3, %v1470_v30, %v5512_v22  ;;  %v1473_v58 = vsel %vm1132_vm3, %v1471_v5, %v5513_v38  ;;  %v8450_v5 = vld [vmem:[#allocation7_spill] sm:$0xff]  ;;  %v8451_v30 = vld [vmem:[#allocation8_spill] sm:$0xff] }
 0x495   :  { %v1475_v34 = vsel %vm1474_vm10, %v1472_v57, %v5517_v27  ;;  %v1476_v42 = vsel %vm1474_vm10, %v1473_v58, %v5518_v23  ;;  %v5618_v23 = vld [vmem:[%s8149_s8 + $0x10] sm:$0xff]   ;;  %v5619_v27 = vld [vmem:[%s8149_s8 + $0x18] sm:$0xff]  }
 0x496   :  { %v1477_v19 = vpack.c.bf16 %v1476_v42, %v1475_v34  ;;  %v5620_v57 = vld [vmem:[%s8148_s7 + $0x10] sm:$0xff]  }
 0x498   :  { %5155 = vmatmul.mubr.bf16.vlgmr.msra.gmra.mrb[16].mxu1 %v1477_v19  ;;  %5175 = vmatmul.mubr.bf16.vlgmr.msra.gmra.mrb[12].mxu0 %v1477_v19 }
 0x499   :  { %5179 = vmatpush3.bf16.msra.mxu1 %v5610_v20  ;;  %5194 = vmatprep.mubr.msk.bf16.mxu1 %vm5747_vm2, %v8436_v21 }
 0x49a   :  { %5180 = vmatprep.subr.bf16.mxu1 %v8436_v21  ;;  %5200 = vmatprep.mubr.msk.bf16.mxu0 %vm649_vm1, %v5715_v61 }
 0x49d   :  { %5181 = vmatpush3.bf16.msra.mxu1 %v5611_v26 }
 0x49e   :  { %5182 = vmatprep.subr.bf16.mxu1 %v8436_v21 }
 0x4a1   :  { %5183 = vmatpush3.bf16.msra.mxu1 %v5612_v35 }
 0x4a2   :  { %5184 = vmatprep.subr.bf16.mxu1 %v8436_v21  ;;  %v6780_v44 = vpop.permute.xlu1 %1754 }
 0x4a3   :  { %8444 = vst [vmem:[#allocation73_spill] sm:$0xff] %v6780_v44  ;;  %v6782_v59 = vpop.permute.xlu0 %1759 }
 0x4a4   :  { %8445 = vst [vmem:[#allocation76_spill] sm:$0xff] %v6782_v59 }
 0x4a5   :  { %5185 = vmatpush3.bf16.msra.mxu1 %v5613_v49 }
 0x4a6   :  { %5186 = vmatprep.subr.bf16.mxu1 %v8436_v21  ;;  %v6792_v47 = vpop.permute.xlu1 %1873 }
 0x4a7   :  { %8446 = vst [vmem:[#allocation75_spill] sm:$0xff] %v6792_v47  ;;  %v6795_v43 = vpop.permute.xlu0 %1878 }
 0x4a8   :  { %8447 = vst [vmem:[#allocation77_spill] sm:$0xff] %v6795_v43 }
 0x4a9   :  { %5187 = vmatpush3.bf16.msra.mxu1 %v5614_v32 }
 0x4aa   :  { %5188 = vmatprep.subr.bf16.mxu1 %v8436_v21 }
 0x4ad   :  { %5189 = vmatpush3.bf16.msra.mxu1 %v5615_v15 }
 0x4ae   :  { %5190 = vmatprep.subr.bf16.mxu1 %v8436_v21 }
 0x4b1   :  { %5191 = vmatpush3.bf16.msra.mxu1 %v5616_v50 }
 0x4b2   :  { %5192 = vmatprep.subr.bf16.mxu1 %v8436_v21 }
 0x4b5   :  { %5193 = vmatpush3.bf16.msra.mxu1 %v5617_v62  ;;  %v5621_v62 = vld [vmem:[%s8148_s7 + $0x18] sm:$0xff]  }
 0x4b6   :  { %5210 = vmatprep.subr.bf16.mxu1 %v5618_v23 }
 0x4b8   :  { %5195 = vmatmul.mubr.bf16.vlgmr.msra.gmra.mrb[20].mxu1 %v1477_v19 }
 0x4b9   :  { %5211 = vmatpush3.bf16.msra.mxu1 %v5618_v23 }
 0x4ba   :  { %5212 = vmatprep.subr.bf16.mxu1 %v5619_v27 }
 0x4bd   :  { %5213 = vmatpush3.bf16.msra.mxu1 %v5619_v27 }
 0x4be   :  { %5218 = vmatprep.subr.bf16.mxu1 %v5620_v57 }
 0x56b   :  { %v1638_v7 = vpop.f32.mrb[16].mxu1  ;;  %v1745_v28 = vpop.f32.mrb[12].mxu0 }
 0x56c   :  { %v1645_v13 = vadd.f32 %v1638_v7, %v1538_v6  ;;  %v1762_v12 = vmul.f32 %v6780_v44, %v1745_v28  ;;  %v5156_v55 = vpop.f32.mrb[17].mxu1  ;;  %v5176_v45 = vpop.f32.mrb[13].mxu0 }
 0x56d   :  { %v1641_v18 = vpop.f32.mrb[18].mxu1  ;;  %v1748_v10 = vpop.f32.mrb[14].mxu0 }
 0x56e   :  { %v1764_v3 = vadd.f32 %v1762_v12, %v1645_v13  ;;  %v1646_v8 = vadd.f32 %v1641_v18, %v1539_v36  ;;  %v1763_v25 = vmul.f32 %v6782_v59, %v1748_v10  ;;  %v5157_v54 = vpop.f32.mrb[19].mxu1  ;;  %v5177_v0 = vpop.f32.mrb[15].mxu0  ;;  %v8497_v59 = vld [vmem:[#allocation30_spill] sm:$0xff] }
 0x570   :  { %v1765_v17 = vadd.f32 %v1763_v25, %v1646_v8 }
 0x58b   :  { %v1864_v60 = vpop.f32.mrb[20].mxu1 }
 0x58c   :  { %v1881_v41 = vmul.f32 %v6792_v47, %v1864_v60  ;;  %v5196_v2 = vpop.f32.mrb[21].mxu1 }
 0x58d   :  { %v1867_v63 = vpop.f32.mrb[22].mxu1 }
 0x58e   :  { %v1883_v56 = vadd.f32 %v1881_v41, %v1764_v3  ;;  %v1882_v52 = vmul.f32 %v6795_v43, %v1867_v63  ;;  %v5197_v29 = vpop.f32.mrb[23].mxu1  ;;  %v8495_v43 = vld [vmem:[#allocation40_spill] sm:$0xff] }
 0x590   :  { %v1884_v11 = vadd.f32 %v1882_v52, %v1765_v17  ;;  %v6801_v14 = vadd.f32 %v4682_v24, %v1883_v56 }
 0x592   :  { %8448 = vst [vmem:[#allocation83_spill] sm:$0xff] %v6801_v14  ;;  %v6803_v38 = vadd.f32 %v4682_v24, %v1884_v11 }
 0x594   :  { %8449 = vst [vmem:[#allocation82_spill] sm:$0xff] %v6803_v38  ;;  %v6807_v22 = vpack.c.bf16 %v6803_v38, %v6801_v14  ;;  %v8499_v14 = vld [vmem:[#allocation45_spill] sm:$0xff] }
 0x596   :  { %5198 = vmatprep.subr.bf16.mxu0 %v6807_v22 }
 0x597   :  { %5199 = vmatpush3.bf16.msra.mxu0 %v6807_v22 }
 0x598   :  { %5204 = vmatprep.subr.bf16.mxu0 %v6807_v22 }
 0x59a   :  { %5201 = vmatmul.mubr.msk.bf16.vlgmr.msra.gmra.mrb[16].mxu0 %vm649_vm1, %v5718_v16 }
 0x59b   :  { %5205 = vmatpush3.bf16.msra.mxu0 %v6807_v22  ;;  %5206 = vmatprep.mubr.msk.bf16.mxu0 %vm649_vm1, %v8450_v5  ;;  %v8494_v5 = vld [vmem:[#allocation23_spill] sm:$0xff] }
 0x59c   :  { %5226 = vmatprep.subr.bf16.mxu0 %v8436_v21 }
 0x5a2   :  { %5207 = vmatmul.mubr.msk.bf16.vlgmr.msra.gmra.mrb[20].mxu0 %vm649_vm1, %v8451_v30 }
 0x5a3   :  { %5230 = vmatprep.mubr.msk.bf16.mxu0 %vm5747_vm2, %v8436_v21 }
 0x66d   :  { %v5202_v58 = vpop.f32.mrb[16].mxu0 }
 0x66e   :  { %v1929_v34 = vpop.f32.mrb[17].mxu0 }
 0x66f   :  { %v5203_v42 = vpop.f32.mrb[18].mxu0 }
 0x670   :  { %v1994_v20 = vpack.c.bf16 %v5203_v42, %v5202_v58  ;;  %v1932_v19 = vpop.f32.mrb[19].mxu0  ;;  %v5622_v58 = vld [vmem:[%s8152_s11 + $0x10] sm:$0xff]   ;;  %v5623_v42 = vld [vmem:[%s8152_s11 + $0x18] sm:$0xff]  }
 0x671   :  { %v1993_v26 = vpack.c.bf16 %v1932_v19, %v1929_v34  ;;  %v8452_v34 = vld [vmem:[#allocation5_spill] sm:$0xff] }
 0x675   :  { %v5208_v61 = vpop.f32.mrb[20].mxu0 }
 0x676   :  { %v1978_v35 = vpop.f32.mrb[21].mxu0 }
 0x677   :  { %v5209_v49 = vpop.f32.mrb[22].mxu0 }
 0x678   :  { %v2001_v32 = vpack.c.bf16 %v5209_v49, %v5208_v61  ;;  %v1981_v15 = vpop.f32.mrb[23].mxu0 }
 0x679   :  { %v2000_v50 = vpack.c.bf16 %v1981_v15, %v1978_v35 }
 0x67b   :  { %5214 = vmatprep.mubr.msk.bf16.mxu1 %vm434_vm0, %v2000_v50  ;;  %v8454_v50 = vld [vmem:[#allocation17_spill] sm:$0xff] }
 0x67c   :  { %5215 = vmatmul.mubr.msk.bf16.vlgmr.msra.gmra.mrb[0].mxu1 %vm434_vm0, %v2001_v32  ;;  %v8453_v32 = vld [vmem:[#allocation15_spill] sm:$0xff] }
 0x67d   :  { %5222 = vmatprep.mubr.msk.bf16.mxu1 %vm434_vm0, %v1993_v26  ;;  %5219 = vmatpush3.bf16.msra.mxu1 %v5620_v57 }
 0x67e   :  { %5220 = vmatprep.subr.bf16.mxu1 %v5621_v62 }
 0x681   :  { %5221 = vmatpush3.bf16.msra.mxu1 %v5621_v62 }
 0x682   :  { %5262 = vmatprep.subr.bf16.mxu1 %v8436_v21 }
 0x688   :  { %5223 = vmatmul.mubr.msk.bf16.vlgmr.msra.gmra.mrb[0].mxu1 %vm434_vm0, %v1994_v20 }
 0x689   :  { %5278 = vmatprep.mubr.msk.bf16.mxu1 %vm5747_vm2, %v8436_v21 }
 0x75b   :  { %v5224_v6 = vpop.f32.mrb[0].mxu1 }
 0x75c   :  { %v5448_v7 = vadd.f32 %v5224_v6, %v4624_v53  ;;  %v2126_v28 = vpop.f32.mrb[1].mxu1 }
 0x75d   :  { %v5449_v46 = vadd.f32 %v4624_v53, %v2126_v28  ;;  %v5225_v36 = vpop.f32.mrb[2].mxu1  ;;  %v8456_v28 = vld [vmem:[#allocation14_spill] sm:$0xff] }
 0x75e   :  { %v5450_v13 = vadd.f32 %v5225_v36, %v4624_v53  ;;  %v2129_v12 = vpop.f32.mrb[3].mxu1  ;;  %v2147_v45 = vmul.f32 %v5448_v7, %v5448_v7  ;;  %v2246_v60 = vsub.f32 0.0, %v5448_v7 }
 0x75f   :  { %v5451_v55 = vadd.f32 %v4624_v53, %v2129_v12  ;;  %v2145_v10 = vmul.f32 %v5449_v46, %v5449_v46  ;;  %v2244_v0 = vsub.f32 0.0, %v5449_v46  ;;  %v8455_v53 = vld [vmem:[#allocation13_spill] sm:$0xff] }
 0x760   :  { %v2148_v18 = vmul.f32 %v5450_v13, %v5450_v13  ;;  %v2247_v17 = vsub.f32 0.0, %v5450_v13  ;;  %v8457_v12 = vld [vmem:[#allocation21_spill] sm:$0xff] }
 0x761   :  { %v2146_v3 = vmul.f32 %v5451_v55, %v5451_v55  ;;  %v2245_v54 = vsub.f32 0.0, %v5451_v55 }
 0x762   :  { %v5524_v8 = vpack.i.bf16 %v2148_v18, %v2147_v45  ;;  %v8458_v45 = vld [vmem:[#allocation26_spill] sm:$0xff] }
 0x763   :  { %v5519_v25 = vpack.i.bf16 %v2146_v3, %v2145_v10  ;;  %v8459_v10 = vld [vmem:[#allocation27_spill] sm:$0xff] }
 0x764   :  { %5525 = vrot.lane.b32.xlu0 %v5524_v8, %s5748_s23 }
 0x765   :  { %5520 = vrot.lane.b32.xlu1 %v5519_v25, %s5748_s23  ;;  %v8461_v25 = vld [vmem:[#allocation38_spill] sm:$0xff] }
 0x768   :  { %2254 = vrot.lane.b32.xlu0 %v2245_v54, %s5748_s23 }
 0x769   :  { %2252 = vrot.lane.b32.xlu1 %v2244_v0, %s5748_s23  ;;  %v8462_v0 = vld [vmem:[#allocation34_spill] sm:$0xff] }
 0x76c   :  { %2258 = vrot.lane.b32.xlu0 %v2247_v17, %s5748_s23 }
 0x76d   :  { %2256 = vrot.lane.b32.xlu1 %v2246_v60, %s5748_s23 }
 0x7d6   :  { %v5526_v41 = vpop.permute.xlu0 %5525 }
 0x7d7   :  { %v5521_v2 = vpop.permute.xlu1 %5520  ;;  %v5528_v63 = vunpack.i.h.bf16 %v5526_v41  ;;  %v5527_v56 = vunpack.i.l.bf16 %v5526_v41  ;;  %v8464_v41 = vld [vmem:[#allocation48_spill] sm:$0xff] }
 0x7d8   :  { %v5523_v52 = vunpack.i.h.bf16 %v5521_v2  ;;  %v5522_v29 = vunpack.i.l.bf16 %v5521_v2 }
 0x7d9   :  { %v2168_v23 = vsel %vm434_vm0, %v5450_v13, %v5528_v63  ;;  %v2167_v27 = vsel %vm434_vm0, %v5448_v7, %v5527_v56  ;;  %v8465_v63 = vld [vmem:[#allocation44_spill] sm:$0xff] }
 0x7da   :  { %v2166_v24 = vsel %vm434_vm0, %v5451_v55, %v5523_v52  ;;  %v2165_v11 = vsel %vm434_vm0, %v5449_v46, %v5522_v29  ;;  %v2170_v57 = vpack.c.bf16 %v2168_v23, %v2167_v27  ;;  %v2255_v20 = vpop.permute.xlu0 %2254  ;;  %v8466_v52 = vld [vmem:[#allocation39_spill] sm:$0xff]  ;;  %v8469_v27 = vld [vmem:[#allocation25_spill] sm:$0xff] }
 0x7db   :  { %v2169_v16 = vpack.c.bf16 %v2166_v24, %v2165_v11  ;;  %v2253_v19 = vpop.permute.xlu1 %2252  ;;  %v6875_v26 = vsel %vm434_vm0, %v5451_v55, %v2255_v20  ;;  %v8467_v24 = vld [vmem:[#allocation56_spill] sm:$0xff] }
 0x7dc   :  { %v6878_v61 = vsel %vm434_vm0, %v5449_v46, %v2253_v19  ;;  %v2269_v15 = vadd.f32 %v6875_v26, %v8453_v32  ;;  %v2273_v62 = vadd.f32 %v6875_v26, %v8454_v50  ;;  %v2277_v46 = vadd.f32 %v6875_v26, %v8457_v12  ;;  %v8471_v20 = vld [vmem:[#allocation32_spill] sm:$0xff] }
 0x7dd   :  { %5227 = vmatpush3.bf16.msra.mxu0 %v2169_v16  ;;  %v2268_v6 = vadd.f32 %v6878_v61, %v8455_v53  ;;  %v2272_v36 = vadd.f32 %v6878_v61, %v8456_v28  ;;  %v2276_v18 = vadd.f32 %v6878_v61, %v8458_v45  ;;  %v6900_v3 = vadd.f32 %v6878_v61, %v8459_v10  ;;  %v8468_v16 = vld [vmem:[#allocation51_spill] sm:$0xff]  ;;  %v8487_v45 = vld [vmem:[#allocation16_spill] sm:$0xff] }
 0x7de   :  { %5228 = vmatprep.subr.bf16.mxu0 %v8436_v21  ;;  %v2259_v35 = vpop.permute.xlu0 %2258  ;;  %v6908_v54 = vadd.f32 %v6878_v61, %v8461_v25  ;;  %v6912_v17 = vadd.f32 %v6875_v26, %v8462_v0  ;;  %v6920_v2 = vadd.f32 %v6875_v26, %v8464_v41  ;;  %v6930_v11 = vadd.f32 %v6878_v61, %v8467_v24  ;;  %v8479_v0 = vld [vmem:[#allocation65_spill] sm:$0xff]  ;;  %v8481_v25 = vld [vmem:[#allocation64_spill] sm:$0xff]  ;;  %v8484_v10 = vld [vmem:[#allocation71_spill] sm:$0xff] }
 0x7df   :  { %v2257_v49 = vpop.permute.xlu1 %2256  ;;  %v6934_v23 = vadd.f32 %v6875_v26, %v8468_v16  ;;  %v2301_v12 = vadd.f32 %v6875_v26, %v6088_v1  ;;  %v2333_v28 = vsel %vm1132_vm3, %v2269_v15, -inf  ;;  %v7039_v44 = vadd.f32 %v6878_v61, %v8497_v59 }
 0x7e0   :  { %v6894_v55 = vsel %vm434_vm0, %v5448_v7, %v2257_v49  ;;  %v8463_v7 = vld [vmem:[#allocation41_spill] sm:$0xff]  ;;  %v2346_v38 = vsel %vm1132_vm3, %v2273_v62, -inf  ;;  %v7074_v33 = vadd.f32 %v6878_v61, %v8505_v40 }
 0x7e1   :  { %5229 = vmatpush3.bf16.msra.mxu0 %v2170_v57  ;;  %v6916_v60 = vadd.f32 %v6878_v61, %v8463_v7  ;;  %v2270_v57 = vadd.f32 %v6894_v55, %v8469_v27  ;;  %v2278_v19 = vadd.f32 %v6894_v55, %v8471_v20  ;;  %v6948_v24 = vadd.f32 %v6894_v55, %v8473_v9  ;;  %v8477_v20 = vld [vmem:[#allocation57_spill] sm:$0xff]  ;;  %v8478_v7 = vld [vmem:[#allocation80_spill] sm:$0xff] }
 0x7e2   :  { %5234 = vmatprep.subr.bf16.mxu0 %v8436_v21 }
 0x7e4   :  { %5231 = vmatmul.mubr.msk.bf16.vlgmr.msra.gmra.mrb[24].mxu0 %vm434_vm0, %v8452_v34  ;;  %v8491_v34 = vld [vmem:[#allocation35_spill] sm:$0xff] }
 0x7e5   :  { %5235 = vmatpush3.bf16.msra.mxu0 %v5622_v58  ;;  %5238 = vmatprep.mubr.msk.bf16.mxu0 %vm5747_vm2, %v8436_v21  ;;  %v8470_v58 = vld [vmem:[#allocation31_spill] sm:$0xff]  ;;  %v7014_v1 = vadd.f32 %v6894_v55, %v8491_v34  ;;  %v8496_v34 = vld [vmem:[#allocation58_spill] sm:$0xff] }
 0x7e6   :  { %5236 = vmatprep.subr.bf16.mxu0 %v8436_v21 }
 0x7e9   :  { %5237 = vmatpush3.bf16.msra.mxu0 %v5623_v42  ;;  %v2274_v42 = vadd.f32 %v6894_v55, %v8470_v58  ;;  %v8476_v58 = vld [vmem:[#allocation72_spill] sm:$0xff] }
 0x7ea   :  { %5242 = vmatprep.subr.bf16.mxu0 %v8436_v21 }
 0x7ec   :  { %5239 = vmatmul.mubr.msk.bf16.vlgmr.msra.gmra.mrb[28].mxu0 %vm434_vm0, %v6807_v22  ;;  %v6885_v22 = vsel %vm434_vm0, %v5450_v13, %v2259_v35  ;;  %v8460_v13 = vld [vmem:[#allocation33_spill] sm:$0xff]  ;;  %v8472_v35 = vld [vmem:[#allocation54_spill] sm:$0xff] }
 0x7ed   :  { %5258 = vmatprep.mubr.msk.bf16.mxu0 %vm5747_vm2, %v8436_v21  ;;  %v6904_v8 = vadd.f32 %v6875_v26, %v8460_v13  ;;  %v2271_v56 = vadd.f32 %v6885_v22, %v8465_v63  ;;  %v6926_v29 = vadd.f32 %v6885_v22, %v8466_v52  ;;  %v6944_v49 = vadd.f32 %v6885_v22, %v8472_v35  ;;  %v8474_v52 = vld [vmem:[#allocation62_spill] sm:$0xff]  ;;  %v8475_v63 = vld [vmem:[#allocation49_spill] sm:$0xff]  ;;  %v8482_v13 = vld [vmem:[#allocation59_spill] sm:$0xff] }
 0x7ee   :  { %v6952_v16 = vadd.f32 %v6885_v22, %v8474_v52  ;;  %v6956_v27 = vadd.f32 %v6894_v55, %v8475_v63  ;;  %v6960_v41 = vadd.f32 %v6885_v22, %v8476_v58  ;;  %v6964_v35 = vadd.f32 %v6894_v55, %v8477_v20  ;;  %v8500_v21 = vld [vmem:[#allocation66_spill] sm:$0xff] }
 0x7ef   :  { %v6968_v9 = vadd.f32 %v6885_v22, %v8478_v7  ;;  %v6972_v52 = vadd.f32 %v6894_v55, %v8479_v0  ;;  %v6976_v63 = vadd.f32 %v6885_v22, %v6467_v51  ;;  %v6980_v58 = vadd.f32 %v6878_v61, %v8481_v25 }
 0x7f0   :  { %v6984_v20 = vadd.f32 %v6875_v26, %v8482_v13  ;;  %v6988_v7 = vadd.f32 %v6894_v55, %v8484_v10  ;;  %v6992_v0 = vadd.f32 %v6885_v22, %v6490_v48  ;;  %v2300_v51 = vadd.f32 %v6878_v61, %v8487_v45  ;;  %v8488_v13 = vld [vmem:[#allocation29_spill] sm:$0xff]  ;;  %v8489_v10 = vld [vmem:[#allocation43_spill] sm:$0xff]  ;;  %v8490_v48 = vld [vmem:[#allocation18_spill] sm:$0xff] }
 0x7f1   :  { %8480 = vst [vmem:[#allocation84_spill] sm:$0xff] %v6976_v63  ;;  %v2332_v25 = vsel %vm1132_vm3, %v2268_v6, -inf  ;;  %v7002_v53 = vadd.f32 %v6894_v55, %v8488_v13  ;;  %v7006_v50 = vadd.f32 %v6885_v22, %v8489_v10  ;;  %v2304_v32 = vadd.f32 %v6878_v61, %v8490_v48  ;;  %v8492_v6 = vld [vmem:[#allocation50_spill] sm:$0xff]  ;;  %v8493_v13 = vld [vmem:[#allocation28_spill] sm:$0xff] }
 0x7f2   :  { %8483 = vst [vmem:[#allocation6_spill] sm:$0xff] %v6984_v20  ;;  %8485 = vst [vmem:[#allocation10_spill] sm:$0xff] %v6988_v7  ;;  %v2305_v45 = vadd.f32 %v6875_v26, %v6094_v4  ;;  %v7018_v15 = vadd.f32 %v6885_v22, %v8492_v6  ;;  %v7022_v30 = vadd.f32 %v6878_v61, %v8493_v13  ;;  %v2335_v10 = vsel %vm1132_vm3, %v2270_v57, -inf  ;;  %v8498_v13 = vld [vmem:[#allocation37_spill] sm:$0xff]  ;;  %v8510_v63 = vld [vmem:[#allocation60_spill] sm:$0xff] }
 0x7f3   :  { %8486 = vst [vmem:[#allocation12_spill] sm:$0xff] %v6992_v0  ;;  %v7027_v48 = vadd.f32 %v6875_v26, %v8494_v5  ;;  %v7031_v4 = vadd.f32 %v6894_v55, %v8495_v43  ;;  %v7035_v47 = vadd.f32 %v6885_v22, %v8496_v34  ;;  %v2334_v6 = vmax.f32 %v2332_v25, %v2333_v28  ;;  %v8501_v28 = vld [vmem:[#allocation36_spill] sm:$0xff]  ;;  %v8514_v20 = vld [vmem:[#allocation70_spill] sm:$0xff] }
 0x7f4   :  { %v7043_v57 = vadd.f32 %v6875_v26, %v8498_v13  ;;  %v2345_v5 = vsel %vm1132_vm3, %v2272_v36, -inf  ;;  %v7049_v43 = vadd.f32 %v6894_v55, %v8499_v14  ;;  %v7053_v34 = vadd.f32 %v6885_v22, %v8500_v21  ;;  %v8502_v36 = vld [vmem:[#allocation53_spill] sm:$0xff] }
 0x7f5   :  { %v7057_v25 = vadd.f32 %v6878_v61, %v8501_v28  ;;  %v2336_v59 = vmax.f32 %v2334_v6, %v2335_v10  ;;  %v7061_v13 = vadd.f32 %v6875_v26, %v6134_v31  ;;  %v7065_v62 = vadd.f32 %v6894_v55, %v8502_v36  ;;  %v8506_v31 = vld [vmem:[#allocation47_spill] sm:$0xff]  ;;  %v8507_v36 = vld [vmem:[#allocation61_spill] sm:$0xff] }
 0x7f6   :  { %v7069_v14 = vadd.f32 %v6885_v22, %v8503_v37  ;;  %v2348_v21 = vsel %vm1132_vm3, %v2274_v42, -inf  ;;  %v2347_v28 = vmax.f32 %v2345_v5, %v2346_v38  ;;  %v2358_v10 = vsel %vm1132_vm3, %v2276_v18, -inf  ;;  %v8508_v37 = vld [vmem:[#allocation85_spill] sm:$0xff] }
 0x7f7   :  { %v2359_v6 = vsel %vm1132_vm3, %v2277_v46, -inf  ;;  %v7080_v39 = vadd.f32 %v6875_v26, %v8506_v31  ;;  %v7084_v0 = vadd.f32 %v6894_v55, %v8507_v36  ;;  %v7088_v42 = vadd.f32 %v6885_v22, %v8508_v37  ;;  %v8511_v31 = vld [vmem:[#allocation55_spill] sm:$0xff] }
 0x7f8   :  { %8504 = vst [vmem:[#allocation88_spill] sm:$0xff] %v7069_v14  ;;  %v2337_v40 = vsel %vm1132_vm3, %v2271_v56, -inf  ;;  %v7093_v38 = vadd.f32 %v6878_v61, %v8510_v63  ;;  %v2349_v46 = vmax.f32 %v2347_v28, %v2348_v21  ;;  %v2361_v18 = vsel %vm1132_vm3, %v2278_v19, -inf  ;;  %v8512_v36 = vld [vmem:[#allocation67_spill] sm:$0xff]  ;;  %v8516_v28 = vld [vmem:[#allocation74_spill] sm:$0xff] }
 0x7f9   :  { %8509 = vst [vmem:[#allocation89_spill] sm:$0xff] %v7088_v42  ;;  %v2338_v5 = vmax.f32 %v2336_v59, %v2337_v40  ;;  %v7098_v14 = vadd.f32 %v6875_v26, %v8511_v31  ;;  %v7102_v7 = vadd.f32 %v6894_v55, %v8512_v36  ;;  %v8513_v37 = vld [vmem:[#allocation79_spill] sm:$0xff]  ;;  %v2360_v56 = vmax.f32 %v2358_v10, %v2359_v6 }
 0x7fa   :  { %v7106_v42 = vadd.f32 %v6885_v22, %v8513_v37  ;;  %v7110_v63 = vadd.f32 %v6878_v61, %v8514_v20  ;;  %v8515_v21 = vld [vmem:[#allocation63_spill] sm:$0xff]  ;;  %v2371_v59 = vsel %vm1132_vm3, %v6900_v3, -inf  ;;  %v2372_v19 = vsel %vm1132_vm3, %v6904_v8, -inf  ;;  %v8517_v37 = vld [vmem:[#allocation81_spill] sm:$0xff] }
 0x7fb   :  { %v7114_v40 = vadd.f32 %v6875_v26, %v8515_v21  ;;  %v7122_v36 = vadd.f32 %v6894_v55, %v8516_v28  ;;  %v7126_v10 = vadd.f32 %v6885_v22, %v8517_v37  ;;  %v2350_v61 = vsel %vm1132_vm3, %v6926_v29, -inf }
 0x7fc   :  { %v2362_v6 = vmax.f32 %v2360_v56, %v2361_v18  ;;  %v2339_v26 = vrot.slane %v2338_v5, 4  ;;  %v2351_v21 = vmax.f32 %v2349_v46, %v2350_v61  ;;  %v2363_v3 = vsel %vm1132_vm3, %v6944_v49, -inf }
 0x7fd   :  { %v2374_v8 = vsel %vm1132_vm3, %v6948_v24, -inf  ;;  %v2373_v20 = vmax.f32 %v2371_v59, %v2372_v19  ;;  %v2376_v55 = vsel %vm1132_vm3, %v6952_v16, -inf  ;;  %v2384_v22 = vsel %vm1132_vm3, %v6908_v54, -inf }
 0x7fe   :  { %v2385_v37 = vsel %vm1132_vm3, %v6912_v17, -inf  ;;  %v2387_v29 = vsel %vm1132_vm3, %v6956_v27, -inf  ;;  %v2389_v46 = vsel %vm1132_vm3, %v6960_v41, -inf  ;;  %v2436_v49 = vsel %vm1132_vm3, %v2300_v51, -inf }
 0x7ff   :  { %v2437_v24 = vsel %vm1132_vm3, %v2301_v12, -inf  ;;  %v2364_v18 = vmax.f32 %v2362_v6, %v2363_v3  ;;  %v2375_v56 = vmax.f32 %v2373_v20, %v2374_v8  ;;  %v2449_v16 = vsel %vm1132_vm3, %v2304_v32, -inf }
 0x800   :  { %v2450_v59 = vsel %vm1132_vm3, %v2305_v45, -inf  ;;  %v2340_v54 = vmax.f32 %v2338_v5, %v2339_v26  ;;  %v2352_v19 = vrot.slane %v2351_v21, 4  ;;  %v2386_v61 = vmax.f32 %v2384_v22, %v2385_v37 }
 0x801   :  { %v2439_v17 = vsel %vm1132_vm3, %v7002_v53, -inf  ;;  %v2438_v27 = vmax.f32 %v2436_v49, %v2437_v24  ;;  %v2452_v41 = vsel %vm1132_vm3, %v7014_v1, -inf  ;;  %v2462_v51 = vsel %vm1132_vm3, %v7022_v30, -inf }
 0x802   :  { %v2463_v12 = vsel %vm1132_vm3, %v7027_v48, -inf  ;;  %v2397_v32 = vsel %vm1132_vm3, %v6916_v60, -inf  ;;  %v2398_v45 = vsel %vm1132_vm3, %v6920_v2, -inf  ;;  %v2400_v37 = vsel %vm1132_vm3, %v6964_v35, -inf }
 0x803   :  { %v2451_v53 = vmax.f32 %v2449_v16, %v2450_v59  ;;  %v2365_v20 = vrot.slane %v2364_v18, 4  ;;  %v2377_v5 = vmax.f32 %v2375_v56, %v2376_v55  ;;  %v2440_v6 = vmax.f32 %v2438_v27, %v2439_v17 }
 0x804   :  { %v2465_v1 = vsel %vm1132_vm3, %v7031_v4, -inf  ;;  %v2353_v30 = vmax.f32 %v2351_v21, %v2352_v19  ;;  %v2388_v26 = vmax.f32 %v2386_v61, %v2387_v29  ;;  %v2464_v48 = vmax.f32 %v2462_v51, %v2463_v12 }
 0x805   :  { %v2453_v3 = vmax.f32 %v2451_v53, %v2452_v41  ;;  %v2341_v8 = vrot.slane %v2340_v54, 2  ;;  %v2399_v22 = vmax.f32 %v2397_v32, %v2398_v45  ;;  %v2402_v60 = vsel %vm1132_vm3, %v6968_v9, -inf }
 0x806   :  { %v2410_v2 = vsel %vm1132_vm3, %v6930_v11, -inf  ;;  %v2441_v35 = vsel %vm1132_vm3, %v7006_v50, -inf  ;;  %v2466_v55 = vmax.f32 %v2464_v48, %v2465_v1  ;;  %v2475_v49 = vsel %vm1132_vm3, %v7039_v44, -inf  ;;  %v8519_v48 = vld [vmem:[#allocation10_spill] sm:$0xff] }
 0x807   :  { %v2476_v4 = vsel %vm1132_vm3, %v7043_v57, -inf  ;;  %v7174_v21 = vmax.f32 %v2364_v18, %v2365_v20  ;;  %v2378_v29 = vrot.slane %v2377_v5, 4  ;;  %v2442_v24 = vmax.f32 %v2440_v6, %v2441_v35 }
 0x808   :  { %v2454_v9 = vsel %vm1132_vm3, %v7018_v15, -inf  ;;  %v2354_v56 = vrot.slane %v2353_v30, 2  ;;  %v7178_v16 = vmax.f32 %v2388_v26, %v2389_v46  ;;  %v2478_v50 = vsel %vm1132_vm3, %v7049_v43, -inf }
 0x809   :  { %v2455_v11 = vmax.f32 %v2453_v3, %v2454_v9  ;;  %v2467_v44 = vsel %vm1132_vm3, %v7035_v47, -inf  ;;  %v2477_v59 = vmax.f32 %v2475_v49, %v2476_v4  ;;  %v2488_v57 = vsel %vm1132_vm3, %v7057_v25, -inf  ;;  %v8518_v3 = vld [vmem:[#allocation6_spill] sm:$0xff]  ;;  %v8521_v4 = vld [vmem:[#allocation84_spill] sm:$0xff] }
 0x80a   :  { %v2489_v18 = vsel %vm1132_vm3, %v7061_v13, -inf  ;;  %v2401_v19 = vmax.f32 %v2399_v22, %v2400_v37  ;;  %v2411_v15 = vsel %vm1132_vm3, %v6934_v23, -inf  ;;  %v2413_v46 = vsel %vm1132_vm3, %v6972_v52, -inf  ;;  %v8520_v22 = vld [vmem:[#allocation88_spill] sm:$0xff] }
 0x80b   :  { %v2468_v61 = vmax.f32 %v2466_v55, %v2467_v44  ;;  %v7192_v17 = vmax.f32 %v2340_v54, %v2341_v8  ;;  %v2443_v43 = vrot.slane %v2442_v24, 4  ;;  %v2479_v27 = vmax.f32 %v2477_v59, %v2478_v50  ;;  %v8522_v50 = vld [vmem:[#allocation89_spill] sm:$0xff] }
 0x80c   :  { %v2491_v47 = vsel %vm1132_vm3, %v7065_v62, -inf  ;;  %v2367_v25 = vrot.slane %v7174_v21, 2  ;;  %v7197_v41 = vmax.f32 %v2377_v5, %v2378_v29  ;;  %v2456_v13 = vrot.slane %v2455_v11, 4 }
 0x80d   :  { %v2490_v51 = vmax.f32 %v2488_v57, %v2489_v18  ;;  %v7199_v12 = vmax.f32 %v2353_v30, %v2354_v56  ;;  %v2391_v23 = vrot.slane %v7178_v16, 4  ;;  %v2501_v52 = vsel %vm1132_vm3, %v7074_v33, -inf }
 0x80e   :  { %v2502_v54 = vsel %vm1132_vm3, %v7080_v39, -inf  ;;  %v7206_v32 = vmax.f32 %v2401_v19, %v2402_v60  ;;  %v2469_v45 = vrot.slane %v2468_v61, 4  ;;  %v2480_v62 = vsel %vm1132_vm3, %v7053_v34, -inf }
 0x80f   :  { %v2492_v37 = vmax.f32 %v2490_v51, %v2491_v47  ;;  %v2412_v53 = vmax.f32 %v2410_v2, %v2411_v15  ;;  %v2444_v20 = vmax.f32 %v2442_v24, %v2443_v43  ;;  %v2481_v5 = vmax.f32 %v2479_v27, %v2480_v62 }
 0x810   :  { %v2504_v6 = vsel %vm1132_vm3, %v7084_v0, -inf  ;;  %v2457_v1 = vmax.f32 %v2455_v11, %v2456_v13  ;;  %v2503_v30 = vmax.f32 %v2501_v52, %v2502_v54  ;;  %v2514_v33 = vsel %vm1132_vm3, %v7093_v38, -inf }
 0x811   :  { %v2515_v39 = vsel %vm1132_vm3, %v7098_v14, -inf  ;;  %v2423_v26 = vsel %vm1132_vm3, %v6980_v58, -inf  ;;  %v2424_v34 = vsel %vm1132_vm3, %v8518_v3, -inf  ;;  %v2426_v8 = vsel %vm1132_vm3, %v8519_v48, -inf }
 0x812   :  { %v2493_v0 = vsel %vm1132_vm3, %v8520_v22, -inf  ;;  %v2470_v60 = vmax.f32 %v2468_v61, %v2469_v45  ;;  %v2505_v35 = vmax.f32 %v2503_v30, %v2504_v6  ;;  %v2517_v38 = vsel %vm1132_vm3, %v7102_v7, -inf }
 0x813   :  { %v2494_v2 = vmax.f32 %v2492_v37, %v2493_v0  ;;  %v2482_v55 = vrot.slane %v2481_v5, 4  ;;  %v2516_v14 = vmax.f32 %v2514_v33, %v2515_v39  ;;  %v2527_v58 = vsel %vm1132_vm3, %v7110_v63, -inf }
 0x814   :  { %v2528_v49 = vsel %vm1132_vm3, %v7114_v40, -inf  ;;  %v2415_v29 = vsel %vm1132_vm3, %v8521_v4, -inf  ;;  %v2425_v24 = vmax.f32 %v2423_v26, %v2424_v34  ;;  %v2445_v9 = vrot.slane %v2444_v20, 2 }
 0x815   :  { %v2458_v56 = vrot.slane %v2457_v1, 2  ;;  %v2414_v11 = vmax.f32 %v2412_v53, %v2413_v46  ;;  %v2506_v44 = vsel %vm1132_vm3, %v8522_v50, -inf  ;;  %v2518_v59 = vmax.f32 %v2516_v14, %v2517_v38 }
 0x816   :  { %v2530_v7 = vsel %vm1132_vm3, %v7122_v36, -inf  ;;  %v2427_v57 = vmax.f32 %v2425_v24, %v2426_v8  ;;  %v2495_v18 = vrot.slane %v2494_v2, 4  ;;  %v2507_v63 = vmax.f32 %v2505_v35, %v2506_v44  ;;  %v8523_v36 = vld [vmem:[#allocation12_spill] sm:$0xff] }
 0x817   :  { %v2529_v19 = vmax.f32 %v2527_v58, %v2528_v49  ;;  %v2343_v40 = vrot.slane %v7192_v17, 1  ;;  %v2380_v15 = vrot.slane %v7197_v41, 2  ;;  %v2471_v61 = vrot.slane %v2470_v60, 2 }
 0x818   :  { %v2483_v43 = vmax.f32 %v2481_v5, %v2482_v55  ;;  %v2446_v27 = vmax.f32 %v2444_v20, %v2445_v9  ;;  %v2459_v47 = vmax.f32 %v2457_v1, %v2458_v56  ;;  %v2519_v46 = vsel %vm1132_vm3, %v7106_v42, -inf }
 0x819   :  { %v2531_v13 = vmax.f32 %v2529_v19, %v2530_v7  ;;  %v2392_v51 = vmax.f32 %v7178_v16, %v2391_v23  ;;  %v2416_v52 = vmax.f32 %v2414_v11, %v2415_v29  ;;  %v2428_v54 = vsel %vm1132_vm3, %v8523_v36, -inf }
 0x81a   :  { %v2520_v45 = vmax.f32 %v2518_v59, %v2519_v46  ;;  %v2404_v62 = vrot.slane %v7206_v32, 4  ;;  %v2429_v37 = vmax.f32 %v2427_v57, %v2428_v54  ;;  %v2496_v53 = vmax.f32 %v2494_v2, %v2495_v18 }
 0x81b   :  { %v2508_v6 = vrot.slane %v2507_v63, 4  ;;  %v2368_v5 = vmax.f32 %v7174_v21, %v2367_v25  ;;  %v2472_v20 = vmax.f32 %v2470_v60, %v2471_v61  ;;  %v2484_v1 = vrot.slane %v2483_v43, 2 }
 0x81c   :  { %v2532_v42 = vsel %vm1132_vm3, %v7126_v10, -inf  ;;  %v2356_v30 = vrot.slane %v7199_v12, 1  ;;  %v2447_v16 = vrot.slane %v2446_v27, 1  ;;  %v2460_v23 = vrot.slane %v2459_v47, 1 }
 0x81d   :  { %v2533_v33 = vmax.f32 %v2531_v13, %v2532_v42  ;;  %v2381_v39 = vmax.f32 %v7197_v41, %v2380_v15  ;;  %v2393_v26 = vrot.slane %v2392_v51, 2  ;;  %v2417_v3 = vrot.slane %v2416_v52, 4 }
 0x81e   :  { %v2521_v34 = vrot.slane %v2520_v45, 4  ;;  %v2405_v48 = vmax.f32 %v7206_v32, %v2404_v62  ;;  %v2430_v8 = vrot.slane %v2429_v37, 4  ;;  %v2497_v22 = vrot.slane %v2496_v53, 2 }
 0x81f   :  { %v2509_v21 = vmax.f32 %v2507_v63, %v2508_v6  ;;  %v2344_v25 = vmax.f32 %v7192_v17, %v2343_v40  ;;  %v2369_v0 = vrot.slane %v2368_v5, 1  ;;  %v2473_v60 = vrot.slane %v2472_v20, 1 }
 0x820   :  { %v2485_v10 = vmax.f32 %v2483_v43, %v2484_v1  ;;  %v2357_v2 = vmax.f32 %v7199_v12, %v2356_v30  ;;  %v2448_v35 = vmax.f32 %v2446_v27, %v2447_v16  ;;  %v2461_v38 = vmax.f32 %v2459_v47, %v2460_v23 }
 0x821   :  { %v2534_v55 = vrot.slane %v2533_v33, 4  ;;  %v2382_v14 = vrot.slane %v2381_v39, 1  ;;  %v2394_v41 = vmax.f32 %v2392_v51, %v2393_v26  ;;  %v2418_v58 = vmax.f32 %v2416_v52, %v2417_v3 }
 0x822   :  { %v2522_v49 = vmax.f32 %v2520_v45, %v2521_v34  ;;  %v2406_v4 = vrot.slane %v2405_v48, 2  ;;  %v2431_v29 = vmax.f32 %v2429_v37, %v2430_v8  ;;  %v2498_v32 = vmax.f32 %v2496_v53, %v2497_v22 }
 0x823   :  { %v2510_v24 = vrot.slane %v2509_v21, 2  ;;  %v2370_v9 = vmax.f32 %v2368_v5, %v2369_v0  ;;  %v2474_v56 = vmax.f32 %v2472_v20, %v2473_v60  ;;  %v2486_v11 = vrot.slane %v2485_v10, 1 }
 0x824   :  { %v2574_v17 = vsub.f32 0.0, %v2344_v25  ;;  %v2535_v50 = vmax.f32 %v2533_v33, %v2534_v55  ;;  %v2575_v44 = vsub.f32 0.0, %v2357_v2  ;;  %v2582_v59 = vsub.f32 0.0, %v2448_v35 }
 0x825   :  { %v2583_v7 = vsub.f32 0.0, %v2461_v38  ;;  %v2383_v12 = vmax.f32 %v2381_v39, %v2382_v14  ;;  %v2395_v57 = vrot.slane %v2394_v41, 1  ;;  %v2419_v18 = vrot.slane %v2418_v58, 2 }
 0x826   :  { %v2523_v63 = vrot.slane %v2522_v49, 2  ;;  %v2407_v19 = vmax.f32 %v2405_v48, %v2406_v4  ;;  %v2432_v40 = vrot.slane %v2431_v29, 2  ;;  %v2499_v15 = vrot.slane %v2498_v32, 1 }
 0x827   :  { %v2511_v61 = vmax.f32 %v2509_v21, %v2510_v24  ;;  %v2576_v43 = vsub.f32 0.0, %v2370_v9  ;;  %v2584_v27 = vsub.f32 0.0, %v2474_v56  ;;  %v2556_v47 = vsel %vm1367_vm4, %v2357_v2, %v2344_v25 }
 0x828   :  { %v2563_v46 = vsel %vm1367_vm4, %v2461_v38, %v2448_v35  ;;  %v2487_v13 = vmax.f32 %v2485_v10, %v2486_v11  ;;  %v2536_v51 = vrot.slane %v2535_v50, 2  ;;  %v2606_v52 = vsel %vm1367_vm4, %v2575_v44, %v2574_v17 }
 0x829   :  { %v2613_v36 = vsel %vm1367_vm4, %v2583_v7, %v2582_v59  ;;  %v2420_v54 = vmax.f32 %v2418_v58, %v2419_v18  ;;  %v2524_v45 = vmax.f32 %v2522_v49, %v2523_v63  ;;  %v2408_v62 = vrot.slane %v2407_v19, 1  ;;  %v8524_v7 = vld [vmem:[#allocation20_spill] sm:$0xff] }
 0x82a   :  { %v2512_v37 = vrot.slane %v2511_v61, 1  ;;  %v2557_v53 = vsel %vm1369_vm5, %v2370_v9, %v2556_v47  ;;  %v2564_v6 = vsel %vm1369_vm5, %v2474_v56, %v2563_v46  ;;  %v2396_v5 = vmax.f32 %v2394_v41, %v2395_v57 }
 0x82b   :  { %v2500_v20 = vmax.f32 %v2498_v32, %v2499_v15  ;;  %v2607_v1 = vsel %vm1369_vm5, %v2576_v43, %v2606_v52  ;;  %v2614_v42 = vsel %vm1369_vm5, %v2584_v27, %v2613_v36  ;;  %v2433_v30 = vmax.f32 %v2431_v29, %v2432_v40 }
 0x82c   :  { %v2537_v16 = vmax.f32 %v2535_v50, %v2536_v51  ;;  %v2577_v23 = vsub.f32 0.0, %v2383_v12  ;;  %v2585_v33 = vsub.f32 0.0, %v2487_v13  ;;  %v2421_v39 = vrot.slane %v2420_v54, 1 }
 0x82d   :  { %v2525_v26 = vrot.slane %v2524_v45, 1  ;;  %v2558_v3 = vsel %vm1371_vm6, %v2383_v12, %v2557_v53  ;;  %v2565_v34 = vsel %vm1371_vm6, %v2487_v13, %v2564_v6  ;;  %v2409_v48 = vmax.f32 %v2407_v19, %v2408_v62  ;;  %v8596_v62 = vld [vmem:[#allocation66_spill] sm:$0xff] }
 0x82e   :  { %v2513_v8 = vmax.f32 %v2511_v61, %v2512_v37  ;;  %v2608_v22 = vsel %vm1371_vm6, %v2577_v23, %v2607_v1  ;;  %v2615_v21 = vsel %vm1371_vm6, %v2585_v33, %v2614_v42  ;;  %v2578_v25 = vsub.f32 0.0, %v2396_v5  ;;  %v8525_v61 = vld [vmem:[#allocation24_spill] sm:$0xff]  ;;  %v5626_v23 = vld [vmem:[%s8153_s12 + $0x48] sm:$0xff]  }
 0x82f   :  { %v2586_v0 = vsub.f32 0.0, %v2500_v20  ;;  %v2434_v60 = vrot.slane %v2433_v30, 1  ;;  %v2538_v10 = vrot.slane %v2537_v16, 1  ;;  %v2559_v2 = vsel %vm1373_vm7, %v2396_v5, %v2558_v3  ;;  %v5627_v33 = vld [vmem:[%s8154_s13 + $0x48] sm:$0xff]   ;;  %v5629_v3 = vld [vmem:[%s8154_s13 + $0x50] sm:$0xff]  }
 0x830   :  { %v2566_v35 = vsel %vm1373_vm7, %v2500_v20, %v2565_v34  ;;  %v2422_v38 = vmax.f32 %v2420_v54, %v2421_v39  ;;  %v2526_v55 = vmax.f32 %v2524_v45, %v2525_v26  ;;  %v2609_v14 = vsel %vm1373_vm7, %v2578_v25, %v2608_v22  ;;  %v5628_v26 = vld [vmem:[%s8153_s12 + $0x50] sm:$0xff]   ;;  %v5630_v34 = vld [vmem:[%s8153_s12 + $0x58] sm:$0xff]   ;;  %v5633_v25 = vld [vmem:[%s8154_s13 + $0x60] sm:$0xff]  }
 0x831   :  { %v2616_v41 = vsel %vm1373_vm7, %v2586_v0, %v2615_v21  ;;  %v2579_v58 = vsub.f32 0.0, %v2409_v48  ;;  %v2587_v49 = vsub.f32 0.0, %v2513_v8  ;;  %v2560_v4 = vsel %vm8324_vm8, %v2409_v48, %v2559_v2  ;;  %v5631_v48 = vld [vmem:[%s8154_s13 + $0x58] sm:$0xff]   ;;  %v5632_v21 = vld [vmem:[%s8153_s12 + $0x60] sm:$0xff]   ;;  %v8598_v54 = vld [vmem:[#allocation42_spill] sm:$0xff] }
 0x832   :  { %v2567_v29 = vsel %vm8324_vm8, %v2513_v8, %v2566_v35  ;;  %v2435_v32 = vmax.f32 %v2433_v30, %v2434_v60  ;;  %v2539_v24 = vmax.f32 %v2537_v16, %v2538_v10  ;;  %v2580_v11 = vsub.f32 0.0, %v2422_v38  ;;  %v5624_v30 = vld [vmem:[%s8153_s12 + $0x40] sm:$0xff]  }
 0x833   :  { %v2610_v9 = vsel %vm8324_vm8, %v2579_v58, %v2609_v14  ;;  %v2617_v56 = vsel %vm8324_vm8, %v2587_v49, %v2616_v41  ;;  %v2588_v17 = vsub.f32 0.0, %v2526_v55  ;;  %v2561_v44 = vsel %vm1377_vm9, %v2422_v38, %v2560_v4  ;;  %vm8529_vm8 = vmmov %vm8527_vm11  ;;  %v5625_v16 = vld [vmem:[%s8154_s13 + $0x40] sm:$0xff]   ;;  %5243 = vmatpush3.bf16.msra.mxu0 %v5624_v30  ;;  %v5634_v41 = vld [vmem:[%s8153_s12 + $0x68] sm:$0xff]  }
 0x834   :  { %v2568_v59 = vsel %vm1377_vm9, %v2526_v55, %v2567_v29  ;;  %v2611_v18 = vsel %vm1377_vm9, %v2580_v11, %v2610_v9  ;;  %v2581_v40 = vsub.f32 0.0, %v2435_v32  ;;  %v2589_v15 = vsub.f32 0.0, %v2539_v24  ;;  %5263 = vmatpush3.bf16.msra.mxu1 %v5625_v16  ;;  %v5635_v58 = vld [vmem:[%s8154_s13 + $0x68] sm:$0xff]   ;;  %v5637_v9 = vld [vmem:[%s8154_s13 + $0x70] sm:$0xff]   ;;  %v5639_v11 = vld [vmem:[%s8154_s13 + $0x78] sm:$0xff]  }
 0x835   :  { %v2618_v63 = vsel %vm1377_vm9, %v2588_v17, %v2617_v56  ;;  %v2562_v46 = vsel %vm8526_vm14, %v2435_v32, %v2561_v44  ;;  %v2569_v13 = vsel %vm8527_vm11, %v2539_v24, %v2568_v59  ;;  %v8532_v39 = vmov 0.0   ;;  %v5636_v24 = vld [vmem:[%s8153_s12 + $0x70] sm:$0xff]   ;;  %v5638_v56 = vld [vmem:[%s8153_s12 + $0x78] sm:$0xff]  }
 0x836   :  { %v2612_v51 = vsel %vm8528_vm12, %v2581_v40, %v2611_v18  ;;  %v2619_v52 = vsel %vm8529_vm8, %v2589_v15, %v2618_v63  ;;  %v2572_v45 = vsel %vm1349_vm13, %v2562_v46, 0.0  ;;  %v2573_v37 = vsel %vm1350_vm15, %v2569_v13, 0.0  ;;  %5244 = vmatprep.subr.bf16.mxu0 %v8532_v39  ;;  %5264 = vmatprep.subr.bf16.mxu1 %v8532_v39 }
 0x837   :  { %v5529_v53 = vpack.i.bf16 %v2619_v52, %v2612_v51  ;;  %v5534_v20 = vpack.i.bf16 %v2573_v37, %v2572_v45  ;;  %5245 = vmatpush3.bf16.msra.mxu0 %v5626_v23 }
 0x838   :  { %5265 = vmatpush3.bf16.msra.mxu1 %v5627_v33  ;;  %5246 = vmatprep.subr.bf16.mxu0 %v8532_v39  ;;  %v5640_v33 = vld [vmem:[%s8155_s14 + $0x40] sm:$0xff]  }
 0x839   :  { %5266 = vmatprep.subr.bf16.mxu1 %v8532_v39 }
 0x83b   :  { %5247 = vmatpush3.bf16.msra.mxu0 %v5628_v26 }
 0x83c   :  { %5267 = vmatpush3.bf16.msra.mxu1 %v5629_v3  ;;  %5248 = vmatprep.subr.bf16.mxu0 %v8532_v39  ;;  %v5642_v3 = vld [vmem:[%s8155_s14 + $0x50] sm:$0xff]  }
 0x83d   :  { %5268 = vmatprep.subr.bf16.mxu1 %v8532_v39 }
 0x83f   :  { %5249 = vmatpush3.bf16.msra.mxu0 %v5630_v34  ;;  %v5643_v34 = vld [vmem:[%s8155_s14 + $0x58] sm:$0xff]  }
 0x840   :  { %5269 = vmatpush3.bf16.msra.mxu1 %v5631_v48  ;;  %5250 = vmatprep.subr.bf16.mxu0 %v8532_v39  ;;  %v5644_v48 = vld [vmem:[%s8155_s14 + $0x60] sm:$0xff]  }
 0x841   :  { %5270 = vmatprep.subr.bf16.mxu1 %v8532_v39 }
 0x843   :  { %5251 = vmatpush3.bf16.msra.mxu0 %v5632_v21  ;;  %v5647_v21 = vld [vmem:[%s8155_s14 + $0x78] sm:$0xff]  }
 0x844   :  { %5271 = vmatpush3.bf16.msra.mxu1 %v5633_v25  ;;  %5252 = vmatprep.subr.bf16.mxu0 %v8532_v39  ;;  %v8533_v25 = vld [vmem:[#allocation83_spill] sm:$0xff] }
 0x845   :  { %5272 = vmatprep.subr.bf16.mxu1 %v8532_v39 }
 0x847   :  { %5253 = vmatpush3.bf16.msra.mxu0 %v5634_v41 }
 0x848   :  { %5273 = vmatpush3.bf16.msra.mxu1 %v5635_v58  ;;  %5254 = vmatprep.subr.bf16.mxu0 %v8532_v39 }
 0x849   :  { %5274 = vmatprep.subr.bf16.mxu1 %v8532_v39 }
 0x84b   :  { %5255 = vmatpush3.bf16.msra.mxu0 %v5636_v24  ;;  %v8536_v24 = vld [vmem:[#allocation76_spill] sm:$0xff] }
 0x84c   :  { %5275 = vmatpush3.bf16.msra.mxu1 %v5637_v9  ;;  %5256 = vmatprep.subr.bf16.mxu0 %v8532_v39 }
 0x84d   :  { %5276 = vmatprep.subr.bf16.mxu1 %v8532_v39 }
 0x84f   :  { %5257 = vmatpush3.bf16.msra.mxu0 %v5638_v56 }
 0x850   :  { %5277 = vmatpush3.bf16.msra.mxu1 %v5639_v11  ;;  %5282 = vmatprep.subr.bf16.mxu0 %v8532_v39 }
 0x8b7   :  { %v2205_v50 = vpop.f32.mrb[24].mxu0 }
 0x8b8   :  { %v7275_v12 = vmul.f32 %v2205_v50, %v8524_v7  ;;  %v5232_v57 = vpop.f32.mrb[25].mxu0  ;;  %v8602_v7 = vld [vmem:[#allocation52_spill] sm:$0xff] }
 0x8b9   :  { %v2208_v19 = vpop.f32.mrb[26].mxu0 }
 0x8ba   :  { %v7280_v43 = vmul.f32 %v2208_v19, %v8525_v61  ;;  %v5233_v27 = vpop.f32.mrb[27].mxu0  ;;  %v2214_v47 = vmul.f32 %v7275_v12, %v7275_v12  ;;  %v8600_v61 = vld [vmem:[#allocation78_spill] sm:$0xff] }
 0x8bc   :  { %2218 = vrot.lane.b32.xlu1 %v2214_v47, %s5748_s23  ;;  %v2215_v36 = vmul.f32 %v7280_v43, %v7280_v43 }
 0x8be   :  { %2220 = vrot.lane.b32.xlu0 %v2215_v36, %s5748_s23 }
 0x8bf   :  { %v7296_v6 = vpop.f32.mrb[28].mxu0 }
 0x8c0   :  { %5530 = vrot.lane.b32.xlu1 %v5529_v53, %s5749_s28  ;;  %v5240_v5 = vpop.f32.mrb[29].mxu0 }
 0x8c1   :  { %v7299_v1 = vpop.f32.mrb[30].mxu0 }
 0x8c2   :  { %5535 = vrot.lane.b32.xlu0 %v5534_v20, %s5748_s23  ;;  %v5241_v42 = vpop.f32.mrb[31].mxu0 }
 0x92e   :  { %v2219_v8 = vpop.permute.xlu1 %2218 }
 0x92f   :  { %v2224_v22 = vsub.f32 %v7275_v12, %v2219_v8  ;;  %v5645_v8 = vld [vmem:[%s8155_s14 + $0x68] sm:$0xff]  }
 0x930   :  { %v2221_v0 = vpop.permute.xlu0 %2220 }
 0x931   :  { %v2226_v60 = vmax.f32 %v2224_v22, 0.0  ;;  %v2225_v10 = vsub.f32 %v7280_v43, %v2221_v0  ;;  %v5646_v22 = vld [vmem:[%s8155_s14 + $0x70] sm:$0xff]   ;;  %v2720_v0 = vadd.f32 %v7296_v6, %v8533_v25 }
 0x932   :  { %v5531_v2 = vpop.permute.xlu1 %5530 }
 0x933   :  { %v2228_v35 = vadd.f32 1e-05, %v2226_v60  ;;  %v2227_v38 = vmax.f32 %v2225_v10, 0.0  ;;  %v5533_v55 = vunpack.i.h.bf16 %v5531_v2  ;;  %v5532_v14 = vunpack.i.l.bf16 %v5531_v2  ;;  %v8534_v2 = vld [vmem:[#allocation82_spill] sm:$0xff] }
 0x934   :  { %v5536_v47 = vpop.permute.xlu0 %5535 }
 0x935   :  { %5703 = vrsqrt.f32 %v2228_v35  ;;  %v2229_v49 = vadd.f32 1e-05, %v2227_v38  ;;  %v2627_v4 = vsel %vm1350_vm15, %v5533_v55, 0.0  ;;  %v2626_v29 = vsel %vm1349_vm13, %v5532_v14, 0.0  ;;  %v8535_v55 = vld [vmem:[#allocation73_spill] sm:$0xff] }
 0x936   :  { %v5539_v32 = vpack.i.bf16 %v2627_v4, %v2626_v29  ;;  %vm2232_vm8 = vcmp.eq.f32.partialorder %v2228_v35, inf  ;;  %v2235_v18 = vand.u32 2147483648, %v2228_v35  ;;  %vm2234_vm11 = vcmp.eq.f32.partialorder %v2228_v35, 0.0 }
 0x937   :  { %5705 = vrsqrt.f32 %v2229_v49  ;;  %vm2239_vm14 = vcmp.eq.f32.partialorder %v2229_v49, inf  ;;  %v2242_v63 = vand.u32 2147483648, %v2229_v49  ;;  %vm2241_vm12 = vcmp.eq.f32.partialorder %v2229_v49, 0.0 }
 0x938   :  { %5540 = vrot.lane.b32.xlu1 %v5539_v32, %s5750_s4  ;;  %v5538_v13 = vunpack.i.h.bf16 %v5536_v47  ;;  %v5537_v51 = vunpack.i.l.bf16 %v5536_v47 }
 0x93a   :  { %v2653_v37 = vsel %vm434_vm0, %v7280_v43, %v5538_v13  ;;  %v2652_v53 = vsel %vm434_vm0, %v7275_v12, %v5537_v51  ;;  %v5641_v12 = vld [vmem:[%s8155_s14 + $0x48] sm:$0xff]   ;;  %v5719_v43 = vld [vmem:[%s8339_s1] sm:$0xff]   ;;  %v8541_v51 = vld [vmem:[#allocation7_spill] sm:$0xff] }
 0x93b   :  { %v5720_v13 = vld [vmem:[%s8339_s1 + $0x8] sm:$0xff]  }
 0x93f   :  { %v5704_v17 = vpop.eup %5703 }
 0x940   :  { %v2231_v50 = vmul.f32 %v5704_v17, %v2228_v35 }
 0x941   :  { %v5706_v44 = vpop.eup %5705 }
 0x942   :  { %v2233_v59 = vsel %vm2232_vm8, %v2228_v35, %v2231_v50  ;;  %v2238_v57 = vmul.f32 %v5706_v44, %v2229_v49  ;;  %v2721_v35 = vadd.f32 %v7299_v1, %v8534_v2  ;;  %v8537_v50 = vld [vmem:[#allocation75_spill] sm:$0xff] }
 0x943   :  { %v2236_v40 = vsel %vm2234_vm11, %v2235_v18, %v2233_v59  ;;  %v8538_v18 = vld [vmem:[#allocation77_spill] sm:$0xff] }
 0x944   :  { %v2240_v19 = vsel %vm2239_vm14, %v2229_v49, %v2238_v57 }
 0x945   :  { %v2243_v15 = vsel %vm2241_vm12, %v2242_v63, %v2240_v19 }
 0x946   :  { %v5544_v27 = vpack.i.bf16 %v2243_v15, %v2236_v40  ;;  %v4784_v40 = vld [vmem:[%s8156_s15 + $0x1] ss:$0 sm:$0xff] }
 0x948   :  { %5545 = vrot.lane.b32.xlu0 %v5544_v27, %s5750_s4 }
 0x9aa   :  { %v5541_v46 = vpop.permute.xlu1 %5540 }
 0x9ab   :  { %v5543_v52 = vunpack.i.h.bf16 %v5541_v46  ;;  %v5542_v36 = vunpack.i.l.bf16 %v5541_v46 }
 0x9ad   :  { %v2654_v42 = vsel %vm1132_vm3, %v2652_v53, %v5542_v36  ;;  %v2655_v30 = vsel %vm1132_vm3, %v2653_v37, %v5543_v52  ;;  %v8542_v52 = vld [vmem:[#allocation8_spill] sm:$0xff] }
 0x9ae   :  { %v5648_v36 = vld [vmem:[%s8149_s8 + $0x20] sm:$0xff]  }
 0x9af   :  { %v5650_v37 = vld [vmem:[%s8148_s7 + $0x20] sm:$0xff]  }
 0x9ba   :  { %v5546_v45 = vpop.permute.xlu0 %5545 }
 0x9bb   :  { %v5548_v5 = vunpack.i.h.bf16 %v5546_v45  ;;  %v5547_v20 = vunpack.i.l.bf16 %v5546_v45  ;;  %v5649_v45 = vld [vmem:[%s8149_s8 + $0x28] sm:$0xff]  }
 0x9bd   :  { %v2656_v16 = vsel %vm1474_vm10, %v2654_v42, %v5547_v20  ;;  %v2657_v23 = vsel %vm1474_vm10, %v2655_v30, %v5548_v5 }
 0x9be   :  { %v2658_v26 = vpack.c.bf16 %v2657_v23, %v2656_v16 }
 0x9c0   :  { %5259 = vmatmul.mubr.bf16.vlgmr.msra.gmra.mrb[32].mxu0 %v2658_v26  ;;  %5279 = vmatmul.mubr.bf16.vlgmr.msra.gmra.mrb[24].mxu1 %v2658_v26 }
 0x9c1   :  { %5283 = vmatpush3.bf16.msra.mxu0 %v5640_v33  ;;  %5298 = vmatprep.mubr.msk.bf16.mxu0 %vm5747_vm2, %v8532_v39 }
 0x9c2   :  { %5284 = vmatprep.subr.bf16.mxu0 %v8532_v39  ;;  %5304 = vmatprep.mubr.msk.bf16.mxu1 %vm649_vm1, %v5719_v43 }
 0x9c5   :  { %5285 = vmatpush3.bf16.msra.mxu0 %v5641_v12 }
 0x9c6   :  { %5286 = vmatprep.subr.bf16.mxu0 %v8532_v39 }
 0x9c9   :  { %5287 = vmatpush3.bf16.msra.mxu0 %v5642_v3 }
 0x9ca   :  { %5288 = vmatprep.subr.bf16.mxu0 %v8532_v39 }
 0x9cd   :  { %5289 = vmatpush3.bf16.msra.mxu0 %v5643_v34  ;;  %v5651_v34 = vld [vmem:[%s8148_s7 + $0x28] sm:$0xff]  }
 0x9ce   :  { %5290 = vmatprep.subr.bf16.mxu0 %v8532_v39 }
 0x9d1   :  { %5291 = vmatpush3.bf16.msra.mxu0 %v5644_v48  ;;  %v4634_v48 = vld [vmem:[%s8151_s10 + $0x2] ss:$0 sm:$0xff] }
 0x9d2   :  { %5292 = vmatprep.subr.bf16.mxu0 %v8532_v39 }
 0x9d5   :  { %5293 = vmatpush3.bf16.msra.mxu0 %v5645_v8 }
 0x9d6   :  { %5294 = vmatprep.subr.bf16.mxu0 %v8532_v39 }
 0x9d9   :  { %5295 = vmatpush3.bf16.msra.mxu0 %v5646_v22 }
 0x9da   :  { %5296 = vmatprep.subr.bf16.mxu0 %v8532_v39 }
 0x9dd   :  { %5297 = vmatpush3.bf16.msra.mxu0 %v5647_v21 }
 0x9de   :  { %5314 = vmatprep.subr.bf16.mxu0 %v5648_v36 }
 0x9e0   :  { %5299 = vmatmul.mubr.bf16.vlgmr.msra.gmra.mrb[36].mxu0 %v2658_v26 }
 0x9e1   :  { %5315 = vmatpush3.bf16.msra.mxu0 %v5648_v36 }
 0x9e2   :  { %5316 = vmatprep.subr.bf16.mxu0 %v5649_v45 }
 0x9e5   :  { %5317 = vmatpush3.bf16.msra.mxu0 %v5649_v45 }
 0x9e6   :  { %5322 = vmatprep.subr.bf16.mxu0 %v5650_v37 }
 0xa93   :  { %v2821_v60 = vpop.f32.mrb[32].mxu0  ;;  %v2929_v10 = vpop.f32.mrb[24].mxu1 }
 0xa94   :  { %v2828_v38 = vadd.f32 %v2821_v60, %v2720_v0  ;;  %v2936_v14 = vmul.f32 %v2929_v10, %v8535_v55  ;;  %v5260_v41 = vpop.f32.mrb[33].mxu0  ;;  %v5280_v58 = vpop.f32.mrb[25].mxu1  ;;  %v8593_v55 = vld [vmem:[#allocation30_spill] sm:$0xff] }
 0xa95   :  { %v2824_v49 = vpop.f32.mrb[34].mxu0  ;;  %v2932_v4 = vpop.f32.mrb[26].mxu1 }
 0xa96   :  { %v2938_v29 = vadd.f32 %v2936_v14, %v2828_v38  ;;  %v2829_v32 = vadd.f32 %v2824_v49, %v2721_v35  ;;  %v2937_v9 = vmul.f32 %v2932_v4, %v8536_v24  ;;  %v5261_v56 = vpop.f32.mrb[35].mxu0  ;;  %v5281_v11 = vpop.f32.mrb[27].mxu1 }
 0xa98   :  { %v2939_v17 = vadd.f32 %v2937_v9, %v2829_v32 }
 0xab3   :  { %v3039_v6 = vpop.f32.mrb[36].mxu0 }
 0xab4   :  { %v3046_v44 = vmul.f32 %v3039_v6, %v8537_v50  ;;  %v5300_v59 = vpop.f32.mrb[37].mxu0  ;;  %v8591_v50 = vld [vmem:[#allocation40_spill] sm:$0xff] }
 0xab5   :  { %v3042_v57 = vpop.f32.mrb[38].mxu0 }
 0xab6   :  { %v3048_v1 = vadd.f32 %v3046_v44, %v2938_v29  ;;  %v3047_v63 = vmul.f32 %v3042_v57, %v8538_v18  ;;  %v5301_v19 = vpop.f32.mrb[39].mxu0  ;;  %v8590_v18 = vld [vmem:[#allocation23_spill] sm:$0xff] }
 0xab8   :  { %v3049_v15 = vadd.f32 %v3047_v63, %v2939_v17  ;;  %v7429_v27 = vadd.f32 %v4784_v40, %v3048_v1 }
 0xaba   :  { %8539 = vst [vmem:[#allocation55_spill] sm:$0xff] %v7429_v27  ;;  %v7431_v47 = vadd.f32 %v4784_v40, %v3049_v15 }
 0xabc   :  { %8540 = vst [vmem:[#allocation74_spill] sm:$0xff] %v7431_v47  ;;  %v7435_v46 = vpack.c.bf16 %v7431_v47, %v7429_v27 }
 0xabe   :  { %5302 = vmatprep.subr.bf16.mxu1 %v7435_v46 }
 0xabf   :  { %5303 = vmatpush3.bf16.msra.mxu1 %v7435_v46 }
 0xac0   :  { %5308 = vmatprep.subr.bf16.mxu1 %v7435_v46 }
 0xac2   :  { %5305 = vmatmul.mubr.msk.bf16.vlgmr.msra.gmra.mrb[28].mxu1 %vm649_vm1, %v5720_v13  ;;  %v5652_v13 = vld [vmem:[%s8152_s11 + $0x20] sm:$0xff]  }
 0xac3   :  { %5309 = vmatpush3.bf16.msra.mxu1 %v7435_v46  ;;  %5310 = vmatprep.mubr.msk.bf16.mxu1 %vm649_vm1, %v8541_v51  ;;  %v8543_v51 = vld [vmem:[#allocation5_spill] sm:$0xff] }
 0xac4   :  { %5330 = vmatprep.subr.bf16.mxu1 %v8532_v39 }
 0xaca   :  { %5311 = vmatmul.mubr.msk.bf16.vlgmr.msra.gmra.mrb[32].mxu1 %vm649_vm1, %v8542_v52  ;;  %v5653_v52 = vld [vmem:[%s8152_s11 + $0x28] sm:$0xff]  }
 0xacb   :  { %5334 = vmatprep.mubr.msk.bf16.mxu1 %vm5747_vm2, %v8532_v39 }
 0xb95   :  { %v5306_v53 = vpop.f32.mrb[28].mxu1 }
 0xb96   :  { %v3095_v5 = vpop.f32.mrb[29].mxu1 }
 0xb97   :  { %v5307_v20 = vpop.f32.mrb[30].mxu1 }
 0xb98   :  { %v3160_v42 = vpack.c.bf16 %v5307_v20, %v5306_v53  ;;  %v3098_v30 = vpop.f32.mrb[31].mxu1 }
 0xb99   :  { %v3159_v16 = vpack.c.bf16 %v3098_v30, %v3095_v5 }
 0xb9d   :  { %v5312_v23 = vpop.f32.mrb[32].mxu1 }
 0xb9e   :  { %v3144_v33 = vpop.f32.mrb[33].mxu1 }
 0xb9f   :  { %v5313_v26 = vpop.f32.mrb[34].mxu1 }
 0xba0   :  { %v3167_v12 = vpack.c.bf16 %v5313_v26, %v5312_v23  ;;  %v3147_v43 = vpop.f32.mrb[35].mxu1 }
 0xba1   :  { %v3166_v3 = vpack.c.bf16 %v3147_v43, %v3144_v33  ;;  %v8546_v33 = vld [vmem:[#allocation13_spill] sm:$0xff] }
 0xba3   :  { %5318 = vmatprep.mubr.msk.bf16.mxu0 %vm434_vm0, %v3166_v3  ;;  %v8548_v3 = vld [vmem:[#allocation21_spill] sm:$0xff] }
 0xba4   :  { %5319 = vmatmul.mubr.msk.bf16.vlgmr.msra.gmra.mrb[4].mxu0 %vm434_vm0, %v3167_v12  ;;  %v8547_v12 = vld [vmem:[#allocation14_spill] sm:$0xff] }
 0xba5   :  { %5326 = vmatprep.mubr.msk.bf16.mxu0 %vm434_vm0, %v3159_v16  ;;  %5323 = vmatpush3.bf16.msra.mxu0 %v5650_v37  ;;  %v8545_v16 = vld [vmem:[#allocation17_spill] sm:$0xff] }
 0xba6   :  { %5324 = vmatprep.subr.bf16.mxu0 %v5651_v34 }
 0xba9   :  { %5325 = vmatpush3.bf16.msra.mxu0 %v5651_v34 }
 0xbaa   :  { %5366 = vmatprep.subr.bf16.mxu0 %v8532_v39 }
 0xbb0   :  { %5327 = vmatmul.mubr.msk.bf16.vlgmr.msra.gmra.mrb[4].mxu0 %vm434_vm0, %v3160_v42  ;;  %v8544_v42 = vld [vmem:[#allocation15_spill] sm:$0xff] }
 0xbb1   :  { %5382 = vmatprep.mubr.msk.bf16.mxu0 %vm5747_vm2, %v8532_v39 }
 0xc83   :  { %v5328_v8 = vpop.f32.mrb[4].mxu0 }
 0xc84   :  { %v5452_v22 = vadd.f32 %v5328_v8, %v4634_v48  ;;  %v3292_v21 = vpop.f32.mrb[5].mxu0  ;;  %v8549_v8 = vld [vmem:[#allocation26_spill] sm:$0xff] }
 0xc85   :  { %v5453_v25 = vadd.f32 %v4634_v48, %v3292_v21  ;;  %v5329_v0 = vpop.f32.mrb[6].mxu0 }
 0xc86   :  { %v5454_v60 = vadd.f32 %v5329_v0, %v4634_v48  ;;  %v3295_v10 = vpop.f32.mrb[7].mxu0  ;;  %v3313_v35 = vmul.f32 %v5452_v22, %v5452_v22  ;;  %v3412_v9 = vsub.f32 0.0, %v5452_v22 }
 0xc87   :  { %v5455_v2 = vadd.f32 %v4634_v48, %v3295_v10  ;;  %v3311_v14 = vmul.f32 %v5453_v25, %v5453_v25  ;;  %v3410_v29 = vsub.f32 0.0, %v5453_v25 }
 0xc88   :  { %v3314_v38 = vmul.f32 %v5454_v60, %v5454_v60  ;;  %v3413_v32 = vsub.f32 0.0, %v5454_v60 }
 0xc89   :  { %v3312_v41 = vmul.f32 %v5455_v2, %v5455_v2  ;;  %v3411_v4 = vsub.f32 0.0, %v5455_v2 }
 0xc8a   :  { %v5554_v58 = vpack.i.bf16 %v3314_v38, %v3313_v35  ;;  %v8553_v38 = vld [vmem:[#allocation34_spill] sm:$0xff] }
 0xc8b   :  { %v5549_v49 = vpack.i.bf16 %v3312_v41, %v3311_v14 }
 0xc8c   :  { %5555 = vrot.lane.b32.xlu0 %v5554_v58, %s5748_s23  ;;  %v8555_v58 = vld [vmem:[#allocation48_spill] sm:$0xff] }
 0xc8d   :  { %5550 = vrot.lane.b32.xlu1 %v5549_v49, %s5748_s23 }
 0xc90   :  { %3420 = vrot.lane.b32.xlu0 %v3411_v4, %s5748_s23  ;;  %v8556_v4 = vld [vmem:[#allocation44_spill] sm:$0xff] }
 0xc91   :  { %3418 = vrot.lane.b32.xlu1 %v3410_v29, %s5748_s23 }
 0xc94   :  { %3424 = vrot.lane.b32.xlu0 %v3413_v32, %s5748_s23  ;;  %v8557_v32 = vld [vmem:[#allocation39_spill] sm:$0xff] }
 0xc95   :  { %3422 = vrot.lane.b32.xlu1 %v3412_v9, %s5748_s23 }
 0xcfe   :  { %v5556_v56 = vpop.permute.xlu0 %5555 }
 0xcff   :  { %v5551_v11 = vpop.permute.xlu1 %5550  ;;  %v5558_v17 = vunpack.i.h.bf16 %v5556_v56  ;;  %v5557_v6 = vunpack.i.l.bf16 %v5556_v56  ;;  %v8558_v56 = vld [vmem:[#allocation56_spill] sm:$0xff] }
 0xd00   :  { %v5553_v44 = vunpack.i.h.bf16 %v5551_v11  ;;  %v5552_v59 = vunpack.i.l.bf16 %v5551_v11 }
 0xd01   :  { %v3334_v19 = vsel %vm434_vm0, %v5454_v60, %v5558_v17  ;;  %v3333_v40 = vsel %vm434_vm0, %v5452_v22, %v5557_v6  ;;  %v8559_v17 = vld [vmem:[#allocation51_spill] sm:$0xff] }
 0xd02   :  { %v3332_v57 = vsel %vm434_vm0, %v5455_v2, %v5553_v44  ;;  %v3331_v1 = vsel %vm434_vm0, %v5453_v25, %v5552_v59  ;;  %v3336_v15 = vpack.c.bf16 %v3334_v19, %v3333_v40  ;;  %v3421_v36 = vpop.permute.xlu0 %3420  ;;  %v8560_v44 = vld [vmem:[#allocation25_spill] sm:$0xff]  ;;  %v8563_v40 = vld [vmem:[#allocation54_spill] sm:$0xff] }
 0xd03   :  { %v3335_v63 = vpack.c.bf16 %v3332_v57, %v3331_v1  ;;  %v3419_v45 = vpop.permute.xlu1 %3418  ;;  %v7503_v37 = vsel %vm434_vm0, %v5455_v2, %v3421_v36  ;;  %v8552_v2 = vld [vmem:[#allocation38_spill] sm:$0xff]  ;;  %v8561_v57 = vld [vmem:[#allocation31_spill] sm:$0xff] }
 0xd04   :  { %v7506_v53 = vsel %vm434_vm0, %v5453_v25, %v3419_v45  ;;  %v3435_v30 = vadd.f32 %v7503_v37, %v8544_v42  ;;  %v3439_v23 = vadd.f32 %v7503_v37, %v8545_v16  ;;  %v3443_v34 = vadd.f32 %v7503_v37, %v8548_v3  ;;  %v8550_v25 = vld [vmem:[#allocation27_spill] sm:$0xff]  ;;  %v8566_v45 = vld [vmem:[#allocation49_spill] sm:$0xff] }
 0xd05   :  { %5331 = vmatpush3.bf16.msra.mxu1 %v3335_v63  ;;  %v3434_v26 = vadd.f32 %v7506_v53, %v8546_v33  ;;  %v3438_v43 = vadd.f32 %v7506_v53, %v8547_v12  ;;  %v3442_v21 = vadd.f32 %v7506_v53, %v8549_v8  ;;  %v7528_v0 = vadd.f32 %v7506_v53, %v8550_v25  ;;  %v8562_v63 = vld [vmem:[#allocation32_spill] sm:$0xff]  ;;  %v8568_v16 = vld [vmem:[#allocation57_spill] sm:$0xff] }
 0xd06   :  { %5332 = vmatprep.subr.bf16.mxu1 %v8532_v39  ;;  %v3425_v5 = vpop.permute.xlu0 %3424  ;;  %v7536_v35 = vadd.f32 %v7506_v53, %v8552_v2  ;;  %v7540_v14 = vadd.f32 %v7503_v37, %v8553_v38  ;;  %v7548_v49 = vadd.f32 %v7503_v37, %v8555_v58  ;;  %v7558_v11 = vadd.f32 %v7506_v53, %v8558_v56  ;;  %v8569_v12 = vld [vmem:[#allocation80_spill] sm:$0xff]  ;;  %v8570_v8 = vld [vmem:[#allocation65_spill] sm:$0xff]  ;;  %v8575_v58 = vld [vmem:[#allocation59_spill] sm:$0xff] }
 0xd07   :  { %v3423_v20 = vpop.permute.xlu1 %3422  ;;  %v7562_v6 = vadd.f32 %v7503_v37, %v8559_v17  ;;  %v8573_v38 = vld [vmem:[#allocation64_spill] sm:$0xff]  ;;  %v8579_v17 = vld [vmem:[#allocation87_spill] sm:$0xff]  ;;  %v7667_v47 = vadd.f32 %v7506_v53, %v8593_v55  ;;  %v3512_v27 = vsel %vm1132_vm3, %v3439_v23, -inf }
 0xd08   :  { %v7522_v48 = vsel %vm434_vm0, %v5452_v22, %v3423_v20  ;;  %v8554_v22 = vld [vmem:[#allocation41_spill] sm:$0xff]  ;;  %v8567_v20 = vld [vmem:[#allocation72_spill] sm:$0xff] }
 0xd09   :  { %5333 = vmatpush3.bf16.msra.mxu1 %v3336_v15  ;;  %v7544_v41 = vadd.f32 %v7506_v53, %v8554_v22  ;;  %v3436_v59 = vadd.f32 %v7522_v48, %v8560_v44  ;;  %v3440_v1 = vadd.f32 %v7522_v48, %v8561_v57  ;;  %v3444_v19 = vadd.f32 %v7522_v48, %v8562_v63  ;;  %v8581_v57 = vld [vmem:[#allocation16_spill] sm:$0xff] }
 0xd0a   :  { %5338 = vmatprep.subr.bf16.mxu1 %v8532_v39  ;;  %v7592_v33 = vadd.f32 %v7522_v48, %v8568_v16  ;;  %v7600_v25 = vadd.f32 %v7522_v48, %v8570_v8  ;;  %v7608_v22 = vadd.f32 %v7506_v53, %v8573_v38  ;;  %v3466_v63 = vadd.f32 %v7506_v53, %v8581_v57 }
 0xd0c   :  { %5335 = vmatmul.mubr.msk.bf16.vlgmr.msra.gmra.mrb[36].mxu1 %vm434_vm0, %v8543_v51  ;;  %8574 = vst [vmem:[#allocation10_spill] sm:$0xff] %v7608_v22  ;;  %v8610_v22 = vld [vmem:[#allocation70_spill] sm:$0xff] }
 0xd0d   :  { %5339 = vmatpush3.bf16.msra.mxu1 %v5652_v13  ;;  %5342 = vmatprep.mubr.msk.bf16.mxu1 %vm5747_vm2, %v8532_v39  ;;  %v8564_v13 = vld [vmem:[#allocation46_spill] sm:$0xff] }
 0xd0e   :  { %5340 = vmatprep.subr.bf16.mxu1 %v8532_v39  ;;  %v7576_v51 = vadd.f32 %v7522_v48, %v8564_v13 }
 0xd11   :  { %5341 = vmatpush3.bf16.msra.mxu1 %v5653_v52  ;;  %v8565_v52 = vld [vmem:[#allocation62_spill] sm:$0xff] }
 0xd12   :  { %5346 = vmatprep.subr.bf16.mxu1 %v8532_v39 }
 0xd14   :  { %5343 = vmatmul.mubr.msk.bf16.vlgmr.msra.gmra.mrb[40].mxu1 %vm434_vm0, %v7435_v46  ;;  %v7513_v46 = vsel %vm434_vm0, %v5454_v60, %v3425_v5  ;;  %v8551_v60 = vld [vmem:[#allocation33_spill] sm:$0xff]  ;;  %v7584_v5 = vadd.f32 %v7522_v48, %v8566_v45  ;;  %v3499_v45 = vsel %vm1132_vm3, %v3435_v30, -inf }
 0xd15   :  { %5362 = vmatprep.mubr.msk.bf16.mxu1 %vm5747_vm2, %v8532_v39  ;;  %v7532_v10 = vadd.f32 %v7503_v37, %v8551_v60  ;;  %v3437_v29 = vadd.f32 %v7513_v46, %v8556_v4  ;;  %v7554_v9 = vadd.f32 %v7513_v46, %v8557_v32  ;;  %v7572_v15 = vadd.f32 %v7513_v46, %v8563_v40  ;;  %v8571_v60 = vld [vmem:[#allocation86_spill] sm:$0xff]  ;;  %v8577_v32 = vld [vmem:[#allocation71_spill] sm:$0xff]  ;;  %v8595_v39 = vld [vmem:[#allocation45_spill] sm:$0xff] }
 0xd16   :  { %v7580_v36 = vadd.f32 %v7513_v46, %v8565_v52  ;;  %v7588_v42 = vadd.f32 %v7513_v46, %v8567_v20  ;;  %v7596_v3 = vadd.f32 %v7513_v46, %v8569_v12  ;;  %v7604_v2 = vadd.f32 %v7513_v46, %v8571_v60  ;;  %v8582_v40 = vld [vmem:[#allocation19_spill] sm:$0xff]  ;;  %v8583_v20 = vld [vmem:[#allocation29_spill] sm:$0xff]  ;;  %v8585_v60 = vld [vmem:[#allocation18_spill] sm:$0xff] }
 0xd17   :  { %v7612_v4 = vadd.f32 %v7503_v37, %v8575_v58  ;;  %v7616_v56 = vadd.f32 %v7522_v48, %v8577_v32  ;;  %v7620_v44 = vadd.f32 %v7513_v46, %v8579_v17  ;;  %v3467_v13 = vadd.f32 %v7503_v37, %v8582_v40  ;;  %v8584_v12 = vld [vmem:[#allocation43_spill] sm:$0xff]  ;;  %v8586_v58 = vld [vmem:[#allocation22_spill] sm:$0xff]  ;;  %v8589_v40 = vld [vmem:[#allocation28_spill] sm:$0xff] }
 0xd18   :  { %8572 = vst [vmem:[#allocation6_spill] sm:$0xff] %v7604_v2  ;;  %v3498_v52 = vsel %vm1132_vm3, %v3434_v26, -inf  ;;  %v7630_v16 = vadd.f32 %v7522_v48, %v8583_v20  ;;  %v7634_v8 = vadd.f32 %v7513_v46, %v8584_v12  ;;  %v3470_v38 = vadd.f32 %v7506_v53, %v8585_v60  ;;  %v8587_v17 = vld [vmem:[#allocation35_spill] sm:$0xff]  ;;  %v8588_v26 = vld [vmem:[#allocation50_spill] sm:$0xff] }
 0xd19   :  { %8576 = vst [vmem:[#allocation88_spill] sm:$0xff] %v7612_v4  ;;  %8578 = vst [vmem:[#allocation84_spill] sm:$0xff] %v7616_v56  ;;  %v3471_v32 = vadd.f32 %v7503_v37, %v8586_v58  ;;  %v7642_v57 = vadd.f32 %v7522_v48, %v8587_v17  ;;  %v7646_v30 = vadd.f32 %v7513_v46, %v8588_v26  ;;  %v3501_v12 = vsel %vm1132_vm3, %v3436_v59, -inf  ;;  %v8592_v17 = vld [vmem:[#allocation58_spill] sm:$0xff] }
 0xd1a   :  { %8580 = vst [vmem:[#allocation89_spill] sm:$0xff] %v7620_v44  ;;  %v7650_v20 = vadd.f32 %v7506_v53, %v8589_v40  ;;  %v7655_v60 = vadd.f32 %v7503_v37, %v8590_v18  ;;  %v7659_v58 = vadd.f32 %v7522_v48, %v8591_v50  ;;  %v7663_v24 = vadd.f32 %v7513_v46, %v8592_v17  ;;  %v8594_v40 = vld [vmem:[#allocation37_spill] sm:$0xff] }
 0xd1b   :  { %v3500_v26 = vmax.f32 %v3498_v52, %v3499_v45  ;;  %v7671_v59 = vadd.f32 %v7503_v37, %v8594_v40  ;;  %v3511_v18 = vsel %vm1132_vm3, %v3438_v43, -inf  ;;  %v7677_v50 = vadd.f32 %v7522_v48, %v8595_v39  ;;  %v8597_v52 = vld [vmem:[#allocation36_spill] sm:$0xff]  ;;  %v8599_v43 = vld [vmem:[#allocation53_spill] sm:$0xff] }
 0xd1c   :  { %v7681_v17 = vadd.f32 %v7513_v46, %v8596_v62  ;;  %v7685_v55 = vadd.f32 %v7506_v53, %v8597_v52  ;;  %v7689_v40 = vadd.f32 %v7503_v37, %v8598_v54  ;;  %v7693_v23 = vadd.f32 %v7522_v48, %v8599_v43  ;;  %v8604_v43 = vld [vmem:[#allocation61_spill] sm:$0xff] }
 0xd1d   :  { %v3502_v45 = vmax.f32 %v3500_v26, %v3501_v12  ;;  %v7697_v39 = vadd.f32 %v7513_v46, %v8600_v61  ;;  %v3514_v62 = vsel %vm1132_vm3, %v3440_v1, -inf  ;;  %v7702_v44 = vadd.f32 %v7506_v53, %v8602_v7  ;;  %v8603_v26 = vld [vmem:[#allocation47_spill] sm:$0xff]  ;;  %v8605_v61 = vld [vmem:[#allocation85_spill] sm:$0xff] }
 0xd1e   :  { %v3513_v52 = vmax.f32 %v3511_v18, %v3512_v27  ;;  %v3524_v12 = vsel %vm1132_vm3, %v3442_v21, -inf  ;;  %v3525_v54 = vsel %vm1132_vm3, %v3443_v34, -inf  ;;  %v7708_v2 = vadd.f32 %v7503_v37, %v8603_v26 }
 0xd1f   :  { %8601 = vst [vmem:[#allocation12_spill] sm:$0xff] %v7697_v39  ;;  %v7712_v56 = vadd.f32 %v7522_v48, %v8604_v43  ;;  %v7716_v1 = vadd.f32 %v7513_v46, %v8605_v61  ;;  %v3503_v7 = vsel %vm1132_vm3, %v3437_v29, -inf  ;;  %v8607_v39 = vld [vmem:[#allocation60_spill] sm:$0xff]  ;;  %v3527_v18 = vsel %vm1132_vm3, %v3444_v19, -inf  ;;  %v8608_v43 = vld [vmem:[#allocation67_spill] sm:$0xff] }
 0xd20   :  { %v7721_v27 = vadd.f32 %v7506_v53, %v8607_v39  ;;  %v3504_v21 = vmax.f32 %v3502_v45, %v3503_v7  ;;  %v3515_v34 = vmax.f32 %v3513_v52, %v3514_v62  ;;  %v7726_v26 = vadd.f32 %v7503_v37, %v8511_v31  ;;  %v8609_v61 = vld [vmem:[#allocation79_spill] sm:$0xff]  ;;  %v8612_v7 = vld [vmem:[#allocation81_spill] sm:$0xff] }
 0xd21   :  { %8606 = vst [vmem:[#allocation83_spill] sm:$0xff] %v7716_v1  ;;  %v7730_v4 = vadd.f32 %v7522_v48, %v8608_v43  ;;  %v7734_v1 = vadd.f32 %v7513_v46, %v8609_v61  ;;  %v3526_v29 = vmax.f32 %v3524_v12, %v3525_v54  ;;  %v7738_v39 = vadd.f32 %v7506_v53, %v8610_v22  ;;  %v8611_v45 = vld [vmem:[#allocation63_spill] sm:$0xff] }
 0xd22   :  { %v7742_v19 = vadd.f32 %v7503_v37, %v8611_v45  ;;  %v3537_v31 = vsel %vm1132_vm3, %v7528_v0, -inf  ;;  %v3538_v62 = vsel %vm1132_vm3, %v7532_v10, -inf  ;;  %v7750_v52 = vadd.f32 %v7522_v48, %v8516_v28 }
 0xd23   :  { %v7754_v12 = vadd.f32 %v7513_v46, %v8612_v7  ;;  %v3516_v53 = vsel %vm1132_vm3, %v7554_v9, -inf  ;;  %v3528_v22 = vmax.f32 %v3526_v29, %v3527_v18  ;;  %v3505_v37 = vrot.slane %v3504_v21, 4 }
 0xd24   :  { %v3517_v54 = vmax.f32 %v3515_v34, %v3516_v53  ;;  %v3529_v0 = vsel %vm1132_vm3, %v7572_v15, -inf  ;;  %v3540_v10 = vsel %vm1132_vm3, %v7576_v51, -inf  ;;  %v3539_v43 = vmax.f32 %v3537_v31, %v3538_v62 }
 0xd25   :  { %v3542_v28 = vsel %vm1132_vm3, %v7580_v36, -inf  ;;  %v3550_v46 = vsel %vm1132_vm3, %v7536_v35, -inf  ;;  %v3551_v48 = vsel %vm1132_vm3, %v7540_v14, -inf  ;;  %v3553_v9 = vsel %vm1132_vm3, %v7584_v5, -inf }
 0xd26   :  { %v3555_v34 = vsel %vm1132_vm3, %v7588_v42, -inf  ;;  %v3602_v15 = vsel %vm1132_vm3, %v3466_v63, -inf  ;;  %v3603_v51 = vsel %vm1132_vm3, %v3467_v13, -inf  ;;  %v3530_v18 = vmax.f32 %v3528_v22, %v3529_v0 }
 0xd27   :  { %v3541_v61 = vmax.f32 %v3539_v43, %v3540_v10  ;;  %v3615_v36 = vsel %vm1132_vm3, %v3470_v38, -inf  ;;  %v3616_v29 = vsel %vm1132_vm3, %v3471_v32, -inf  ;;  %v3506_v35 = vmax.f32 %v3504_v21, %v3505_v37 }
 0xd28   :  { %v3518_v45 = vrot.slane %v3517_v54, 4  ;;  %v3552_v31 = vmax.f32 %v3550_v46, %v3551_v48  ;;  %v3605_v14 = vsel %vm1132_vm3, %v7630_v16, -inf  ;;  %v3604_v5 = vmax.f32 %v3602_v15, %v3603_v51 }
 0xd29   :  { %v3618_v42 = vsel %vm1132_vm3, %v7642_v57, -inf  ;;  %v3628_v63 = vsel %vm1132_vm3, %v7650_v20, -inf  ;;  %v3629_v13 = vsel %vm1132_vm3, %v7655_v60, -inf  ;;  %v3563_v38 = vsel %vm1132_vm3, %v7544_v41, -inf }
 0xd2a   :  { %v3564_v32 = vsel %vm1132_vm3, %v7548_v49, -inf  ;;  %v3566_v21 = vsel %vm1132_vm3, %v7592_v33, -inf  ;;  %v3617_v16 = vmax.f32 %v3615_v36, %v3616_v29  ;;  %v3531_v62 = vrot.slane %v3530_v18, 4 }
 0xd2b   :  { %v3543_v7 = vmax.f32 %v3541_v61, %v3542_v28  ;;  %v3606_v53 = vmax.f32 %v3604_v5, %v3605_v14  ;;  %v3631_v57 = vsel %vm1132_vm3, %v7659_v58, -inf  ;;  %v3519_v20 = vmax.f32 %v3517_v54, %v3518_v45 }
 0xd2c   :  { %v3554_v22 = vmax.f32 %v3552_v31, %v3553_v9  ;;  %v3619_v37 = vmax.f32 %v3617_v16, %v3618_v42  ;;  %v3630_v60 = vmax.f32 %v3628_v63, %v3629_v13  ;;  %v3507_v0 = vrot.slane %v3506_v35, 2 }
 0xd2d   :  { %v3565_v10 = vmax.f32 %v3563_v38, %v3564_v32  ;;  %v3568_v41 = vsel %vm1132_vm3, %v7596_v3, -inf  ;;  %v3576_v49 = vsel %vm1132_vm3, %v7558_v11, -inf  ;;  %v3607_v33 = vsel %vm1132_vm3, %v7634_v8, -inf }
 0xd2e   :  { %v3632_v43 = vmax.f32 %v3630_v60, %v3631_v57  ;;  %v3641_v28 = vsel %vm1132_vm3, %v7667_v47, -inf  ;;  %v3642_v58 = vsel %vm1132_vm3, %v7671_v59, -inf  ;;  %v7802_v54 = vmax.f32 %v3530_v18, %v3531_v62  ;;  %v8616_v60 = vld [vmem:[#allocation12_spill] sm:$0xff] }
 0xd2f   :  { %v3544_v46 = vrot.slane %v3543_v7, 4  ;;  %v3608_v48 = vmax.f32 %v3606_v53, %v3607_v33  ;;  %v3620_v3 = vsel %vm1132_vm3, %v7646_v30, -inf  ;;  %v3520_v9 = vrot.slane %v3519_v20, 2  ;;  %v8613_v53 = vld [vmem:[#allocation10_spill] sm:$0xff] }
 0xd30   :  { %v7806_v15 = vmax.f32 %v3554_v22, %v3555_v34  ;;  %v3621_v11 = vmax.f32 %v3619_v37, %v3620_v3  ;;  %v3644_v8 = vsel %vm1132_vm3, %v7677_v50, -inf  ;;  %v3633_v47 = vsel %vm1132_vm3, %v7663_v24, -inf  ;;  %v8615_v22 = vld [vmem:[#allocation84_spill] sm:$0xff] }
 0xd31   :  { %v3643_v51 = vmax.f32 %v3641_v28, %v3642_v58  ;;  %v3654_v59 = vsel %vm1132_vm3, %v7685_v55, -inf  ;;  %v3655_v18 = vsel %vm1132_vm3, %v7689_v40, -inf  ;;  %v3567_v61 = vmax.f32 %v3565_v10, %v3566_v21  ;;  %v8617_v28 = vld [vmem:[#allocation6_spill] sm:$0xff] }
 0xd32   :  { %v3577_v30 = vsel %vm1132_vm3, %v7562_v6, -inf  ;;  %v3579_v34 = vsel %vm1132_vm3, %v7600_v25, -inf  ;;  %v3634_v36 = vmax.f32 %v3632_v43, %v3633_v47  ;;  %v7820_v29 = vmax.f32 %v3506_v35, %v3507_v0 }
 0xd33   :  { %v3609_v50 = vrot.slane %v3608_v48, 4  ;;  %v3645_v45 = vmax.f32 %v3643_v51, %v3644_v8  ;;  %v3657_v24 = vsel %vm1132_vm3, %v7693_v23, -inf  ;;  %v3533_v55 = vrot.slane %v7802_v54, 2 }
 0xd34   :  { %v7825_v31 = vmax.f32 %v3543_v7, %v3544_v46  ;;  %v3622_v40 = vrot.slane %v3621_v11, 4  ;;  %v3656_v14 = vmax.f32 %v3654_v59, %v3655_v18  ;;  %v7827_v5 = vmax.f32 %v3519_v20, %v3520_v9  ;;  %v8614_v20 = vld [vmem:[#allocation88_spill] sm:$0xff] }
 0xd35   :  { %v3557_v6 = vrot.slane %v7806_v15, 4  ;;  %v3667_v25 = vsel %vm1132_vm3, %v7702_v44, -inf  ;;  %v3668_v35 = vsel %vm1132_vm3, %v7708_v2, -inf  ;;  %v7834_v42 = vmax.f32 %v3567_v61, %v3568_v41 }
 0xd36   :  { %v3635_v63 = vrot.slane %v3634_v36, 4  ;;  %v3646_v23 = vsel %vm1132_vm3, %v7681_v17, -inf  ;;  %v3658_v13 = vmax.f32 %v3656_v14, %v3657_v24  ;;  %v3578_v38 = vmax.f32 %v3576_v49, %v3577_v30 }
 0xd37   :  { %v3610_v32 = vmax.f32 %v3608_v48, %v3609_v50  ;;  %v3647_v21 = vmax.f32 %v3645_v45, %v3646_v23  ;;  %v3670_v16 = vsel %vm1132_vm3, %v7712_v56, -inf  ;;  %v3623_v62 = vmax.f32 %v3621_v11, %v3622_v40  ;;  %v8618_v11 = vld [vmem:[#allocation83_spill] sm:$0xff] }
 0xd38   :  { %v3669_v7 = vmax.f32 %v3667_v25, %v3668_v35  ;;  %v3680_v44 = vsel %vm1132_vm3, %v7721_v27, -inf  ;;  %v3681_v2 = vsel %vm1132_vm3, %v7726_v26, -inf  ;;  %v3589_v57 = vsel %vm1132_vm3, %v8613_v53, -inf }
 0xd39   :  { %v3590_v17 = vsel %vm1132_vm3, %v8614_v20, -inf  ;;  %v3592_v37 = vsel %vm1132_vm3, %v8615_v22, -inf  ;;  %v3659_v56 = vsel %vm1132_vm3, %v8616_v60, -inf  ;;  %v3636_v0 = vmax.f32 %v3634_v36, %v3635_v63 }
 0xd3a   :  { %v3660_v10 = vmax.f32 %v3658_v13, %v3659_v56  ;;  %v3671_v41 = vmax.f32 %v3669_v7, %v3670_v16  ;;  %v3683_v27 = vsel %vm1132_vm3, %v7730_v4, -inf  ;;  %v3648_v49 = vrot.slane %v3647_v21, 4 }
 0xd3b   :  { %v3682_v26 = vmax.f32 %v3680_v44, %v3681_v2  ;;  %v3693_v33 = vsel %vm1132_vm3, %v7738_v39, -inf  ;;  %v3694_v43 = vsel %vm1132_vm3, %v7742_v19, -inf  ;;  %v3581_v58 = vsel %vm1132_vm3, %v8617_v28, -inf }
 0xd3c   :  { %v3591_v46 = vmax.f32 %v3589_v57, %v3590_v17  ;;  %v3611_v48 = vrot.slane %v3610_v32, 2  ;;  %v3624_v3 = vrot.slane %v3623_v62, 2  ;;  %v3580_v9 = vmax.f32 %v3578_v38, %v3579_v34 }
 0xd3d   :  { %v3672_v8 = vsel %vm1132_vm3, %v8618_v11, -inf  ;;  %v3684_v47 = vmax.f32 %v3682_v26, %v3683_v27  ;;  %v3696_v4 = vsel %vm1132_vm3, %v7750_v52, -inf  ;;  %v3661_v59 = vrot.slane %v3660_v10, 4  ;;  %v8619_v52 = vld [vmem:[#allocation89_spill] sm:$0xff] }
 0xd3e   :  { %v3593_v51 = vmax.f32 %v3591_v46, %v3592_v37  ;;  %v3673_v39 = vmax.f32 %v3671_v41, %v3672_v8  ;;  %v3695_v18 = vmax.f32 %v3693_v33, %v3694_v43  ;;  %v3509_v19 = vrot.slane %v7820_v29, 1 }
 0xd3f   :  { %v3546_v61 = vrot.slane %v7825_v31, 2  ;;  %v3637_v30 = vrot.slane %v3636_v0, 2  ;;  %v3649_v36 = vmax.f32 %v3647_v21, %v3648_v49  ;;  %v3612_v50 = vmax.f32 %v3610_v32, %v3611_v48 }
 0xd40   :  { %v3625_v45 = vmax.f32 %v3623_v62, %v3624_v3  ;;  %v3685_v34 = vsel %vm1132_vm3, %v7734_v1, -inf  ;;  %v3697_v24 = vmax.f32 %v3695_v18, %v3696_v4  ;;  %v3558_v40 = vmax.f32 %v7806_v15, %v3557_v6 }
 0xd41   :  { %v3582_v14 = vmax.f32 %v3580_v9, %v3581_v58  ;;  %v3594_v25 = vsel %vm1132_vm3, %v8619_v52, -inf  ;;  %v3686_v35 = vmax.f32 %v3684_v47, %v3685_v34  ;;  %v3570_v63 = vrot.slane %v7834_v42, 4 }
 0xd42   :  { %v3595_v23 = vmax.f32 %v3593_v51, %v3594_v25  ;;  %v3662_v13 = vmax.f32 %v3660_v10, %v3661_v59  ;;  %v3674_v38 = vrot.slane %v3673_v39, 4  ;;  %v3534_v21 = vmax.f32 %v7802_v54, %v3533_v55 }
 0xd43   :  { %v3638_v32 = vmax.f32 %v3636_v0, %v3637_v30  ;;  %v3650_v16 = vrot.slane %v3649_v36, 2  ;;  %v3698_v1 = vsel %vm1132_vm3, %v7754_v12, -inf  ;;  %v3522_v62 = vrot.slane %v7827_v5, 1 }
 0xd44   :  { %v3613_v15 = vrot.slane %v3612_v50, 1  ;;  %v3626_v6 = vrot.slane %v3625_v45, 1  ;;  %v3699_v7 = vmax.f32 %v3697_v24, %v3698_v1  ;;  %v3547_v44 = vmax.f32 %v7825_v31, %v3546_v61 }
 0xd45   :  { %v3559_v2 = vrot.slane %v3558_v40, 2  ;;  %v3583_v53 = vrot.slane %v3582_v14, 4  ;;  %v3687_v57 = vrot.slane %v3686_v35, 4  ;;  %v3571_v20 = vmax.f32 %v7834_v42, %v3570_v63 }
 0xd46   :  { %v3596_v17 = vrot.slane %v3595_v23, 4  ;;  %v3663_v22 = vrot.slane %v3662_v13, 2  ;;  %v3675_v54 = vmax.f32 %v3673_v39, %v3674_v38  ;;  %v3510_v55 = vmax.f32 %v7820_v29, %v3509_v19 }
 0xd47   :  { %v3535_v37 = vrot.slane %v3534_v21, 1  ;;  %v3639_v60 = vrot.slane %v3638_v32, 1  ;;  %v3651_v12 = vmax.f32 %v3649_v36, %v3650_v16  ;;  %v3523_v56 = vmax.f32 %v7827_v5, %v3522_v62 }
 0xd48   :  { %v3614_v0 = vmax.f32 %v3612_v50, %v3613_v15  ;;  %v3627_v10 = vmax.f32 %v3625_v45, %v3626_v6  ;;  %v3700_v41 = vrot.slane %v3699_v7, 4  ;;  %v3548_v27 = vrot.slane %v3547_v44, 1 }
 0xd49   :  { %v3560_v31 = vmax.f32 %v3558_v40, %v3559_v2  ;;  %v3584_v49 = vmax.f32 %v3582_v14, %v3583_v53  ;;  %v3688_v26 = vmax.f32 %v3686_v35, %v3687_v57  ;;  %v3572_v33 = vrot.slane %v3571_v20, 2 }
 0xd4a   :  { %v3597_v43 = vmax.f32 %v3595_v23, %v3596_v17  ;;  %v3664_v42 = vmax.f32 %v3662_v13, %v3663_v22  ;;  %v3676_v28 = vrot.slane %v3675_v54, 2  ;;  %v3536_v58 = vmax.f32 %v3534_v21, %v3535_v37 }
 0xd4b   :  { %v3640_v46 = vmax.f32 %v3638_v32, %v3639_v60  ;;  %v3652_v48 = vrot.slane %v3651_v12, 1  ;;  %v3740_v29 = vsub.f32 0.0, %v3510_v55  ;;  %v3701_v3 = vmax.f32 %v3699_v7, %v3700_v41 }
 0xd4c   :  { %v3741_v9 = vsub.f32 0.0, %v3523_v56  ;;  %v3748_v11 = vsub.f32 0.0, %v3614_v0  ;;  %v3749_v8 = vsub.f32 0.0, %v3627_v10  ;;  %v3549_v5 = vmax.f32 %v3547_v44, %v3548_v27 }
 0xd4d   :  { %v3561_v47 = vrot.slane %v3560_v31, 1  ;;  %v3585_v4 = vrot.slane %v3584_v49, 2  ;;  %v3689_v51 = vrot.slane %v3688_v26, 2  ;;  %v3573_v59 = vmax.f32 %v3571_v20, %v3572_v33 }
 0xd4e   :  { %v3598_v39 = vrot.slane %v3597_v43, 2  ;;  %v3665_v18 = vrot.slane %v3664_v42, 1  ;;  %v3677_v19 = vmax.f32 %v3675_v54, %v3676_v28  ;;  %v3742_v61 = vsub.f32 0.0, %v3536_v58 }
 0xd4f   :  { %v3750_v30 = vsub.f32 0.0, %v3640_v46  ;;  %v3722_v36 = vsel %vm1367_vm4, %v3523_v56, %v3510_v55  ;;  %v3729_v50 = vsel %vm1367_vm4, %v3627_v10, %v3614_v0  ;;  %v3653_v45 = vmax.f32 %v3651_v12, %v3652_v48 }
 0xd50   :  { %v3702_v34 = vrot.slane %v3701_v3, 2  ;;  %v3772_v24 = vsel %vm1367_vm4, %v3741_v9, %v3740_v29  ;;  %v3779_v40 = vsel %vm1367_vm4, %v3749_v8, %v3748_v11  ;;  %v3586_v14 = vmax.f32 %v3584_v49, %v3585_v4  ;;  %v8624_v9 = vld [vmem:[#allocation20_spill] sm:$0xff] }
 0xd51   :  { %v3690_v52 = vmax.f32 %v3688_v26, %v3689_v51  ;;  %v3574_v25 = vrot.slane %v3573_v59, 1  ;;  %v3678_v35 = vrot.slane %v3677_v19, 1  ;;  %v3723_v63 = vsel %vm1369_vm5, %v3536_v58, %v3722_v36 }
 0xd52   :  { %v3730_v23 = vsel %vm1369_vm5, %v3640_v46, %v3729_v50  ;;  %v3562_v13 = vmax.f32 %v3560_v31, %v3561_v47  ;;  %v3666_v38 = vmax.f32 %v3664_v42, %v3665_v18  ;;  %v3773_v21 = vsel %vm1369_vm5, %v3742_v61, %v3772_v24  ;;  %v8625_v18 = vld [vmem:[#allocation24_spill] sm:$0xff] }
 0xd53   :  { %v3780_v32 = vsel %vm1369_vm5, %v3750_v30, %v3779_v40  ;;  %v3599_v16 = vmax.f32 %v3597_v43, %v3598_v39  ;;  %v3703_v1 = vmax.f32 %v3701_v3, %v3702_v34  ;;  %v3743_v62 = vsub.f32 0.0, %v3549_v5 }
 0xd54   :  { %v3751_v15 = vsub.f32 0.0, %v3653_v45  ;;  %v3587_v6 = vrot.slane %v3586_v14, 1  ;;  %v3691_v7 = vrot.slane %v3690_v52, 1  ;;  %v3724_v44 = vsel %vm1371_vm6, %v3549_v5, %v3723_v63 }
 0xd55   :  { %v3731_v2 = vsel %vm1371_vm6, %v3653_v45, %v3730_v23  ;;  %v3575_v53 = vmax.f32 %v3573_v59, %v3574_v25  ;;  %v3679_v57 = vmax.f32 %v3677_v19, %v3678_v35  ;;  %v3774_v20 = vsel %vm1371_vm6, %v3743_v62, %v3773_v21  ;;  %v5654_v21 = vld [vmem:[%s8153_s12 + $0x80] sm:$0xff]  }
 0xd56   :  { %v3781_v17 = vsel %vm1371_vm6, %v3751_v15, %v3780_v32  ;;  %v3744_v22 = vsub.f32 0.0, %v3562_v13  ;;  %v3752_v54 = vsub.f32 0.0, %v3666_v38  ;;  %v3600_v55 = vrot.slane %v3599_v16, 1  ;;  %v5655_v32 = vld [vmem:[%s8154_s13 + $0x80] sm:$0xff]   ;;  %5347 = vmatpush3.bf16.msra.mxu1 %v5654_v21  ;;  %v5658_v15 = vld [vmem:[%s8153_s12 + $0x90] sm:$0xff]  }
 0xd57   :  { %v3704_v37 = vrot.slane %v3703_v1, 1  ;;  %v3725_v60 = vsel %vm1373_vm7, %v3562_v13, %v3724_v44  ;;  %v3732_v12 = vsel %vm1373_vm7, %v3666_v38, %v3731_v2  ;;  %v3588_v56 = vmax.f32 %v3586_v14, %v3587_v6  ;;  %5367 = vmatpush3.bf16.msra.mxu0 %v5655_v32  ;;  %v5659_v6 = vld [vmem:[%s8154_s13 + $0x90] sm:$0xff]   ;;  %v5660_v2 = vld [vmem:[%s8153_s12 + $0x98] sm:$0xff]  }
 0xd58   :  { %v3692_v0 = vmax.f32 %v3690_v52, %v3691_v7  ;;  %v3775_v10 = vsel %vm1373_vm7, %v3744_v22, %v3774_v20  ;;  %v3782_v41 = vsel %vm1373_vm7, %v3752_v54, %v3781_v17  ;;  %v3745_v27 = vsub.f32 0.0, %v3575_v53  ;;  %v7957_v7 = vld [vmem:[%s8147_s6] sm:$0x3] }
 0xd59   :  { %v3753_v31 = vsub.f32 0.0, %v3679_v57  ;;  %vm8620_vm5 = vcmask 1045509   ;;  %v3601_v33 = vmax.f32 %v3599_v16, %v3600_v55  ;;  %v3705_v43 = vmax.f32 %v3703_v1, %v3704_v37  ;;  %v5656_v16 = vld [vmem:[%s8153_s12 + $0x88] sm:$0xff]   ;;  %v7970_v17 = vld [vmem:[%s8146_s5] sm:$0x1] }
 0xd5a   :  { %v3726_v49 = vsel %vm8620_vm5, %v3575_v53, %v3725_v60  ;;  %vm8621_vm8 = vmmov %vm8620_vm5  ;;  %v3746_v58 = vsub.f32 0.0, %v3588_v56  ;;  %v3754_v46 = vsub.f32 0.0, %v3692_v0  ;;  %vm8626_vm7 = vcmask 1047559   ;;  %v5657_v1 = vld [vmem:[%s8154_s13 + $0x88] sm:$0xff]   ;;  %v5661_v53 = vld [vmem:[%s8154_s13 + $0x98] sm:$0xff]  }
 0xd5b   :  { %v3733_v26 = vsel %vm8621_vm8, %v3679_v57, %v3732_v12  ;;  %vm8622_vm6 = vmmov %vm8620_vm5  ;;  %v3727_v29 = vsel %vm1377_vm9, %v3588_v56, %v3726_v49  ;;  %v3747_v51 = vsub.f32 0.0, %v3601_v33  ;;  %v3755_v59 = vsub.f32 0.0, %v3705_v43  ;;  %v5662_v22 = vld [vmem:[%s8153_s12 + $0xa0] sm:$0xff]   ;;  %v5665_v49 = vld [vmem:[%s8154_s13 + $0xa8] sm:$0xff]  }
 0xd5c   :  { %v3776_v42 = vsel %vm8622_vm6, %v3745_v27, %v3775_v10  ;;  %vm8623_vm14 = vmmov %vm8620_vm5  ;;  %v3734_v3 = vsel %vm1377_vm9, %v3692_v0, %v3733_v26  ;;  %v3728_v30 = vsel %vm8626_vm7, %v3601_v33, %v3727_v29  ;;  %v8632_v62 = vmov 0.0   ;;  %v5663_v54 = vld [vmem:[%s8154_s13 + $0xa0] sm:$0xff]  }
 0xd5d   :  { %v3783_v28 = vsel %vm8623_vm14, %v3753_v31, %v3782_v41  ;;  %v3777_v5 = vsel %vm1377_vm9, %v3746_v58, %v3776_v42  ;;  %vm8627_vm11 = vmmov %vm8626_vm7  ;;  %v3738_v40 = vsel %vm1349_vm13, %v3728_v30, 0.0  ;;  %5348 = vmatprep.subr.bf16.mxu1 %v8632_v62  ;;  %5368 = vmatprep.subr.bf16.mxu0 %v8632_v62  ;;  %v4228_v44 = vmax.f32 %v7957_v7, 1.0  ;;  %v5664_v31 = vld [vmem:[%s8153_s12 + $0xa8] sm:$0xff]   ;;  %v5666_v58 = vld [vmem:[%s8153_s12 + $0xb0] sm:$0xff]  }
 0xd5e   :  { %v3784_v47 = vsel %vm1377_vm9, %v3754_v46, %v3783_v28  ;;  %v3735_v36 = vsel %vm8627_vm11, %v3705_v43, %v3734_v3  ;;  %vm8628_vm12 = vmmov %vm8626_vm7  ;;  %5349 = vmatpush3.bf16.msra.mxu1 %v5656_v16  ;;  %5369 = vmatpush3.bf16.msra.mxu0 %v5657_v1  ;;  %v4282_v56 = vunpack.c.l.bf16 %v7970_v17  ;;  %v5667_v46 = vld [vmem:[%s8154_s13 + $0xb0] sm:$0xff]   ;;  %v5668_v3 = vld [vmem:[%s8153_s12 + $0xb8] sm:$0xff]   ;;  %vm4229_vm6 = vcmp.gt.f32.partialorder %v7957_v7, 0.0 }
 0xd5f   :  { %v3778_v50 = vsel %vm8628_vm12, %v3747_v51, %v3777_v5  ;;  %vm8629_vm5 = vmmov %vm8626_vm7  ;;  %v3739_v52 = vsel %vm1350_vm15, %v3735_v36, 0.0  ;;  %5350 = vmatprep.subr.bf16.mxu1 %v8632_v62  ;;  %5370 = vmatprep.subr.bf16.mxu0 %v8632_v62  ;;  %5707 = vrcp.f32 %v4228_v44  ;;  %v8633_v5 = vld [vmem:[#allocation11_spill] sm:$0xff]  ;;  %v8634_v30 = vld [vmem:[#allocation9_spill] sm:$0xff] }
 0xd60   :  { %v3785_v45 = vsel %vm8629_vm5, %v3755_v59, %v3784_v47  ;;  %v5564_v23 = vpack.i.bf16 %v3739_v52, %v3738_v40  ;;  %v4888_v28 = vadd.f32 -1.0, %v4282_v56  ;;  %v8635_v40 = vmov 0  }
 0xd61   :  { %v5559_v25 = vpack.i.bf16 %v3785_v45, %v3778_v50  ;;  %v4329_v14 = vsel %vm4229_vm6, 1, %v8635_v40 }
 0xd62   :  { %5351 = vmatpush3.bf16.msra.mxu1 %v5658_v15  ;;  %5371 = vmatpush3.bf16.msra.mxu0 %v5659_v6  ;;  %v4284_v29 = vmul.f32 3e+38, %v4888_v28 }
 0xd63   :  { %5352 = vmatprep.subr.bf16.mxu1 %v8632_v62  ;;  %5372 = vmatprep.subr.bf16.mxu0 %v8632_v62 }
 0xd64   :  { %v4288_v47 = vrot.slane %v4284_v29, %v8633_v5  ;;  %v4299_v36 = vrot.slane %v4284_v29, %v8634_v30  ;;  %v8641_v30 = vld [vmem:[#allocation77_spill] sm:$0xff] }
 0xd66   :  { %5353 = vmatpush3.bf16.msra.mxu1 %v5660_v2  ;;  %5373 = vmatpush3.bf16.msra.mxu0 %v5661_v53 }
 0xd67   :  { %5354 = vmatprep.subr.bf16.mxu1 %v8632_v62  ;;  %5374 = vmatprep.subr.bf16.mxu0 %v8632_v62 }
 0xd6a   :  { %5355 = vmatpush3.bf16.msra.mxu1 %v5662_v22  ;;  %5375 = vmatpush3.bf16.msra.mxu0 %v5663_v54  ;;  %v5673_v22 = vld [vmem:[%s8155_s14 + $0x98] sm:$0xff]   ;;  %v5674_v54 = vld [vmem:[%s8155_s14 + $0xa0] sm:$0xff]  }
 0xd6b   :  { %5356 = vmatprep.subr.bf16.mxu1 %v8632_v62  ;;  %5376 = vmatprep.subr.bf16.mxu0 %v8632_v62 }
 0xd6e   :  { %5357 = vmatpush3.bf16.msra.mxu1 %v5664_v31  ;;  %5377 = vmatpush3.bf16.msra.mxu0 %v5665_v49  ;;  %v8638_v49 = vld [vmem:[#allocation73_spill] sm:$0xff] }
 0xd6f   :  { %5358 = vmatprep.subr.bf16.mxu1 %v8632_v62  ;;  %5378 = vmatprep.subr.bf16.mxu0 %v8632_v62 }
 0xd72   :  { %5359 = vmatpush3.bf16.msra.mxu1 %v5666_v58  ;;  %5379 = vmatpush3.bf16.msra.mxu0 %v5667_v46 }
 0xd73   :  { %5360 = vmatprep.subr.bf16.mxu1 %v8632_v62  ;;  %5380 = vmatprep.subr.bf16.mxu0 %v8632_v62 }
 0xd76   :  { %5361 = vmatpush3.bf16.msra.mxu1 %v5668_v3 }
 0xd77   :  { %5386 = vmatprep.subr.bf16.mxu1 %v8632_v62 }
 0xddf   :  { %v3371_v48 = vpop.f32.mrb[36].mxu1 }
 0xde0   :  { %v7903_v11 = vmul.f32 %v3371_v48, %v8624_v9  ;;  %v5336_v8 = vpop.f32.mrb[37].mxu1  ;;  %v5708_v48 = vpop.eup %5707  ;;  %v5669_v9 = vld [vmem:[%s8154_s13 + $0xb8] sm:$0xff]  }
 0xde1   :  { %v3374_v4 = vpop.f32.mrb[38].mxu1  ;;  %5381 = vmatpush3.bf16.msra.mxu0 %v5669_v9 }
 0xde2   :  { %v3380_v39 = vmul.f32 %v7903_v11, %v7903_v11  ;;  %v7910_v19 = vmul.f32 %v3374_v4, %v8625_v18  ;;  %v5337_v61 = vpop.f32.mrb[39].mxu1  ;;  %5406 = vmatprep.subr.bf16.mxu0 %v8632_v62 }
 0xde4   :  { %v3381_v34 = vmul.f32 %v7910_v19, %v7910_v19  ;;  %3384 = vrot.lane.b32.xlu1 %v3380_v39, %s5748_s23 }
 0xde6   :  { %3386 = vrot.lane.b32.xlu0 %v3381_v34, %s5748_s23 }
 0xde7   :  { %v7924_v35 = vpop.f32.mrb[40].mxu1 }
 0xde8   :  { %5560 = vrot.lane.b32.xlu1 %v5559_v25, %s5749_s28  ;;  %v5344_v63 = vpop.f32.mrb[41].mxu1 }
 0xde9   :  { %v7927_v13 = vpop.f32.mrb[42].mxu1 }
 0xdea   :  { %5565 = vrot.lane.b32.xlu0 %v5564_v23, %s5748_s23  ;;  %v5345_v38 = vpop.f32.mrb[43].mxu1 }
 0xe56   :  { %v3385_v57 = vpop.permute.xlu1 %3384 }
 0xe57   :  { %v3390_v20 = vsub.f32 %v7903_v11, %v3385_v57  ;;  %v5670_v57 = vld [vmem:[%s8155_s14 + $0x80] sm:$0xff]  }
 0xe58   :  { %v3387_v55 = vpop.permute.xlu0 %3386 }
 0xe59   :  { %v3392_v37 = vmax.f32 %v3390_v20, 0.0  ;;  %v3391_v60 = vsub.f32 %v7910_v19, %v3387_v55  ;;  %v5675_v55 = vld [vmem:[%s8155_s14 + $0xa8] sm:$0xff]  }
 0xe5a   :  { %v5561_v12 = vpop.permute.xlu1 %5560 }
 0xe5b   :  { %v3394_v0 = vadd.f32 1e-05, %v3392_v37  ;;  %v3393_v10 = vmax.f32 %v3391_v60, 0.0  ;;  %v5563_v41 = vunpack.i.h.bf16 %v5561_v12  ;;  %v5562_v27 = vunpack.i.l.bf16 %v5561_v12  ;;  %v5676_v37 = vld [vmem:[%s8155_s14 + $0xb0] sm:$0xff]   ;;  %v5677_v60 = vld [vmem:[%s8155_s14 + $0xb8] sm:$0xff]  }
 0xe5c   :  { %v5566_v52 = vpop.permute.xlu0 %5565  ;;  %v8636_v12 = vld [vmem:[#allocation55_spill] sm:$0xff] }
 0xe5d   :  { %5709 = vrsqrt.f32 %v3394_v0  ;;  %v3395_v26 = vadd.f32 1e-05, %v3393_v10  ;;  %v3793_v33 = vsel %vm1350_vm15, %v5563_v41, 0.0  ;;  %v3792_v43 = vsel %vm1349_vm13, %v5562_v27, 0.0  ;;  %v8637_v41 = vld [vmem:[#allocation74_spill] sm:$0xff] }
 0xe5e   :  { %v5569_v42 = vpack.i.bf16 %v3793_v33, %v3792_v43  ;;  %vm3398_vm9 = vcmp.eq.f32.partialorder %v3394_v0, inf  ;;  %v3401_v18 = vand.u32 2147483648, %v3394_v0  ;;  %vm3400_vm15 = vcmp.eq.f32.partialorder %v3394_v0, 0.0 }
 0xe5f   :  { %5711 = vrsqrt.f32 %v3395_v26  ;;  %vm3405_vm13 = vcmp.eq.f32.partialorder %v3395_v26, inf  ;;  %v3408_v61 = vand.u32 2147483648, %v3395_v26  ;;  %vm3407_vm8 = vcmp.eq.f32.partialorder %v3395_v26, 0.0 }
 0xe60   :  { %5570 = vrot.lane.b32.xlu1 %v5569_v42, %s5750_s4  ;;  %v5568_v63 = vunpack.i.h.bf16 %v5566_v52  ;;  %v5567_v23 = vunpack.i.l.bf16 %v5566_v52  ;;  %v3886_v56 = vadd.f32 %v7924_v35, %v8636_v12  ;;  %v3887_v27 = vadd.f32 %v7927_v13, %v8637_v41 }
 0xe62   :  { %v3819_v16 = vsel %vm434_vm0, %v7910_v19, %v5568_v63  ;;  %v3818_v1 = vsel %vm434_vm0, %v7903_v11, %v5567_v23  ;;  %v5671_v11 = vld [vmem:[%s8155_s14 + $0x88] sm:$0xff]   ;;  %v5672_v19 = vld [vmem:[%s8155_s14 + $0x90] sm:$0xff]  }
 0xe64   :  { %4278 = vperm.xlu1 %5498, %v5708_v48   ;;  %v8639_v48 = vld [vmem:[#allocation76_spill] sm:$0xff] }
 0xe67   :  { %v5710_v8 = vpop.eup %5709 }
 0xe68   :  { %v3397_v4 = vmul.f32 %v5710_v8, %v3394_v0  ;;  %4294 = vbcast.lane.b32.xlu1 %v4288_v47, 264 }
 0xe69   :  { %v5712_v51 = vpop.eup %5711 }
 0xe6a   :  { %v3399_v59 = vsel %vm3398_vm9, %v3394_v0, %v3397_v4  ;;  %v3404_v39 = vmul.f32 %v5712_v51, %v3395_v26  ;;  %v8640_v51 = vld [vmem:[#allocation75_spill] sm:$0xff] }
 0xe6b   :  { %v3402_v45 = vsel %vm3400_vm15, %v3401_v18, %v3399_v59 }
 0xe6c   :  { %v3406_v50 = vsel %vm3405_vm13, %v3395_v26, %v3404_v39  ;;  %4305 = vbcast.lane.b32.xlu1 %v4299_v36, 264  ;;  %v4886_v39 = vld [vmem:[%s8156_s15 + $0x2] ss:$0 sm:$0xff] }
 0xe6d   :  { %v3409_v34 = vsel %vm3407_vm8, %v3408_v61, %v3406_v50 }
 0xe6e   :  { %v5574_v24 = vpack.i.bf16 %v3409_v34, %v3402_v45 }
 0xe70   :  { %5575 = vrot.lane.b32.xlu0 %v5574_v24, %s5750_s4 }
 0xe74   :  { %4290 = vbcast.lane.b32.xlu0 %v4288_v47, 256 }
 0xe78   :  { %4301 = vbcast.lane.b32.xlu0 %v4299_v36, 256 }
 0xe7c   :  { %4331 = vperm.xlu0 %5497, %v4329_v14  }
 0xed2   :  { %v5571_v25 = vpop.permute.xlu1 %5570 }
 0xed3   :  { %v5573_v38 = vunpack.i.h.bf16 %v5571_v25  ;;  %v5572_v21 = vunpack.i.l.bf16 %v5571_v25 }
 0xed5   :  { %v3820_v7 = vsel %vm1132_vm3, %v3818_v1, %v5572_v21  ;;  %v3821_v44 = vsel %vm1132_vm3, %v3819_v16, %v5573_v38 }
 0xee2   :  { %v5576_v32 = vpop.permute.xlu0 %5575 }
 0xee3   :  { %v5578_v15 = vunpack.i.h.bf16 %v5576_v32  ;;  %v5577_v6 = vunpack.i.l.bf16 %v5576_v32  ;;  %v4279_v35 = vpop.permute.xlu1 %4278 }
 0xee5   :  { %v3822_v2 = vsel %vm1474_vm10, %v3820_v7, %v5577_v6  ;;  %v3823_v53 = vsel %vm1474_vm10, %v3821_v44, %v5578_v15  ;;  %v5678_v7 = vld [vmem:[%s8157_s16 + $0x10] sm:$0xff]  }
 0xee6   :  { %v3824_v20 = vpack.c.bf16 %v3823_v53, %v3822_v2  ;;  %v4291_v5 = vpop.permute.xlu0 %4290 }
 0xee7   :  { %v4295_v4 = vpop.permute.xlu1 %4294 }
 0xee8   :  { %5363 = vmatmul.mubr.bf16.vlgmr.msra.gmra.mrb[44].mxu1 %v3824_v20  ;;  %5383 = vmatmul.mubr.bf16.vlgmr.msra.gmra.mrb[40].mxu0 %v3824_v20 }
 0xee9   :  { %5387 = vmatpush3.bf16.msra.mxu1 %v5670_v57  ;;  %5402 = vmatprep.mubr.msk.bf16.mxu1 %vm5747_vm2, %v8632_v62 }
 0xeea   :  { %5388 = vmatprep.subr.bf16.mxu1 %v8632_v62  ;;  %5408 = vmatprep.mubr.msk.bf16.mxu0 %vm5747_vm2, %v8632_v62  ;;  %v4302_v24 = vpop.permute.xlu0 %4301 }
 0xeeb   :  { %v4306_v40 = vpop.permute.xlu1 %4305 }
 0xeed   :  { %5389 = vmatpush3.bf16.msra.mxu1 %v5671_v11 }
 0xeee   :  { %5390 = vmatprep.subr.bf16.mxu1 %v8632_v62 }
 0xef1   :  { %5391 = vmatpush3.bf16.msra.mxu1 %v5672_v19 }
 0xef2   :  { %5392 = vmatprep.subr.bf16.mxu1 %v8632_v62 }
 0xef5   :  { %5393 = vmatpush3.bf16.msra.mxu1 %v5673_v22 }
 0xef6   :  { %5394 = vmatprep.subr.bf16.mxu1 %v8632_v62 }
 0xef9   :  { %5395 = vmatpush3.bf16.msra.mxu1 %v5674_v54 }
 0xefa   :  { %5396 = vmatprep.subr.bf16.mxu1 %v8632_v62 }
 0xefd   :  { %5397 = vmatpush3.bf16.msra.mxu1 %v5675_v55 }
 0xefe   :  { %5398 = vmatprep.subr.bf16.mxu1 %v8632_v62 }
 0xf01   :  { %5399 = vmatpush3.bf16.msra.mxu1 %v5676_v37 }
 0xf02   :  { %5400 = vmatprep.subr.bf16.mxu1 %v8632_v62 }
 0xf05   :  { %5401 = vmatpush3.bf16.msra.mxu1 %v5677_v60 }
 0xf06   :  { %5436 = vmatprep.subr.bf16.mxu1 %v8632_v62 }
 0xf08   :  { %5403 = vmatmul.mubr.bf16.vlgmr.msra.gmra.mrb[48].mxu1 %v3824_v20 }
 0xf09   :  { %5440 = vmatprep.mubr.msk.bf16.mxu1 %vm5747_vm2, %v8632_v62 }
 0xfbb   :  { %v3987_v0 = vpop.f32.mrb[44].mxu1  ;;  %v4095_v10 = vpop.f32.mrb[40].mxu0 }
 0xfbc   :  { %v3994_v31 = vadd.f32 %v3987_v0, %v3886_v56  ;;  %v4102_v26 = vmul.f32 %v4095_v10, %v8638_v49  ;;  %v5364_v33 = vpop.f32.mrb[45].mxu1  ;;  %v5384_v43 = vpop.f32.mrb[41].mxu0 }
 0xfbd   :  { %v3990_v42 = vpop.f32.mrb[46].mxu1  ;;  %v4098_v28 = vpop.f32.mrb[42].mxu0  ;;  %v5682_v33 = vld [vmem:[%s8157_s16 + $0x20] sm:$0xff]  }
 0xfbe   :  { %v4104_v58 = vadd.f32 %v4102_v26, %v3994_v31  ;;  %v3995_v46 = vadd.f32 %v3990_v42, %v3887_v27  ;;  %v4103_v29 = vmul.f32 %v4098_v28, %v8639_v48  ;;  %v5365_v3 = vpop.f32.mrb[47].mxu1  ;;  %v5385_v9 = vpop.f32.mrb[43].mxu0  ;;  %v5680_v27 = vld [vmem:[%s8157_s16] sm:$0xff]   ;;  %v5681_v26 = vld [vmem:[%s8157_s16 + $0x8] sm:$0xff]  }
 0xfbf   :  { %v4332_v42 = vpop.permute.xlu0 %4331  ;;  %v5683_v28 = vld [vmem:[%s8157_s16 + $0x28] sm:$0xff]   ;;  %v5684_v48 = vld [vmem:[%s8159_s18] sm:$0xff]  }
 0xfc0   :  { %v4105_v8 = vadd.f32 %v4103_v29, %v3995_v46  ;;  %5437 = vmatpush3.bf16.msra.mxu1 %v5684_v48  ;;  %v5685_v29 = vld [vmem:[%s8159_s18 + $0x8] sm:$0xff]  }
 0xfc1   :  { %5438 = vmatprep.subr.bf16.mxu1 %v8632_v62 }
 0xfc4   :  { %5439 = vmatpush3.bf16.msra.mxu1 %v5685_v29 }
 0xfdb   :  { %v4205_v47 = vpop.f32.mrb[48].mxu1 }
 0xfdc   :  { %v4212_v13 = vmul.f32 %v4205_v47, %v8640_v51  ;;  %v5404_v59 = vpop.f32.mrb[49].mxu1 }
 0xfdd   :  { %v4208_v18 = vpop.f32.mrb[50].mxu1 }
 0xfde   :  { %v4214_v61 = vadd.f32 %v4212_v13, %v4104_v58  ;;  %v4213_v36 = vmul.f32 %v4208_v18, %v8641_v30  ;;  %v5405_v50 = vpop.f32.mrb[51].mxu1 }
 0xfe0   :  { %v4224_v45 = vadd.f32 %v4886_v39, %v4214_v61  ;;  %v4215_v34 = vadd.f32 %v4213_v36, %v4105_v8 }
 0xfe2   :  { %v4225_v14 = vadd.f32 %v4886_v39, %v4215_v34  ;;  %v4307_v52 = vadd.f32 %v4291_v5, %v4224_v45  ;;  %v4309_v25 = vadd.f32 %v4302_v24, %v4224_v45  ;;  %v4898_v39 = vld [vmem:[%s8158_s17] ss:$0 sm:$0xff]  ;;  %s5721_s17 = scalar_lea.vmem %s4605_s29, 32 }
 0xfe3   :  { %v4899_v34 = vld [vmem:[%s8160_s19] ss:$0 sm:$0xff]  ;;  %p5722_p0 = scmp.ne.s32.totalorder %s4605_s29, %s5721_s17  ;;  %p5727_p2 = scmp.lt.s32.totalorder %s5721_s17, %s5721_s17 }
 0xfe4   :  { %v4308_v63 = vadd.f32 %v4295_v4, %v4225_v14  ;;  %v4310_v23 = vadd.f32 %v4306_v40, %v4225_v14  ;;  %v4230_v38 = vpack.c.bf16 %v4225_v14, %v4224_v45  ;;  %v4311_v21 = vsel %vm434_vm0, %v4307_v52, -inf }
 0xfe5   :  { %v4320_v16 = vsel %vm434_vm0, %v4309_v25, -inf  ;;  %p5728_p3 = por %p5727_p2, %p5726_p1 }
 0xfe6   :  { %v4312_v32 = vsel %vm434_vm0, %v4308_v63, -inf  ;;  %v4321_v1 = vsel %vm434_vm0, %v4310_v23, -inf  ;;  %5407 = vmatpush3.bf16.msra.mxu0 %v4230_v38 }
 0xfe7   :  { %v4313_v15 = vmax.f32 %v4311_v21, %v4312_v32  ;;  %v4322_v6 = vmax.f32 %v4320_v16, %v4321_v1  ;;  %5412 = vmatprep.subr.bf16.mxu0 %v8632_v62  ;;  %p5729_p4 = pnand %p5728_p3, %p5722_p0 }
 0xfe9   :  { %v4314_v44 = vrot.slane %v4313_v15, 4  ;;  %v4323_v2 = vrot.slane %v4322_v6, 4  ;;  %5409 = vmatmul.mubr.msk.bf16.vlgmr.msra.gmra.mrb[44].mxu0 %vm649_vm1, %v7970_v17  ;;  %v5679_v17 = vld [vmem:[%s8157_s16 + $0x18] sm:$0xff]   ;;  %vm4333_vm1 = vcmp.eq.s32.totalorder %v4332_v42, 1 }
 0xfea   :  { %5413 = vmatpush3.bf16.msra.mxu0 %v5678_v7  ;;  %5416 = vmatprep.mubr.msk.bf16.mxu0 %vm5747_vm2, %v8632_v62 }
 0xfeb   :  { %v4315_v53 = vmax.f32 %v4313_v15, %v4314_v44  ;;  %v4324_v57 = vmax.f32 %v4322_v6, %v4323_v2  ;;  %5414 = vmatprep.subr.bf16.mxu0 %v8632_v62 }
 0xfed   :  { %v4316_v20 = vrot.slane %v4315_v53, 2  ;;  %v4325_v11 = vrot.slane %v4324_v57, 2 }
 0xfee   :  { %5415 = vmatpush3.bf16.msra.mxu0 %v5679_v17 }
 0xfef   :  { %v4317_v19 = vmax.f32 %v4315_v53, %v4316_v20  ;;  %v4326_v22 = vmax.f32 %v4324_v57, %v4325_v11  ;;  %5420 = vmatprep.subr.bf16.mxu0 %v8632_v62 }
 0xff1   :  { %v4318_v54 = vrot.slane %v4317_v19, 1  ;;  %v4327_v55 = vrot.slane %v4326_v22, 1 }
 0xff3   :  { %v4319_v37 = vmax.f32 %v4317_v19, %v4318_v54  ;;  %v4328_v60 = vmax.f32 %v4326_v22, %v4327_v55 }
 0xff5   :  { %v4336_v12 = vsel %vm1367_vm4, %v4328_v60, %v4319_v37 }
 0xff6   :  { %v4338_v58 = vsel %vm4333_vm1, %v4336_v12, 0.0 }
 0xff7   :  { %v4463_v46 = vpack.c.bf16 %v4338_v58, %v4338_v58 }
0x10bc   :  { %v4268_v56 = vpop.f32.mrb[44].mxu0 }
0x10bd   :  { %v4281_v0 = vmul.f32 %v4279_v35, %v4268_v56  ;;  %v5410_v10 = vpop.f32.mrb[45].mxu0  ;;  %v4351_v43 = vpack.c.bf16 %v4268_v56, %v4268_v56 }
0x10be   :  { %v4271_v41 = vpop.f32.mrb[46].mxu0 }
0x10bf   :  { %v4352_v31 = vpack.c.bf16 %v4281_v0, %v4281_v0  ;;  %v5411_v49 = vpop.f32.mrb[47].mxu0 }
0x10c1   :  { %5417 = vmatmul.mubr.msk.bf16.vlgmr.msra.gmra.mrb[48].mxu0 %vm434_vm0, %v4352_v31 }
0x10c2   :  { %5421 = vmatpush3.bf16.msra.mxu0 %v5680_v27  ;;  %5424 = vmatprep.mubr.msk.bf16.mxu0 %vm5747_vm2, %v8632_v62 }
0x10c3   :  { %5422 = vmatprep.subr.bf16.mxu0 %v8632_v62 }
0x10c6   :  { %5423 = vmatpush3.bf16.msra.mxu0 %v5681_v26 }
0x10c7   :  { %5428 = vmatprep.subr.bf16.mxu0 %v8632_v62 }
0x10c9   :  { %5425 = vmatmul.mubr.msk.bf16.vlgmr.msra.gmra.mrb[52].mxu0 %vm434_vm0, %v4351_v43 }
0x10ca   :  { %5429 = vmatpush3.bf16.msra.mxu0 %v5682_v33  ;;  %5432 = vmatprep.mubr.msk.bf16.mxu0 %vm5747_vm2, %v8632_v62  ;;  %vm4596_vm2 = vcmask 25600  }
0x10cb   :  { %5430 = vmatprep.subr.bf16.mxu0 %v8632_v62 }
0x10ce   :  { %5431 = vmatpush3.bf16.msra.mxu0 %v5683_v28 }
0x10d1   :  { %5433 = vmatmul.mubr.msk.bf16.vlgmr.msra.gmra.mrb[56].mxu0 %vm434_vm0, %v4463_v46 }
0x1194   :  { %v4402_v3 = vpop.f32.mrb[48].mxu0 }
0x1195   :  { %v5418_v9 = vpop.f32.mrb[49].mxu0 }
0x1196   :  { %v4405_v8 = vpop.f32.mrb[50].mxu0 }
0x1197   :  { %v5419_v35 = vpop.f32.mrb[51].mxu0 }
0x119c   :  { %v4457_v5 = vpop.f32.mrb[52].mxu0 }
0x119d   :  { %v4458_v47 = vadd.f32 %v4457_v5, %v4402_v3  ;;  %v5426_v4 = vpop.f32.mrb[53].mxu0 }
0x119e   :  { %v4460_v51 = vpop.f32.mrb[54].mxu0 }
0x119f   :  { %v5427_v13 = vpop.f32.mrb[55].mxu0 }
0x11a4   :  { %v4513_v59 = vpop.f32.mrb[56].mxu0 }
0x11a5   :  { %v4519_v18 = vadd.f32 %v4513_v59, %v4458_v47  ;;  %v5434_v61 = vpop.f32.mrb[57].mxu0 }
0x11a6   :  { %v4516_v30 = vpop.f32.mrb[58].mxu0 }
0x11a7   :  { %v4527_v36 = vadd.f32 %v4898_v39, %v4519_v18  ;;  %v5435_v62 = vpop.f32.mrb[59].mxu0 }
0x11a9   :  { %v4528_v50 = vmax.f32 %v4527_v36, 0.0 }
0x11ab   :  { %v4529_v45 = vpack.c.bf16 %v4528_v50, %v4528_v50 }
0x11ad   :  { %5441 = vmatmul.mubr.msk.bf16.vlgmr.msra.gmra.mrb[52].mxu1 %vm434_vm0, %v4529_v45 }
0x1280   :  { %v4590_v24 = vpop.f32.mrb[52].mxu1 }
0x1281   :  { %v4591_v40 = vadd.f32 %v4899_v34, %v4590_v24  ;;  %v5442_v14 = vpop.f32.mrb[53].mxu1 }
0x1282   :  { %v4593_v52 = vpop.f32.mrb[54].mxu1 }
0x1283   :  { %v5443_v25 = vpop.f32.mrb[55].mxu1  ;;  %4597 = vst.msk [vmem:[#allocation2] sm:$0x3] %vm4596_vm2, %v4591_v40 }
0x1284   :  { %5732 = shalt.err (!%p5729_p4)
}
0x1285   :  { %s5733_s19 = scalar_lea.hbm %s8161_s20, 32 }
0x1286   :  { %p5734_p5 = scmp.ne.s32.totalorder %s8161_s20, %s5733_s19  ;;  %p5737_p6 = scmp.lt.u32.totalorder %s5733_s19, %s8161_s20 }
0x1288   :  { %p5739_p7 = pnand %p5737_p6, %p5734_p5 }
0x128a   :  { %5742 = shalt.err (!%p5739_p7)
}
0x128b   :  { %4607 = dma.vmem_to_hbm [thread:$0]  %s4605_s29, 32, %s8161_s20, [#allocation3]  }
0x128c   :  { %5743 = dma.done.wait [#allocation3], 32  }
0x128d   :  { %5744 = vsyncadd [#allocation3], 4294967264 }
0x128e   :  { %4611 = vsyncpa [#allocation3], 1 }

</bundles_post_ra>
